<compile_context>
chip_gen: v5e
topology: v5e:2x2
jax: 0.10.0
libtpu: 0.0.40
codegen_flags: <defaults>
</compile_context>

<pallas_src>
import jax
import jax.numpy as jnp
from jax import lax
from jax.experimental import pallas as pl
from jax.experimental.pallas import tpu as pltpu


# ----------------------------- config (small, synthetic) -------------------
VOCAB = 512
HIDDEN = 128
N_HEADS = 4
HEAD_DIM = HIDDEN // N_HEADS          # 32
FFN = 256
N_LAYERS = 2
SEQ = 8
SEQ_PAD = 16                          # pad seq so bf16 intermediates fill a (16,128) vreg
EPS = 1e-6
NEG_INF = -1e30


def _rmsnorm(x, w):
    # x: [S, H] f32, w: [1, H] f32
    var = jnp.mean(x * x, axis=-1, keepdims=True)
    return x * lax.rsqrt(var + EPS) * w


# -------------------- fused whole-stack decoder kernel ----------------------
def decoder_stack_kernel(ids_ref, embed_ref, cos_ref, sin_ref, mask_ref,
                         anorm_ref, wqkv_ref, wo_ref,
                         mnorm_ref, wgu_ref, wd_ref,
                         x_ref):
    """grid=(N_LAYERS,).  x_ref (the output block) is the resident activation."""
    l = pl.program_id(0)
    S, H = SEQ_PAD, HIDDEN
    nH, Dh = N_HEADS, HEAD_DIM

    @pl.when(l == 0)
    def _():
        # Embedding gather folded in: lane-dense one-hot matmul on the MXU
        # (avoids dynamic row indexing and an XLA-side gather round-trip).
        tok = ids_ref[...]                                           # [S, 1] i32
        vocab_iota = lax.broadcasted_iota(jnp.int32, (S, VOCAB), 1)
        onehot = (vocab_iota == tok).astype(jnp.bfloat16)            # [S, V]
        x_ref[...] = jnp.dot(onehot, embed_ref[...],
                             preferred_element_type=jnp.float32)     # [S, H] f32

    x = x_ref[...]                                                   # f32 residual

    # ----------------------- attention sub-layer ----------------------------
    h = _rmsnorm(x, anorm_ref[...])
    qkv = jnp.dot(h.astype(jnp.bfloat16), wqkv_ref[...],
                  preferred_element_type=jnp.float32)                # [S, 3H]
    q = qkv[:, :H].reshape(S, nH, Dh)
    k = qkv[:, H:2 * H].reshape(S, nH, Dh)
    v = qkv[:, 2 * H:].reshape(S, nH, Dh)

    cos = cos_ref[...][:, None, :]        # [S, 1, Dh]
    sin_s = sin_ref[...][:, None, :]      # sign-folded sin: no in-kernel negate

    def rot_half(t):                      # plain half-rotation; sign lives in sin_s
        return jnp.concatenate([t[..., Dh // 2:], t[..., :Dh // 2]], axis=-1)

    q = q * cos + rot_half(q) * sin_s
    k = k * cos + rot_half(k) * sin_s

    scale = 1.0 / jnp.sqrt(jnp.float32(Dh))
    # TODO(synk): at real seq lengths this [h, s, t] layout should be re-tiled
    # so k_pos sits lane-dense (>=128) — fine at this toy size.
    scores = jnp.einsum("shd,thd->hst", q, k,
                        preferred_element_type=jnp.float32) * scale
    scores = scores + mask_ref[...][None, :, :]                      # additive causal
    m = jnp.max(scores, axis=-1, keepdims=True)
    p = jnp.exp(scores - m)
    p = p / jnp.sum(p, axis=-1, keepdims=True)                       # exact divide
    ctx = jnp.einsum("hst,thd->shd", p, v,
                     preferred_element_type=jnp.float32).reshape(S, H)
    x = x + jnp.dot(ctx.astype(jnp.bfloat16), wo_ref[...],
                    preferred_element_type=jnp.float32)

    # ------------------------- SwiGLU MLP sub-layer --------------------------
    h2 = _rmsnorm(x, mnorm_ref[...])
    gu = jnp.dot(h2.astype(jnp.bfloat16), wgu_ref[...],
                 preferred_element_type=jnp.float32)                 # [S, 2F]
    g = gu[:, :FFN]
    u = gu[:, FFN:]
    act = (g * jax.nn.sigmoid(g)) * u                                # SiLU(g) * u, f32
    x = x + jnp.dot(act.astype(jnp.bfloat16), wd_ref[...],
                    preferred_element_type=jnp.float32)

    x_ref[...] = x                                                   # stays in VMEM across layers


def decoder_stack(ids_pad, embed, cos, sin_signed, mask,
                  attn_norm, wqkv, wo, mlp_norm, wgu, wd):
    S, H = SEQ_PAD, HIDDEN
    return pl.pallas_call(
        decoder_stack_kernel,
        out_shape=jax.ShapeDtypeStruct((S, H), jnp.float32),
        grid_spec=pltpu.PrefetchScalarGridSpec(
            num_scalar_prefetch=0,
            grid=(N_LAYERS,),
            in_specs=[
                pl.BlockSpec((S, 1), lambda l: (0, 0)),                 # token ids
                pl.BlockSpec((VOCAB, H), lambda l: (0, 0)),             # embed (bf16)
                pl.BlockSpec((S, HEAD_DIM), lambda l: (0, 0)),          # cos
                pl.BlockSpec((S, HEAD_DIM), lambda l: (0, 0)),          # sin (sign-folded)
                pl.BlockSpec((S, S), lambda l: (0, 0)),                 # causal mask (additive)
                pl.BlockSpec((None, 1, H), lambda l: (l, 0, 0)),        # attn_norm
                pl.BlockSpec((None, H, 3 * H), lambda l: (l, 0, 0)),    # wqkv fused
                pl.BlockSpec((None, H, H), lambda l: (l, 0, 0)),        # wo
                pl.BlockSpec((None, 1, H), lambda l: (l, 0, 0)),        # mlp_norm
                pl.BlockSpec((None, H, 2 * FFN), lambda l: (l, 0, 0)),  # gate/up fused
                pl.BlockSpec((None, FFN, H), lambda l: (l, 0, 0)),      # down
            ],
            out_specs=pl.BlockSpec((S, H), lambda l: (0, 0)),           # resident activation
        ),
        compiler_params=pltpu.CompilerParams(
            dimension_semantics=("arbitrary",)),
    )(ids_pad, embed, cos, sin_signed, mask, attn_norm, wqkv, wo, mlp_norm, wgu, wd)


# ------------------- LM head (final RMSNorm fused, vocab-tiled) --------------
def lm_head_kernel(x_ref, norm_ref, w_ref, o_ref):
    h = _rmsnorm(x_ref[...], norm_ref[...])
    o_ref[...] = jnp.dot(h.astype(jnp.bfloat16), w_ref[...],
                         preferred_element_type=jnp.float32).astype(o_ref.dtype)


def lm_head(x, norm, w, *, tile_v=256):
    S, H = x.shape
    V = w.shape[1]
    return pl.pallas_call(
        lm_head_kernel,
        out_shape=jax.ShapeDtypeStruct((S, V), jnp.float32),
        grid_spec=pltpu.PrefetchScalarGridSpec(
            num_scalar_prefetch=0,
            grid=(V // tile_v,),
            in_specs=[pl.BlockSpec((S, H), lambda j: (0, 0)),
                      pl.BlockSpec((1, H), lambda j: (0, 0)),
                      pl.BlockSpec((H, tile_v), lambda j: (0, j))],
            out_specs=pl.BlockSpec((S, tile_v), lambda j: (0, j)),
        ),
        compiler_params=pltpu.CompilerParams(
            dimension_semantics=("parallel",)),
    )(x, norm.reshape(1, H), w)


# ------------------------------- model glue ---------------------------------
def init_params(key):
    ks = iter(jax.random.split(key, 2 + 4 * N_LAYERS))
    scale = 0.02

    def rnd(shape):
        return (scale * jax.random.normal(next(ks), shape, jnp.float32)
                ).astype(jnp.bfloat16)

    return {
        "embed": rnd((VOCAB, HIDDEN)),
        "lm_head": rnd((HIDDEN, VOCAB)),
        "final_norm": jnp.ones((HIDDEN,), jnp.float32),
        "attn_norm": jnp.ones((N_LAYERS, 1, HIDDEN), jnp.float32),
        "mlp_norm": jnp.ones((N_LAYERS, 1, HIDDEN), jnp.float32),
        "wqkv": rnd((N_LAYERS, HIDDEN, 3 * HIDDEN)),
        "wo": rnd((N_LAYERS, HIDDEN, HIDDEN)),
        "wgu": rnd((N_LAYERS, HIDDEN, 2 * FFN)),
        "wd": rnd((N_LAYERS, FFN, HIDDEN)),
    }


def rope_tables(seq, dim):
    inv_freq = 1.0 / (10000.0 ** (jnp.arange(0, dim, 2, dtype=jnp.float32) / dim))
    t = jnp.arange(seq, dtype=jnp.float32)
    freqs = jnp.einsum("s,d->sd", t, inv_freq)          # [S, dim/2]
    emb = jnp.concatenate([freqs, freqs], axis=-1)      # [S, dim]
    # fold rotate_half's (-,+) sign into sin so the kernel skips the negate
    sign = jnp.concatenate([-jnp.ones((dim // 2,), jnp.float32),
                            jnp.ones((dim // 2,), jnp.float32)])
    return jnp.cos(emb), jnp.sin(emb) * sign[None, :]


def causal_mask(s):
    row = lax.broadcasted_iota(jnp.int32, (s, s), 0)
    col = lax.broadcasted_iota(jnp.int32, (s, s), 1)
    return jnp.where(col <= row, 0.0, NEG_INF).astype(jnp.float32)


@jax.jit
def vicuna_forward(params, token_ids):
    cos, sin_signed = rope_tables(SEQ_PAD, HEAD_DIM)
    mask = causal_mask(SEQ_PAD)
    ids_pad = jnp.zeros((SEQ_PAD,), jnp.int32).at[:SEQ].set(token_ids)
    ids_pad = ids_pad.reshape(SEQ_PAD, 1)

    x_final = decoder_stack(ids_pad, params["embed"], cos, sin_signed, mask,
                            params["attn_norm"], params["wqkv"], params["wo"],
                            params["mlp_norm"], params["wgu"], params["wd"])

    # Full-sequence logits kept to preserve the forward's output; for pure
    # autoregressive decode only x_final[SEQ-1:SEQ] would need the LM head.
    logits = lm_head(x_final, params["final_norm"], params["lm_head"])[:SEQ]

    # temperature=0 greedy next-token (single decode step of .generate())
    next_token = jnp.argmax(logits[-1], axis=-1)
    return logits, next_token


if __name__ == "__main__":
    key = jax.random.PRNGKey(0)
    k_param, k_ids = jax.random.split(key)
    params = init_params(k_param)
    token_ids = jax.random.randint(k_ids, (SEQ,), 0, VOCAB, dtype=jnp.int32)

    logits, next_token = vicuna_forward(params, token_ids)
    jax.block_until_ready((logits, next_token))

    assert logits.shape == (SEQ, VOCAB)
    assert bool(jnp.isfinite(logits).all())
    print("KERNEL_OK")
</pallas_src>

<mosaic_0001>
module attributes {stable_mosaic.version = 11 : i64} {
  func.func @decoder_stack_kernel(%arg0: i32, %arg1: memref<16x1xi32, #tpu.memory_space<vmem>>, %arg2: memref<512x128xbf16, #tpu.memory_space<vmem>>, %arg3: memref<16x32xf32, #tpu.memory_space<vmem>>, %arg4: memref<16x32xf32, #tpu.memory_space<vmem>>, %arg5: memref<16x16xf32, #tpu.memory_space<vmem>>, %arg6: memref<1x1x128xf32, #tpu.memory_space<vmem>>, %arg7: memref<1x128x384xbf16, #tpu.memory_space<vmem>>, %arg8: memref<1x128x128xbf16, #tpu.memory_space<vmem>>, %arg9: memref<1x1x128xf32, #tpu.memory_space<vmem>>, %arg10: memref<1x128x512xbf16, #tpu.memory_space<vmem>>, %arg11: memref<1x256x128xbf16, #tpu.memory_space<vmem>>, %arg12: memref<16x128xf32, #tpu.memory_space<vmem>>) attributes {dimension_semantics = [#tpu.dimension_semantics<arbitrary>], iteration_bounds = array<i64: 2>, scalar_prefetch = 0 : i64, scratch_operands = 0 : i64, tpu.core_type = #tpu.core_type<tc>, window_params = [{pipeline_mode = #tpu.pipeline_mode<synchronous>, transform_indices = @transform_0, window_bounds = array<i64: 16, 1>}, {pipeline_mode = #tpu.pipeline_mode<synchronous>, transform_indices = @transform_1, window_bounds = array<i64: 512, 128>}, {pipeline_mode = #tpu.pipeline_mode<synchronous>, transform_indices = @transform_2, window_bounds = array<i64: 16, 32>}, {pipeline_mode = #tpu.pipeline_mode<synchronous>, transform_indices = @transform_3, window_bounds = array<i64: 16, 32>}, {pipeline_mode = #tpu.pipeline_mode<synchronous>, transform_indices = @transform_4, window_bounds = array<i64: 16, 16>}, {transform_indices = @transform_5, window_bounds = array<i64: 1, 1, 128>}, {transform_indices = @transform_6, window_bounds = array<i64: 1, 128, 384>}, {transform_indices = @transform_7, window_bounds = array<i64: 1, 128, 128>}, {transform_indices = @transform_8, window_bounds = array<i64: 1, 1, 128>}, {transform_indices = @transform_9, window_bounds = array<i64: 1, 128, 512>}, {transform_indices = @transform_10, window_bounds = array<i64: 1, 256, 128>}, {pipeline_mode = #tpu.pipeline_mode<synchronous>, transform_indices = @transform_11, window_bounds = array<i64: 16, 128>}]} {
    %c0_i32 = arith.constant 0 : i32
    %0 = arith.cmpi eq, %arg0, %c0_i32 : i32
    %1 = arith.extui %0 : i1 to i32
    %c0_i32_0 = arith.constant 0 : i32
    %2 = arith.cmpi ne, %1, %c0_i32_0 : i32
    scf.if %2 {
      %c0_44 = arith.constant 0 : index
      %c0_45 = arith.constant 0 : index
      %107 = vector.load %arg1[%c0_44, %c0_45] : memref<16x1xi32, #tpu.memory_space<vmem>>, vector<16x1xi32>
      %108 = tpu.iota {dimensions = array<i32: 1>} : vector<16x512xi32>
      %109 = vector.broadcast %107 : vector<16x1xi32> to vector<16x512xi32>
      %110 = arith.cmpi eq, %108, %109 : vector<16x512xi32>
      %111 = arith.extui %110 : vector<16x512xi1> to vector<16x512xi32>
      %112 = arith.sitofp %111 : vector<16x512xi32> to vector<16x512xf32>
      %113 = arith.truncf %112 : vector<16x512xf32> to vector<16x512xbf16>
      %c0_46 = arith.constant 0 : index
      %c0_47 = arith.constant 0 : index
      %114 = vector.load %arg2[%c0_46, %c0_47] : memref<512x128xbf16, #tpu.memory_space<vmem>>, vector<512x128xbf16>
      %cst_48 = arith.constant dense<0.000000e+00> : vector<16x128xf32>
      %115 = tpu.matmul %113, %114, %cst_48 {dimension_numbers = #tpu.dot_dimension_numbers<[1], [0], [0], [1], [0, 0, 1, 1], [], []>} : vector<16x512xbf16>, vector<512x128xbf16>, vector<16x128xf32> -> vector<16x128xf32>
      %c0_49 = arith.constant 0 : index
      %c0_50 = arith.constant 0 : index
      %116 = vector.load %arg12[%c0_49, %c0_50] : memref<16x128xf32, #tpu.memory_space<vmem>>, vector<16x128xf32>
      tpu.vector_store %arg12[%c0_49, %c0_50], %115 {strides = array<i32>} : memref<16x128xf32, #tpu.memory_space<vmem>>, vector<16x128xf32>,
    } else {
    }
    %c0 = arith.constant 0 : index
    %c0_1 = arith.constant 0 : index
    %3 = vector.load %arg12[%c0, %c0_1] : memref<16x128xf32, #tpu.memory_space<vmem>>, vector<16x128xf32>
    %c0_2 = arith.constant 0 : index
    %c0_3 = arith.constant 0 : index
    %c0_4 = arith.constant 0 : index
    %4 = vector.load %arg6[%c0_2, %c0_3, %c0_4] : memref<1x1x128xf32, #tpu.memory_space<vmem>>, vector<1x1x128xf32>
    %5 = vector.shape_cast %4 : vector<1x1x128xf32> to vector<1x128xf32>
    %6 = arith.mulf %3, %3 : vector<16x128xf32>
    %cst = arith.constant dense<0.000000e+00> : vector<16xf32>
    %7 = vector.multi_reduction <add>, %6, %cst [1] : vector<16x128xf32> to vector<16xf32>
    %8 = vector.shape_cast %7 : vector<16xf32> to vector<16x1xf32>
    %cst_5 = arith.constant 1.280000e+02 : f32
    %9 = vector.broadcast %cst_5 : f32 to vector<16x1xf32>
    %10 = arith.divf %8, %9 : vector<16x1xf32>
    %cst_6 = arith.constant 9.99999997E-7 : f32
    %11 = vector.broadcast %cst_6 : f32 to vector<16x1xf32>
    %12 = arith.addf %10, %11 : vector<16x1xf32>
    %13 = math.rsqrt %12 : vector<16x1xf32>
    %14 = vector.broadcast %13 : vector<16x1xf32> to vector<16x128xf32>
    %15 = arith.mulf %3, %14 : vector<16x128xf32>
    %16 = vector.broadcast %5 : vector<1x128xf32> to vector<16x128xf32>
    %17 = arith.mulf %15, %16 : vector<16x128xf32>
    %18 = arith.truncf %17 : vector<16x128xf32> to vector<16x128xbf16>
    %c0_7 = arith.constant 0 : index
    %c0_8 = arith.constant 0 : index
    %c0_9 = arith.constant 0 : index
    %19 = vector.load %arg7[%c0_7, %c0_8, %c0_9] : memref<1x128x384xbf16, #tpu.memory_space<vmem>>, vector<1x128x384xbf16>
    %20 = vector.shape_cast %19 : vector<1x128x384xbf16> to vector<128x384xbf16>
    %cst_10 = arith.constant dense<0.000000e+00> : vector<16x384xf32>
    %21 = tpu.matmul %18, %20, %cst_10 {dimension_numbers = #tpu.dot_dimension_numbers<[1], [0], [0], [1], [0, 0, 1, 1], [], []>} : vector<16x128xbf16>, vector<128x384xbf16>, vector<16x384xf32> -> vector<16x384xf32>
    %22 = vector.extract_strided_slice %21 {offsets = [0, 0], sizes = [16, 128], strides = [1, 1]} : vector<16x384xf32> to vector<16x128xf32>
    %23 = vector.shape_cast %22 : vector<16x128xf32> to vector<16x4x32xf32>
    %24 = vector.extract_strided_slice %21 {offsets = [0, 128], sizes = [16, 128], strides = [1, 1]} : vector<16x384xf32> to vector<16x128xf32>
    %25 = vector.shape_cast %24 : vector<16x128xf32> to vector<16x4x32xf32>
    %26 = vector.extract_strided_slice %21 {offsets = [0, 256], sizes = [16, 128], strides = [1, 1]} : vector<16x384xf32> to vector<16x128xf32>
    %27 = vector.shape_cast %26 : vector<16x128xf32> to vector<16x4x32xf32>
    %c0_11 = arith.constant 0 : index
    %c0_12 = arith.constant 0 : index
    %28 = vector.load %arg3[%c0_11, %c0_12] : memref<16x32xf32, #tpu.memory_space<vmem>>, vector<16x32xf32>
    %29 = vector.shape_cast %28 : vector<16x32xf32> to vector<16x1x32xf32>
    %c0_13 = arith.constant 0 : index
    %c0_14 = arith.constant 0 : index
    %30 = vector.load %arg4[%c0_13, %c0_14] : memref<16x32xf32, #tpu.memory_space<vmem>>, vector<16x32xf32>
    %31 = vector.shape_cast %30 : vector<16x32xf32> to vector<16x1x32xf32>
    %32 = vector.broadcast %29 : vector<16x1x32xf32> to vector<16x4x32xf32>
    %33 = arith.mulf %23, %32 : vector<16x4x32xf32>
    %34 = vector.extract_strided_slice %23 {offsets = [0, 0, 16], sizes = [16, 4, 16], strides = [1, 1, 1]} : vector<16x4x32xf32> to vector<16x4x16xf32>
    %35 = vector.extract_strided_slice %23 {offsets = [0, 0, 0], sizes = [16, 4, 16], strides = [1, 1, 1]} : vector<16x4x32xf32> to vector<16x4x16xf32>
    %36 = tpu.concatenate %34, %35 in 2 : vector<16x4x16xf32>, vector<16x4x16xf32> -> vector<16x4x32xf32>
    %37 = vector.broadcast %31 : vector<16x1x32xf32> to vector<16x4x32xf32>
    %38 = arith.mulf %36, %37 : vector<16x4x32xf32>
    %39 = arith.addf %33, %38 : vector<16x4x32xf32>
    %40 = vector.broadcast %29 : vector<16x1x32xf32> to vector<16x4x32xf32>
    %41 = arith.mulf %25, %40 : vector<16x4x32xf32>
    %42 = vector.extract_strided_slice %25 {offsets = [0, 0, 16], sizes = [16, 4, 16], strides = [1, 1, 1]} : vector<16x4x32xf32> to vector<16x4x16xf32>
    %43 = vector.extract_strided_slice %25 {offsets = [0, 0, 0], sizes = [16, 4, 16], strides = [1, 1, 1]} : vector<16x4x32xf32> to vector<16x4x16xf32>
    %44 = tpu.concatenate %42, %43 in 2 : vector<16x4x16xf32>, vector<16x4x16xf32> -> vector<16x4x32xf32>
    %45 = vector.broadcast %31 : vector<16x1x32xf32> to vector<16x4x32xf32>
    %46 = arith.mulf %44, %45 : vector<16x4x32xf32>
    %47 = arith.addf %41, %46 : vector<16x4x32xf32>
    %cst_15 = arith.constant 3.200000e+01 : f32
    %48 = math.sqrt %cst_15 : f32
    %cst_16 = arith.constant 1.000000e+00 : f32
    %49 = arith.divf %cst_16, %48 : f32
    "tpu.trace_start"() <{level = 10 : i32, message = "shd,thd->hst"}> : () -> ()
    %cst_17 = arith.constant dense<0.000000e+00> : vector<4x16x16xf32>
    %50 = tpu.matmul %39, %47, %cst_17 {dimension_numbers = #tpu.dot_dimension_numbers<[2], [2], [0], [0], [0, 1, 0, 0, 1, 0], [1], [1]>} : vector<16x4x32xf32>, vector<16x4x32xf32>, vector<4x16x16xf32> -> vector<4x16x16xf32>
    "tpu.trace_stop"() : () -> ()
    %51 = vector.broadcast %49 : f32 to vector<4x16x16xf32>
    %52 = arith.mulf %50, %51 : vector<4x16x16xf32>
    %c0_18 = arith.constant 0 : index
    %c0_19 = arith.constant 0 : index
    %53 = vector.load %arg5[%c0_18, %c0_19] : memref<16x16xf32, #tpu.memory_space<vmem>>, vector<16x16xf32>
    %54 = vector.shape_cast %53 : vector<16x16xf32> to vector<1x16x16xf32>
    %55 = vector.broadcast %54 : vector<1x16x16xf32> to vector<4x16x16xf32>
    %56 = arith.addf %52, %55 : vector<4x16x16xf32>
    %cst_20 = arith.constant dense<0xFF800000> : vector<4x16xf32>
    %57 = vector.multi_reduction <maximumf>, %56, %cst_20 [2] : vector<4x16x16xf32> to vector<4x16xf32>
    %58 = vector.shape_cast %57 : vector<4x16xf32> to vector<4x16x1xf32>
    %59 = vector.broadcast %58 : vector<4x16x1xf32> to vector<4x16x16xf32>
    %60 = arith.subf %56, %59 : vector<4x16x16xf32>
    %61 = math.exp %60 : vector<4x16x16xf32>
    %cst_21 = arith.constant dense<0.000000e+00> : vector<4x16xf32>
    %62 = vector.multi_reduction <add>, %61, %cst_21 [2] : vector<4x16x16xf32> to vector<4x16xf32>
    %63 = vector.shape_cast %62 : vector<4x16xf32> to vector<4x16x1xf32>
    %64 = vector.broadcast %63 : vector<4x16x1xf32> to vector<4x16x16xf32>
    %65 = arith.divf %61, %64 : vector<4x16x16xf32>
    "tpu.trace_start"() <{level = 10 : i32, message = "hst,thd->shd"}> : () -> ()
    %cst_22 = arith.constant dense<0.000000e+00> : vector<4x32x16xf32>
    %66 = tpu.matmul %27, %65, %cst_22 {dimension_numbers = #tpu.dot_dimension_numbers<[0], [2], [2], [1], [0, 1, 0, 2, 1, 1], [1], [0]>} : vector<16x4x32xf32>, vector<4x16x16xf32>, vector<4x32x16xf32> -> vector<4x32x16xf32>
    %67 = tpu.transpose %66, [2, 0, 1] : vector<4x32x16xf32> -> vector<16x4x32xf32>
    "tpu.trace_stop"() : () -> ()
    %68 = vector.shape_cast %67 : vector<16x4x32xf32> to vector<16x128xf32>
    %69 = arith.truncf %68 : vector<16x128xf32> to vector<16x128xbf16>
    %c0_23 = arith.constant 0 : index
    %c0_24 = arith.constant 0 : index
    %c0_25 = arith.constant 0 : index
    %70 = vector.load %arg8[%c0_23, %c0_24, %c0_25] : memref<1x128x128xbf16, #tpu.memory_space<vmem>>, vector<1x128x128xbf16>
    %71 = vector.shape_cast %70 : vector<1x128x128xbf16> to vector<128x128xbf16>
    %cst_26 = arith.constant dense<0.000000e+00> : vector<16x128xf32>
    %72 = tpu.matmul %69, %71, %cst_26 {dimension_numbers = #tpu.dot_dimension_numbers<[1], [0], [0], [1], [0, 0, 1, 1], [], []>} : vector<16x128xbf16>, vector<128x128xbf16>, vector<16x128xf32> -> vector<16x128xf32>
    %73 = arith.addf %3, %72 : vector<16x128xf32>
    %c0_27 = arith.constant 0 : index
    %c0_28 = arith.constant 0 : index
    %c0_29 = arith.constant 0 : index
    %74 = vector.load %arg9[%c0_27, %c0_28, %c0_29] : memref<1x1x128xf32, #tpu.memory_space<vmem>>, vector<1x1x128xf32>
    %75 = vector.shape_cast %74 : vector<1x1x128xf32> to vector<1x128xf32>
    %76 = arith.mulf %73, %73 : vector<16x128xf32>
    %cst_30 = arith.constant dense<0.000000e+00> : vector<16xf32>
    %77 = vector.multi_reduction <add>, %76, %cst_30 [1] : vector<16x128xf32> to vector<16xf32>
    %78 = vector.shape_cast %77 : vector<16xf32> to vector<16x1xf32>
    %cst_31 = arith.constant 1.280000e+02 : f32
    %79 = vector.broadcast %cst_31 : f32 to vector<16x1xf32>
    %80 = arith.divf %78, %79 : vector<16x1xf32>
    %cst_32 = arith.constant 9.99999997E-7 : f32
    %81 = vector.broadcast %cst_32 : f32 to vector<16x1xf32>
    %82 = arith.addf %80, %81 : vector<16x1xf32>
    %83 = math.rsqrt %82 : vector<16x1xf32>
    %84 = vector.broadcast %83 : vector<16x1xf32> to vector<16x128xf32>
    %85 = arith.mulf %73, %84 : vector<16x128xf32>
    %86 = vector.broadcast %75 : vector<1x128xf32> to vector<16x128xf32>
    %87 = arith.mulf %85, %86 : vector<16x128xf32>
    %88 = arith.truncf %87 : vector<16x128xf32> to vector<16x128xbf16>
    %c0_33 = arith.constant 0 : index
    %c0_34 = arith.constant 0 : index
    %c0_35 = arith.constant 0 : index
    %89 = vector.load %arg10[%c0_33, %c0_34, %c0_35] : memref<1x128x512xbf16, #tpu.memory_space<vmem>>, vector<1x128x512xbf16>
    %90 = vector.shape_cast %89 : vector<1x128x512xbf16> to vector<128x512xbf16>
    %cst_36 = arith.constant dense<0.000000e+00> : vector<16x512xf32>
    %91 = tpu.matmul %88, %90, %cst_36 {dimension_numbers = #tpu.dot_dimension_numbers<[1], [0], [0], [1], [0, 0, 1, 1], [], []>} : vector<16x128xbf16>, vector<128x512xbf16>, vector<16x512xf32> -> vector<16x512xf32>
    %92 = vector.extract_strided_slice %91 {offsets = [0, 0], sizes = [16, 256], strides = [1, 1]} : vector<16x512xf32> to vector<16x256xf32>
    %93 = vector.extract_strided_slice %91 {offsets = [0, 256], sizes = [16, 256], strides = [1, 1]} : vector<16x512xf32> to vector<16x256xf32>
    %94 = arith.negf %92 : vector<16x256xf32>
    %95 = math.exp %94 : vector<16x256xf32>
    %cst_37 = arith.constant 1.000000e+00 : f32
    %96 = vector.broadcast %cst_37 : f32 to vector<16x256xf32>
    %97 = arith.addf %96, %95 : vector<16x256xf32>
    %98 = arith.divf %96, %97 : vector<16x256xf32>
    %99 = arith.mulf %92, %98 : vector<16x256xf32>
    %100 = arith.mulf %99, %93 : vector<16x256xf32>
    %101 = arith.truncf %100 : vector<16x256xf32> to vector<16x256xbf16>
    %c0_38 = arith.constant 0 : index
    %c0_39 = arith.constant 0 : index
    %c0_40 = arith.constant 0 : index
    %102 = vector.load %arg11[%c0_38, %c0_39, %c0_40] : memref<1x256x128xbf16, #tpu.memory_space<vmem>>, vector<1x256x128xbf16>
    %103 = vector.shape_cast %102 : vector<1x256x128xbf16> to vector<256x128xbf16>
    %cst_41 = arith.constant dense<0.000000e+00> : vector<16x128xf32>
    %104 = tpu.matmul %101, %103, %cst_41 {dimension_numbers = #tpu.dot_dimension_numbers<[1], [0], [0], [1], [0, 0, 1, 1], [], []>} : vector<16x256xbf16>, vector<256x128xbf16>, vector<16x128xf32> -> vector<16x128xf32>
    %105 = arith.addf %73, %104 : vector<16x128xf32>
    %c0_42 = arith.constant 0 : index
    %c0_43 = arith.constant 0 : index
    %106 = vector.load %arg12[%c0_42, %c0_43] : memref<16x128xf32, #tpu.memory_space<vmem>>, vector<16x128xf32>
    tpu.vector_store %arg12[%c0_42, %c0_43], %105 {strides = array<i32>} : memref<16x128xf32, #tpu.memory_space<vmem>>, vector<16x128xf32>,
    return
  }
  func.func @transform_0(%arg0: i32) -> (i32, i32) {
    %c0_i32 = arith.constant 0 : i32
    %c0_i32_0 = arith.constant 0 : i32
    %c0_i32_1 = arith.constant 0 : i32
    return %c0_i32, %c0_i32_0 : i32, i32
  }
  func.func @transform_1(%arg0: i32) -> (i32, i32) {
    %c0_i32 = arith.constant 0 : i32
    %c0_i32_0 = arith.constant 0 : i32
    %c0_i32_1 = arith.constant 0 : i32
    return %c0_i32, %c0_i32_0 : i32, i32
  }
  func.func @transform_2(%arg0: i32) -> (i32, i32) {
    %c0_i32 = arith.constant 0 : i32
    %c0_i32_0 = arith.constant 0 : i32
    %c0_i32_1 = arith.constant 0 : i32
    return %c0_i32, %c0_i32_0 : i32, i32
  }
  func.func @transform_3(%arg0: i32) -> (i32, i32) {
    %c0_i32 = arith.constant 0 : i32
    %c0_i32_0 = arith.constant 0 : i32
    %c0_i32_1 = arith.constant 0 : i32
    return %c0_i32, %c0_i32_0 : i32, i32
  }
  func.func @transform_4(%arg0: i32) -> (i32, i32) {
    %c0_i32 = arith.constant 0 : i32
    %c0_i32_0 = arith.constant 0 : i32
    %c0_i32_1 = arith.constant 0 : i32
    return %c0_i32, %c0_i32_0 : i32, i32
  }
  func.func @transform_5(%arg0: i32) -> (i32, i32, i32) {
    %c0_i32 = arith.constant 0 : i32
    %c0_i32_0 = arith.constant 0 : i32
    %c0_i32_1 = arith.constant 0 : i32
    return %arg0, %c0_i32, %c0_i32_0 : i32, i32, i32
  }
  func.func @transform_6(%arg0: i32) -> (i32, i32, i32) {
    %c0_i32 = arith.constant 0 : i32
    %c0_i32_0 = arith.constant 0 : i32
    %c0_i32_1 = arith.constant 0 : i32
    return %arg0, %c0_i32, %c0_i32_0 : i32, i32, i32
  }
  func.func @transform_7(%arg0: i32) -> (i32, i32, i32) {
    %c0_i32 = arith.constant 0 : i32
    %c0_i32_0 = arith.constant 0 : i32
    %c0_i32_1 = arith.constant 0 : i32
    return %arg0, %c0_i32, %c0_i32_0 : i32, i32, i32
  }
  func.func @transform_8(%arg0: i32) -> (i32, i32, i32) {
    %c0_i32 = arith.constant 0 : i32
    %c0_i32_0 = arith.constant 0 : i32
    %c0_i32_1 = arith.constant 0 : i32
    return %arg0, %c0_i32, %c0_i32_0 : i32, i32, i32
  }
  func.func @transform_9(%arg0: i32) -> (i32, i32, i32) {
    %c0_i32 = arith.constant 0 : i32
    %c0_i32_0 = arith.constant 0 : i32
    %c0_i32_1 = arith.constant 0 : i32
    return %arg0, %c0_i32, %c0_i32_0 : i32, i32, i32
  }
  func.func @transform_10(%arg0: i32) -> (i32, i32, i32) {
    %c0_i32 = arith.constant 0 : i32
    %c0_i32_0 = arith.constant 0 : i32
    %c0_i32_1 = arith.constant 0 : i32
    return %arg0, %c0_i32, %c0_i32_0 : i32, i32, i32
  }
  func.func @transform_11(%arg0: i32) -> (i32, i32) {
    %c0_i32 = arith.constant 0 : i32
    %c0_i32_0 = arith.constant 0 : i32
    %c0_i32_1 = arith.constant 0 : i32
    return %c0_i32, %c0_i32_0 : i32, i32
  }
}

module attributes {stable_mosaic.version = 11 : i64} {
  func.func @lm_head_kernel(%arg0: i32, %arg1: memref<16x128xf32, #tpu.memory_space<vmem>>, %arg2: memref<1x128xf32, #tpu.memory_space<vmem>>, %arg3: memref<128x256xbf16, #tpu.memory_space<vmem>>, %arg4: memref<16x256xf32, #tpu.memory_space<vmem>>) attributes {dimension_semantics = [#tpu.dimension_semantics<parallel>], iteration_bounds = array<i64: 2>, scalar_prefetch = 0 : i64, scratch_operands = 0 : i64, tpu.core_type = #tpu.core_type<tc>, window_params = [{pipeline_mode = #tpu.pipeline_mode<synchronous>, transform_indices = @transform_0, window_bounds = array<i64: 16, 128>}, {pipeline_mode = #tpu.pipeline_mode<synchronous>, transform_indices = @transform_1, window_bounds = array<i64: 1, 128>}, {transform_indices = @transform_2, window_bounds = array<i64: 128, 256>}, {transform_indices = @transform_3, window_bounds = array<i64: 16, 256>}]} {
    %c0 = arith.constant 0 : index
    %c0_0 = arith.constant 0 : index
    %0 = vector.load %arg1[%c0, %c0_0] : memref<16x128xf32, #tpu.memory_space<vmem>>, vector<16x128xf32>
    %c0_1 = arith.constant 0 : index
    %c0_2 = arith.constant 0 : index
    %1 = vector.load %arg2[%c0_1, %c0_2] : memref<1x128xf32, #tpu.memory_space<vmem>>, vector<1x128xf32>
    %2 = arith.mulf %0, %0 : vector<16x128xf32>
    %cst = arith.constant dense<0.000000e+00> : vector<16xf32>
    %3 = vector.multi_reduction <add>, %2, %cst [1] : vector<16x128xf32> to vector<16xf32>
    %4 = vector.shape_cast %3 : vector<16xf32> to vector<16x1xf32>
    %cst_3 = arith.constant 1.280000e+02 : f32
    %5 = vector.broadcast %cst_3 : f32 to vector<16x1xf32>
    %6 = arith.divf %4, %5 : vector<16x1xf32>
    %cst_4 = arith.constant 9.99999997E-7 : f32
    %7 = vector.broadcast %cst_4 : f32 to vector<16x1xf32>
    %8 = arith.addf %6, %7 : vector<16x1xf32>
    %9 = math.rsqrt %8 : vector<16x1xf32>
    %10 = vector.broadcast %9 : vector<16x1xf32> to vector<16x128xf32>
    %11 = arith.mulf %0, %10 : vector<16x128xf32>
    %12 = vector.broadcast %1 : vector<1x128xf32> to vector<16x128xf32>
    %13 = arith.mulf %11, %12 : vector<16x128xf32>
    %14 = arith.truncf %13 : vector<16x128xf32> to vector<16x128xbf16>
    %c0_5 = arith.constant 0 : index
    %c0_6 = arith.constant 0 : index
    %15 = vector.load %arg3[%c0_5, %c0_6] : memref<128x256xbf16, #tpu.memory_space<vmem>>, vector<128x256xbf16>
    %cst_7 = arith.constant dense<0.000000e+00> : vector<16x256xf32>
    %16 = tpu.matmul %14, %15, %cst_7 {dimension_numbers = #tpu.dot_dimension_numbers<[1], [0], [0], [1], [0, 0, 1, 1], [], []>} : vector<16x128xbf16>, vector<128x256xbf16>, vector<16x256xf32> -> vector<16x256xf32>
    %c0_8 = arith.constant 0 : index
    %c0_9 = arith.constant 0 : index
    %17 = vector.load %arg4[%c0_8, %c0_9] : memref<16x256xf32, #tpu.memory_space<vmem>>, vector<16x256xf32>
    tpu.vector_store %arg4[%c0_8, %c0_9], %16 {strides = array<i32>} : memref<16x256xf32, #tpu.memory_space<vmem>>, vector<16x256xf32>,
    return
  }
  func.func @transform_0(%arg0: i32) -> (i32, i32) {
    %c0_i32 = arith.constant 0 : i32
    %c0_i32_0 = arith.constant 0 : i32
    %c0_i32_1 = arith.constant 0 : i32
    return %c0_i32, %c0_i32_0 : i32, i32
  }
  func.func @transform_1(%arg0: i32) -> (i32, i32) {
    %c0_i32 = arith.constant 0 : i32
    %c0_i32_0 = arith.constant 0 : i32
    %c0_i32_1 = arith.constant 0 : i32
    return %c0_i32, %c0_i32_0 : i32, i32
  }
  func.func @transform_2(%arg0: i32) -> (i32, i32) {
    %c0_i32 = arith.constant 0 : i32
    %c0_i32_0 = arith.constant 0 : i32
    return %c0_i32, %arg0 : i32, i32
  }
  func.func @transform_3(%arg0: i32) -> (i32, i32) {
    %c0_i32 = arith.constant 0 : i32
    %c0_i32_0 = arith.constant 0 : i32
    return %c0_i32, %arg0 : i32, i32
  }
}

</mosaic_0001>

<bundles_post_ra>
// kernel: vicuna_forward.3
= control target key start
LH: loop header
LB: loop body
LE: loop exit
PB: predicated region body
PF: predicated region fallthrough
CT: control target
= control target key end

     0   :  { %8 = vsyncpa [#allocation3], 0  ;;  %s850_s0 = inlined_call_operand.vmem [shape: f32[16,128], index: 0, kind: input, shape index: {}]   ;;  %s851_s1 = inlined_call_operand.vmem [shape: f32[1,128], index: 1, kind: input, shape index: {}]   ;;  %s852_s2 = inlined_call_operand.hbm [shape: bf16[128,512], index: 2, kind: input, shape index: {}]   ;;  %s853_s3 = inlined_call_operand.vmem [shape: f32[16,512], index: 3, kind: output, shape index: {}]  }
   0x1   :  { %10 = vsyncpa [#allocation3 + $0x1], 0  ;;  %s696_s12 = smov 0   ;;  %s698_s13 = smov 0  }
   0x2   :  { %s700_s14 = smov 0   ;;  %s702_s15 = smov 0  }
   0x3 LB: > { %s715_s16 = sadd.s32 4294967295, %s670_s15   ;;  %s718_s17 = sadd.s32 1, %s670_s15   ;;  %s670_s15 = sphi %s702_s15, %s861_s15   ;;  %s666_s14 = sphi %s700_s14, %s860_s14   ;;  %s662_s13 = sphi %s698_s13, %s859_s13   ;;  %s658_s12 = sphi %s696_s12, %s858_s12  }
   0x4   : > { %s62_s18 = ssub.s32 %s670_s15, %s718_s17  ;;  %s65_s19 = sadd.s32 1, %s666_s14 }
   0x5   : > { %p63_p0 = scmp.eq.s32.totalorder %s62_s18, 0  ;;  %p72_p1 = scmp.ne.s32.totalorder %s666_s14, %s662_s13 }
   0x6   : > { %p73_p2 = scmp.eq.s32.totalorder %s670_s15, 0  ;;  %p78_p3 = scmp.ne.s32.totalorder %s662_s13, %s658_s12 }
   0x7   : > { %s728_s20 = scalar_select %p63_p0, %s666_s14, %s65_s19  }
   0x8   : > { %p730_p4 = por %p73_p2, %p72_p1  ;;  %p79_p5 = scmp.eq.s32.totalorder %s715_s16, 0 }
   0x9   : > { %p102_p6 = scmp.eq.s32.totalorder %s715_s16, 1  ;;  %p562_p8 = scmp.lt.s32.totalorder %s670_s15, 2 }
   0xa   : > { %p736_p7 = por %p79_p5, %p78_p3  ;;  %s134_s24 = sand.u32 1, %s666_s14  }
   0xb   : > { %p741_p9 = por %p102_p6, %p72_p1  ;;  %s463_s25 = sshll.u32 %s134_s24, 7 }
   0xc   : > { %s538_s26 = sshll.u32 %s670_s15, 3  ;;  %s138_s30 = scalar_lea.vmem [#allocation2], %s463_s25 }
   0xd   : > { %s143_s29 = scalar_lea.hbm %s852_s2, %s538_s26  ;;  %s146_s4 = sshll.u32 %s138_s30, 4  ;;  %s147_s4 = int_to_ptr.vmem [resolvable:$true] %s146_s4 }
   0xe   : > { %s144_s5 = sshll.u32 %s143_s29, 4  ;;  %p752_p10 = pnand %p562_p8, %p730_p4  ;;  %s145_s5 = int_to_ptr.hbm [resolvable:$true] %s144_s5 }
   0xf   : > { %s135_s7 = scalar_lea.sflag [#allocation3], %s134_s24  ;;  %s606_s8 = sshra.s32 %s145_s5, 4  ;;  %s607_s8 = int_to_ptr.hbm [resolvable:$true] %s606_s8 }
  0x10   : > { %s608_s9 = scalar_lea.hbm %s607_s8, 128  ;;  %p610_p12 = pneg %p752_p10 }
  0x11   : > { %p609_p11 = scmp.ne.s32.totalorder %s607_s8, %s608_s9  ;;  %s613_s12 = scalar_lea.hbm %s852_s2, 256 }
  0x12   : > { %p614_p1 = scmp.lt.s32.totalorder %s607_s8, %s852_s2  ;;  %p615_p2 = scmp.lt.s32.totalorder %s613_s12, %s608_s9 }
  0x13   : > { %p611_p13 = pnand %p610_p12, %p609_p11 }
  0x14   : > { %p616_p3 = por %p615_p2, %p614_p1 }
  0x15   : > { %p612_p0 = pneg %p611_p13 }
  0x17   : > { %p617_p4 = pnand %p616_p3, %p612_p0 }
  0x19   : > { %620 = shalt.err (!%p617_p4)
}
  0x1a   : > { %s672_s21 = smov 256   ;;  %s673_s24 = smov 128  }
  0x1b   : > { %s674_s25 = smov 8   ;;  %p466_p5 = scmp.ge.s32.totalorder %s670_s15, 1 }
  0x1c   : > { %561 = dma.hbm_to_vmem [thread:$0]  (!%p752_p10), %s145_s5, 2048, %s147_s4, %s135_s7, %s672_s21, %s673_s24, %s674_s25  }
  0x1d   : > { %p154_p6 = scmp.lt.s32.totalorder %s670_s15, 3 }
  0x1f   : > { %p155_p8 = pnand %p466_p5, %p154_p6 }
  0x20   : > { %s769_s26 = sand.u32 (!%p155_p8), 1, %s662_s13  }
  0x21   : > { %158 = sbr.rel (%p155_p8) target bundleno = 338 (0x152), region = 32  ;;  %s467_s27 = sshll.u32 (!%p155_p8), %s769_s26, 7 }
  0x22   : > { %s161_s28 = scalar_lea.sflag (!%p155_p8), [#allocation3], %s769_s26  ;;  %s773_s29 = scalar_lea.vmem (!%p155_p8), [#allocation2], %s467_s27 }
  0x26   : > { %653 = dma.done.wait (%p736_p7), %s161_s28, 2048  }
  0x27   : > { %655 = vsyncadd (%p736_p7), %s161_s28, 4294965248  ;;  %v782_v0 = vld [vmem:[%s850_s0] sm:$0xff]  ;;  %v789_v2 = vld [vmem:[%s850_s0 + $0x8] sm:$0xff]  ;;  %v675_v9 = vmov 128.0   ;;  %s468_s7 = sshll.u32 %s769_s26, 5  ;;  %s555_s9 = sshll.u32 (%p741_p9), %s715_s16, 4 }
  0x28   : > { %v192_v1 = vmul.f32 %v782_v0, %v782_v0  ;;  %v193_v3 = vmul.f32 %v789_v2, %v789_v2  ;;  %v527_v4 = vld [vmem:[%s773_s29 + $0x70] sm:$0xf]  ;;  %v554_v5 = vld [vmem:[%s773_s29 + $0x74] sm:$0xf0]  ;;  %v553_v6 = vld [vmem:[%s773_s29 + $0x74] sm:$0xf]  ;;  %600 = vrcp.f32 %v675_v9  ;;  %s374_s12 = scalar_lea.vmem (%p741_p9), %s853_s3, %s555_s9 }
  0x29   : > { %v528_v7 = vor.u32 %v554_v5, %v527_v4  ;;  %v529_v8 = vld [vmem:[%s773_s29 + $0x78] sm:$0xf0]  ;;  %v519_v11 = vld [vmem:[%s773_s29 + $0x60] sm:$0xf]  ;;  %v552_v12 = vld [vmem:[%s773_s29 + $0x64] sm:$0xf0] }
  0x2a   : > { %194 = vadd.xlane.f32.xlu0 %v192_v1  ;;  %v532_v10 = vor.u32 %v553_v6, %v529_v8  ;;  %v551_v13 = vld [vmem:[%s773_s29 + $0x64] sm:$0xf]  ;;  %v520_v14 = vor.u32 %v552_v12, %v519_v11  ;;  %v521_v15 = vld [vmem:[%s773_s29 + $0x68] sm:$0xf0]  ;;  %v511_v18 = vld [vmem:[%s773_s29 + $0x50] sm:$0xf] }
  0x2b   : > { %333 = vmatpush.bf16.msra.mxu0 %v528_v7  ;;  %v524_v16 = vor.u32 %v551_v13, %v521_v15  ;;  %v550_v19 = vld [vmem:[%s773_s29 + $0x54] sm:$0xf0]  ;;  %v549_v20 = vld [vmem:[%s773_s29 + $0x54] sm:$0xf]  ;;  %v513_v22 = vld [vmem:[%s773_s29 + $0x58] sm:$0xf0] }
  0x2c   : > { %347 = vmatpush.bf16.msra.mxu1 %v532_v10  ;;  %v512_v21 = vor.u32 %v550_v19, %v511_v18  ;;  %v516_v23 = vor.u32 %v549_v20, %v513_v22  ;;  %v503_v25 = vld [vmem:[%s773_s29 + $0x40] sm:$0xf]  ;;  %v548_v26 = vld [vmem:[%s773_s29 + $0x44] sm:$0xf0]  ;;  %v547_v27 = vld [vmem:[%s773_s29 + $0x44] sm:$0xf] }
  0x2d   : > { %v504_v28 = vor.u32 %v548_v26, %v503_v25  ;;  %v505_v29 = vld [vmem:[%s773_s29 + $0x48] sm:$0xf0]  ;;  %v495_v32 = vld [vmem:[%s773_s29 + $0x30] sm:$0xf]  ;;  %v546_v33 = vld [vmem:[%s773_s29 + $0x34] sm:$0xf0] }
  0x2e   : > { %v601_v17 = vpop.eup %600  ;;  %v508_v30 = vor.u32 %v547_v27, %v505_v29  ;;  %v545_v34 = vld [vmem:[%s773_s29 + $0x34] sm:$0xf]  ;;  %v496_v35 = vor.u32 %v546_v33, %v495_v32  ;;  %v497_v36 = vld [vmem:[%s773_s29 + $0x38] sm:$0xf0]  ;;  %v487_v39 = vld [vmem:[%s773_s29 + $0x20] sm:$0xf] }
  0x2f   : > { %334 = vmatpush.bf16.msra.mxu0 %v520_v14  ;;  %v199_v24 = vmul.f32 128.0, %v601_v17  ;;  %v500_v37 = vor.u32 %v545_v34, %v497_v36  ;;  %v544_v40 = vld [vmem:[%s773_s29 + $0x24] sm:$0xf0]  ;;  %v543_v41 = vld [vmem:[%s773_s29 + $0x24] sm:$0xf]  ;;  %vm203_vm0 = vweird.f32 %v601_v17  ;;  %s186_s8 = scalar_lea.vmem [#allocation4], %s468_s7 }
  0x30   : > { %348 = vmatpush.bf16.msra.mxu1 %v524_v16  ;;  %v488_v42 = vor.u32 %v544_v40, %v487_v39  ;;  %v489_v43 = vld [vmem:[%s773_s29 + $0x28] sm:$0xf0]  ;;  %v479_v46 = vld [vmem:[%s773_s29 + $0x10] sm:$0xf]  ;;  %v542_v47 = vld [vmem:[%s773_s29 + $0x14] sm:$0xf0] }
  0x31   : > { %v200_v31 = vsub.f32 1.0, %v199_v24  ;;  %v492_v44 = vor.u32 %v543_v41, %v489_v43  ;;  %v541_v48 = vld [vmem:[%s773_s29 + $0x14] sm:$0xf]  ;;  %v480_v49 = vor.u32 %v542_v47, %v479_v46  ;;  %v481_v50 = vld [vmem:[%s773_s29 + $0x18] sm:$0xf0] }
  0x32   : > { %196 = vadd.xlane.f32.xlu0 %v193_v3  ;;  %v471_v51 = vld [vmem:[%s773_s29] sm:$0xf]  ;;  %v540_v52 = vld [vmem:[%s773_s29 + $0x4] sm:$0xf0]  ;;  %v484_v53 = vor.u32 %v541_v48, %v481_v50  ;;  %v539_v54 = vld [vmem:[%s773_s29 + $0x4] sm:$0xf] }
  0x33   : > { %335 = vmatpush.bf16.msra.mxu0 %v512_v21  ;;  %v201_v38 = vmul.f32 %v601_v17, %v200_v31  ;;  %v473_v55 = vld [vmem:[%s773_s29 + $0x8] sm:$0xf0]  ;;  %v472_v57 = vor.u32 %v540_v52, %v471_v51 }
  0x34   : > { %349 = vmatpush.bf16.msra.mxu1 %v516_v23  ;;  %v476_v58 = vor.u32 %v539_v54, %v473_v55 }
  0x35   : > { %v202_v45 = vadd.f32 %v601_v17, %v201_v38 }
  0x37   : > { %336 = vmatpush.bf16.msra.mxu0 %v504_v28  ;;  %v204_v56 = vsel %vm203_vm0, %v601_v17, %v202_v45  ;;  %v599_v17 = vld [vmem:[%s851_s1] ss:$0 sm:$0xff] }
  0x38   : > { %350 = vmatpush.bf16.msra.mxu1 %v508_v30 }
  0x3b   : > { %337 = vmatpush.bf16.msra.mxu0 %v496_v35 }
  0x3c   : > { %351 = vmatpush.bf16.msra.mxu1 %v500_v37 }
  0x3f   : > { %338 = vmatpush.bf16.msra.mxu0 %v488_v42 }
  0x40   : > { %352 = vmatpush.bf16.msra.mxu1 %v492_v44 }
  0x43   : > { %339 = vmatpush.bf16.msra.mxu0 %v480_v49 }
  0x44   : > { %353 = vmatpush.bf16.msra.mxu1 %v484_v53 }
  0x47   : > { %340 = vmatpush.bf16.msra.mxu0 %v472_v57 }
  0x48   : > { %354 = vmatpush.bf16.msra.mxu1 %v476_v58 }
  0x9d   : > { %v195_v59 = vpop.xlane.xlu0 %194 }
  0x9e   : > { %v205_v60 = vmul.f32 %v204_v56, %v195_v59 }
  0xa0   : > { %v207_v61 = vadd.f32 1e-06, %v205_v60 }
  0xa2   : > { %602 = vrsqrt.f32 %v207_v61  ;;  %vm215_vm2 = vweird.f32 %v207_v61 }
  0xa5   : > { %v197_v62 = vpop.xlane.xlu0 %196 }
  0xa6   : > { %v206_v63 = vmul.f32 %v204_v56, %v197_v62 }
  0xa8   : > { %v603_v1 = vpop.eup %602  ;;  %v208_v3 = vadd.f32 1e-06, %v206_v63 }
  0xa9   : > { %v210_v4 = vmul.f32 %v603_v1, %v207_v61  ;;  %vm216_vm1 = vweird.f32 %v603_v1 }
  0xaa   : > { %604 = vrsqrt.f32 %v208_v3  ;;  %vm217_vm3 = vmor %vm215_vm2, %vm216_vm1  ;;  %vm225_vm5 = vweird.f32 %v208_v3 }
  0xab   : > { %v211_v5 = vmul.f32 %v603_v1, %v210_v4 }
  0xad   : > { %v212_v6 = vmul.f32 0.5, %v211_v5 }
  0xaf   : > { %v213_v7 = vsub.f32 1.5, %v212_v6 }
  0xb0   : > { %v605_v8 = vpop.eup %604 }
  0xb1   : > { %v220_v9 = vmul.f32 %v605_v8, %v208_v3  ;;  %v214_v10 = vmul.f32 %v603_v1, %v213_v7  ;;  %vm226_vm4 = vweird.f32 %v605_v8 }
  0xb2   : > { %vm227_vm6 = vmor %vm225_vm5, %vm226_vm4 }
  0xb3   : > { %v221_v11 = vmul.f32 %v605_v8, %v220_v9  ;;  %v218_v14 = vsel %vm217_vm3, %v603_v1, %v214_v10 }
  0xb4   : > { %v229_v16 = vmul.f32 %v218_v14, %v782_v0 }
  0xb5   : > { %v222_v12 = vmul.f32 0.5, %v221_v11 }
  0xb6   : > { %v234_v20 = vmul.f32 %v599_v17, %v229_v16 }
  0xb7   : > { %v223_v13 = vsub.f32 1.5, %v222_v12 }
  0xb9   : > { %v224_v15 = vmul.f32 %v605_v8, %v223_v13 }
  0xbb   : > { %v228_v18 = vsel %vm227_vm6, %v605_v8, %v224_v15 }
  0xbc   : > { %v230_v19 = vmul.f32 %v228_v18, %v789_v2 }
  0xbe   : > { %v235_v21 = vmul.f32 %v599_v17, %v230_v19 }
  0xc0   : > { %v236_v22 = vpack.c.bf16 %v235_v21, %v234_v20 }
  0xc2   : > { %341 = vmatmul.bf16.vlgmr.msra.gmra.mxu0 %v236_v22  ;;  %355 = vmatmul.bf16.vlgmr.msra.gmra.mxu1 %v236_v22 }
 0x13f   : > { %v342_v23 = vpop.f32.mrf.mxu0  ;;  %v356_v24 = vpop.f32.mrf.mxu1 }
 0x140   : > { %361 = vst [vmem:[%s186_s8] sm:$0xff] %v342_v23 }
 0x141   : > { %362 = vst [vmem:[%s186_s8 + $0x8] sm:$0xff] %v356_v24 }
 0x145   : > { %371 = sbr.rel (!%p741_p9) target bundleno = 338 (0x152), region = 40 }
 0x147   : > { %v344_v25 = vpop.f32.mrf.mxu0  ;;  %v358_v0 = vpop.f32.mrf.mxu1  ;;  %v387_v2 = vld [vmem:[%s186_s8] sm:$0xff] (%p741_p9) }
 0x148   : > { %363 = vst [vmem:[%s186_s8 + $0x10] sm:$0xff] %v344_v25  ;;  %v389_v26 = vld [vmem:[%s186_s8 + $0x8] sm:$0xff] (%p741_p9) }
 0x149   : > { %364 = vst [vmem:[%s186_s8 + $0x18] sm:$0xff] %v358_v0 }
 0x14a   : > { %388 = vst [vmem:[%s374_s12] sm:$0xff] %v387_v2 }
 0x14b   : > { %390 = vst [vmem:[%s374_s12 + $0x8] sm:$0xff] %v389_v26 }
 0x14f   : > { %v391_v27 = vld [vmem:[%s186_s8 + $0x10] sm:$0xff] }
 0x150   : > { %v393_v28 = vld [vmem:[%s186_s8 + $0x18] sm:$0xff]  ;;  %392 = vst [vmem:[%s374_s12 + $0x20] sm:$0xff] %v391_v27 }
 0x151   : > { %394 = vst [vmem:[%s374_s12 + $0x28] sm:$0xff] %v393_v28 }
 0x152 PF: > { %p13_p7 = scmp.ge.s32.totalorder %s718_s17, 4   ;;  %s858_s12 = smov %s662_s13 }
 0x153   : > { %s859_s13 = smov %s666_s14  ;;  %s860_s14 = smov %s728_s20 }
 0x154   : > { %s861_s15 = smov %s718_s17  ;;  %15 = sbr.rel (!%p13_p7) target bundleno = 3 (0x3), region = 95 }
 0x159   :  { %410 = vsyncpa [#allocation3], 1 }
 0x15a   :  { %412 = vsyncpa [#allocation3 + $0x1], 1 }

// kernel: vicuna_forward.2
= control target key start
LH: loop header
LB: loop body
LE: loop exit
PB: predicated region body
PF: predicated region fallthrough
CT: control target
= control target key end

     0   :  { %s10326_s0 = inlined_call_operand.vmem [shape: s32[16,1], index: 0, kind: input, shape index: {}]   ;;  %s10327_s1 = inlined_call_operand.hbm [shape: bf16[512,128], index: 1, kind: input, shape index: {}]   ;;  %s10328_s2 = inlined_call_operand.vmem [shape: f32[16,32], index: 2, kind: input, shape index: {}]   ;;  %s10329_s3 = inlined_call_operand.vmem [shape: f32[16,32], index: 3, kind: input, shape index: {}]   ;;  %s10330_s4 = inlined_call_operand.vmem [shape: f32[16,16], index: 4, kind: input, shape index: {}]   ;;  %s10331_s5 = inlined_call_operand.vmem [shape: f32[2,1,128], index: 5, kind: input, shape index: {}]   ;;  %s10332_s6 = inlined_call_operand.hbm [shape: bf16[2,128,384], index: 6, kind: input, shape index: {}]   ;;  %s10333_s7 = inlined_call_operand.hbm [shape: bf16[2,128,128], index: 7, kind: input, shape index: {}]   ;;  %s10334_s8 = inlined_call_operand.vmem [shape: f32[2,1,128], index: 8, kind: input, shape index: {}]   ;;  %s10335_s9 = inlined_call_operand.hbm [shape: bf16[2,128,512], index: 9, kind: input, shape index: {}]   ;;  %s10336_s10 = inlined_call_operand.hbm [shape: bf16[2,256,128], index: 10, kind: input, shape index: {}]   ;;  %s10337_s11 = inlined_call_operand.vmem [shape: f32[16,128], index: 11, kind: output, shape index: {}]  }
   0x1   :  { %10383 = sst [smem:[#allocation45_spill]] %s10327_s1 }
   0x2   :  { %10384 = sst [smem:[#allocation46_spill]] %s10328_s2 }
   0x3   :  { %10385 = sst [smem:[#allocation47_spill]] %s10329_s3 }
   0x4   :  { %10386 = sst [smem:[#allocation48_spill]] %s10330_s4 }
   0x5   :  { %10387 = sst [smem:[#allocation49_spill]] %s10332_s6 }
   0x6   :  { %10388 = sst [smem:[#allocation50_spill]] %s10335_s9 }
   0x7   :  { %16 = vsyncpa [#allocation3], 0 }
   0x8   :  { %17 = vsyncpa [#allocation5], 0 }
   0x9   :  { %19 = vsyncpa [#allocation5 + $0x1], 0 }
   0xa   :  { %20 = vsyncpa [#allocation8], 0 }
   0xb   :  { %22 = vsyncpa [#allocation8 + $0x1], 0  ;;  %s7870_s17 = smov 0   ;;  %s7872_s18 = smov 0  }
   0xc   :  { %s7874_s19 = smov 0   ;;  %s7876_s20 = smov 0  }
   0xd LB: > { %10389 = sst [smem:[#allocation13_spill]] %s7787_s19  ;;  %s7891_s21 = sadd.s32 1, %s7791_s20   ;;  %s7791_s20 = sphi %s7876_s20, %s10526_s20   ;;  %s7787_s19 = sphi %s7874_s19, %s10528_s19   ;;  %s7783_s18 = sphi %s7872_s18, %s10530_s18   ;;  %s7779_s17 = sphi %s7870_s17, %s10529_s17  }
   0xe   : > { %10390 = sst [smem:[#allocation14_spill]] %s7891_s21  ;;  %s166_s22 = sadd.s32 1, %s7787_s19 }
   0xf   : > { %s163_s23 = ssub.s32 %s7791_s20, %s7891_s21  ;;  %p173_p0 = scmp.ne.s32.totalorder %s7787_s19, %s7783_s18 }
  0x10   : > { %p164_p1 = scmp.eq.s32.totalorder %s163_s23, 0  ;;  %p174_p2 = scmp.eq.s32.totalorder %s7791_s20, 0 }
  0x11   : > { %p7113_p3 = scmp.lt.s32.totalorder %s7791_s20, 2  ;;  %s10338_s25 = sand.u32 1, %s7791_s20  }
  0x12   : > { %s7901_s24 = scalar_select %p164_p1, %s7787_s19, %s166_s22  }
  0x13   : > { %p175_p4 = por %p174_p2, %p173_p0  ;;  %s7905_s26 = sand.u32 1, %s7787_s19  }
  0x14   : > { %10391 = sst [smem:[#allocation15_spill]] %s7901_s24  ;;  %s7080_s27 = smul.u32 192, %s7905_s26 }
  0x15   : > { %p7908_p5 = pnand %p7113_p3, %p175_p4  ;;  %s7081_s29 = smul.u32 192, %s7791_s20 }
  0x16   : > { %s10393_s6 = sld [smem:[#allocation49_spill]]  ;;  %s364_s14 = scalar_lea.vmem [#allocation4], %s7080_s27 }
  0x17   : > { %s372_s15 = sshll.u32 %s364_s14, 4  ;;  %s7918_s22 = scalar_lea.sflag [#allocation5], %s10338_s25  ;;  %s373_s15 = int_to_ptr.vmem [resolvable:$true] %s372_s15 }
  0x18   : > { %p7603_p7 = pneg %p7908_p5 }
  0x1c   : > { %s369_s13 = scalar_lea.hbm %s10393_s6, %s7081_s29  ;;  %s7606_s27 = scalar_lea.hbm %s10393_s6, 384 }
  0x1d   : > { %s370_s16 = sshll.u32 %s369_s13, 4  ;;  %s371_s16 = int_to_ptr.hbm [resolvable:$true] %s370_s16 }
  0x1e   : > { %s7599_s23 = sshra.s32 %s371_s16, 4  ;;  %s7600_s23 = int_to_ptr.hbm [resolvable:$true] %s7599_s23 }
  0x1f   : > { %s7601_s24 = scalar_lea.hbm %s7600_s23, 192  ;;  %p7607_p10 = scmp.lt.s32.totalorder %s7600_s23, %s10393_s6 }
  0x20   : > { %p7602_p6 = scmp.ne.s32.totalorder %s7600_s23, %s7601_s24  ;;  %p7608_p11 = scmp.lt.s32.totalorder %s7606_s27, %s7601_s24 }
  0x22   : > { %p7604_p8 = pnand %p7603_p7, %p7602_p6  ;;  %p7609_p12 = por %p7608_p11, %p7607_p10 }
  0x24   : > { %p7605_p9 = pneg %p7604_p8 }
  0x26   : > { %p7610_p13 = pnand %p7609_p12, %p7605_p9 }
  0x28   : > { %7613 = shalt.err (!%p7610_p13)
}
  0x29   : > { %s7793_s14 = smov 192   ;;  %s7794_s25 = smov 12  }
  0x2a   : > { %7102 = dma.hbm_to_vmem [thread:$0]  (!%p7908_p5), %s371_s16, 3072, %s373_s15, %s7918_s22, %s7793_s14, %s7793_s14, %s7794_s25  }
  0x2b   : > { %s6451_s30 = sshll.u32 %s7905_s26, 8  ;;  %s6966_s29 = sshll.u32 %s7791_s20, 8 }
  0x2c   : > { %s10394_s9 = sld [smem:[#allocation50_spill]]  ;;  %s414_s24 = scalar_lea.vmem [#allocation7], %s6451_s30 }
  0x2d   : > { %s422_s27 = sshll.u32 %s414_s24, 4  ;;  %s10395_s13 = sand.u32 1, %s7791_s20   ;;  %s423_s27 = int_to_ptr.vmem [resolvable:$true] %s422_s27 }
  0x2e   : > { %s7941_s6 = scalar_lea.sflag [#allocation8], %s10395_s13 }
  0x32   : > { %s419_s23 = scalar_lea.hbm %s10394_s9, %s6966_s29  ;;  %s7636_s19 = scalar_lea.hbm %s10394_s9, 512 }
  0x33   : > { %s420_s12 = sshll.u32 %s419_s23, 4  ;;  %s421_s12 = int_to_ptr.hbm [resolvable:$true] %s420_s12 }
  0x34   : > { %s7629_s4 = sshra.s32 %s421_s12, 4  ;;  %s7630_s4 = int_to_ptr.hbm [resolvable:$true] %s7629_s4 }
  0x35   : > { %s7631_s3 = scalar_lea.hbm %s7630_s4, 256  ;;  %p7637_p3 = scmp.lt.s32.totalorder %s7630_s4, %s10394_s9 }
  0x36   : > { %p7632_p0 = scmp.ne.s32.totalorder %s7630_s4, %s7631_s3  ;;  %p7638_p4 = scmp.lt.s32.totalorder %s7636_s19, %s7631_s3 }
  0x38   : > { %p7634_p1 = pnand %p7632_p0, %p7603_p7  ;;  %p7639_p6 = por %p7638_p4, %p7637_p3 }
  0x3a   : > { %p7635_p2 = pneg %p7634_p1 }
  0x3c   : > { %p7640_p8 = pnand %p7639_p6, %p7635_p2 }
  0x3e   : > { %7643 = shalt.err (!%p7640_p8)
}
  0x3f   : > { %s7795_s14 = smov 256   ;;  %s7796_s30 = smov 16  }
  0x40   : > { %7108 = dma.hbm_to_vmem [thread:$0]  (!%p7908_p5), %s421_s12, 4096, %s423_s27, %s7941_s6, %s7795_s14, %s7795_s14, %s7796_s30  }
  0x41   : > { %s7956_s29 = sadd.s32 4294967295, %s7791_s20   ;;  %p179_p9 = scmp.ne.s32.totalorder %s7783_s18, %s7779_s17 }
  0x42   : > { %p180_p10 = scmp.eq.s32.totalorder %s7956_s29, 0  ;;  %p6444_p11 = scmp.ge.s32.totalorder %s7791_s20, 1 }
  0x43   : > { %p315_p12 = scmp.lt.s32.totalorder %s7791_s20, 3  ;;  %p6445_p0 = scmp.ne.s32.totalorder %s7956_s29, 0 }
  0x44   : > { %p7965_p13 = por %p180_p10, %p179_p9  ;;  %s10398_s1 = sld [smem:[#allocation45_spill]] }
  0x45   : > { %p7970_p1 = pnand %p6444_p11, %p315_p12  ;;  %s7797_s17 = smov [#allocation2]  }
  0x46   : > { %s331_s12 = sshll.u32 %s7797_s17, 4  ;;  %s6448_s13 = sshll.u32 %s7905_s26, 6  ;;  %s332_s12 = int_to_ptr.vmem [resolvable:$true] %s331_s12 }
  0x47   : > { %p7095_p2 = pneg %p7970_p1  ;;  %s6965_s25 = sshll.u32 %s7791_s20, 6 }
  0x48   : > { %s7798_s15 = smov 64   ;;  %s7799_s19 = smov 4  }
  0x49   : > { %p7096_p3 = pnand %p7095_p2, %p180_p10  ;;  %s391_s14 = scalar_lea.hbm %s10333_s7, %s6965_s25 }
  0x4a   : > { %s329_s27 = sshll.u32 %s10398_s1, 4  ;;  %s386_s30 = scalar_lea.vmem [#allocation6], %s6448_s13  ;;  %s330_s27 = int_to_ptr.hbm [resolvable:$true] %s329_s27 }
  0x4b   : > { %7098 = dma.hbm_to_vmem [thread:$0]  (!%p7096_p3), %s330_s27, 4096, %s332_s12, [#allocation3], %s7798_s15, %s7798_s15, %s7799_s19  }
  0x4c   : > { %s394_s23 = sshll.u32 %s386_s30, 4  ;;  %s392_s24 = sshll.u32 %s391_s14, 4  ;;  %s395_s23 = int_to_ptr.vmem [resolvable:$true] %s394_s23  ;;  %s393_s24 = int_to_ptr.hbm [resolvable:$true] %s392_s24 }
  0x4d   : > { %s6454_s17 = sshll.u32 %s7905_s26, 7  ;;  %s7689_s1 = sshra.s32 %s393_s24, 4  ;;  %s7690_s1 = int_to_ptr.hbm [resolvable:$true] %s7689_s1 }
  0x4e   : > { %s7691_s9 = scalar_lea.hbm %s7690_s1, 64  ;;  %s7696_s12 = scalar_lea.hbm %s10333_s7, 128 }
  0x4f   : > { %p7692_p4 = scmp.ne.s32.totalorder %s7690_s1, %s7691_s9  ;;  %p7697_p9 = scmp.lt.s32.totalorder %s7690_s1, %s10333_s7 }
  0x50   : > { %p7698_p11 = scmp.lt.s32.totalorder %s7696_s12, %s7691_s9 }
  0x51   : > { %p7694_p6 = pnand %p7692_p4, %p7603_p7 }
  0x52   : > { %p7699_p12 = por %p7698_p11, %p7697_p9 }
  0x53   : > { %p7695_p8 = pneg %p7694_p6 }
  0x55   : > { %p7700_p2 = pnand %p7699_p12, %p7695_p8 }
  0x57   : > { %7703 = shalt.err (!%p7700_p2)
}
  0x58   : > { %7105 = dma.hbm_to_vmem [thread:$0]  (!%p7908_p5), %s393_s24, 1024, %s395_s23, %s7918_s22, %s7798_s15, %s7798_s15, %s7799_s19  }
  0x59   : > { %s6967_s26 = sshll.u32 %s7791_s20, 7  ;;  %s436_s14 = scalar_lea.vmem [#allocation9], %s6454_s17 }
  0x5a   : > { %s441_s16 = scalar_lea.hbm %s10336_s10, %s6967_s26  ;;  %s444_s1 = sshll.u32 %s436_s14, 4  ;;  %s445_s1 = int_to_ptr.vmem [resolvable:$true] %s444_s1 }
  0x5b   : > { %s442_s9 = sshll.u32 %s441_s16, 4  ;;  %s7726_s20 = scalar_lea.hbm %s10336_s10, 256  ;;  %s443_s9 = int_to_ptr.hbm [resolvable:$true] %s442_s9 }
  0x5c   : > { %s7719_s30 = sshra.s32 %s443_s9, 4  ;;  %s7720_s30 = int_to_ptr.hbm [resolvable:$true] %s7719_s30 }
  0x5d   : > { %s7721_s27 = scalar_lea.hbm %s7720_s30, 128  ;;  %p7727_p8 = scmp.lt.s32.totalorder %s7720_s30, %s10336_s10 }
  0x5e   : > { %p7722_p3 = scmp.ne.s32.totalorder %s7720_s30, %s7721_s27  ;;  %p7728_p9 = scmp.lt.s32.totalorder %s7726_s20, %s7721_s27 }
  0x60   : > { %p7724_p4 = pnand %p7722_p3, %p7603_p7  ;;  %p7729_p11 = por %p7728_p9, %p7727_p8 }
  0x62   : > { %p7725_p6 = pneg %p7724_p4 }
  0x64   : > { %p7730_p12 = pnand %p7729_p11, %p7725_p6 }
  0x66   : > { %7733 = shalt.err (!%p7730_p12)
}
  0x67   : > { %7111 = dma.hbm_to_vmem [thread:$0]  (!%p7908_p5), %s443_s9, 2048, %s445_s1, %s7941_s6, %s7798_s15, %s7798_s15, %s7799_s19  }
  0x68   : > { %456 = sbr.rel (%p7970_p1) target bundleno = 3218 (0xc92), region = 64 }
  0x6d   : > { %7766 = dma.done.wait (%p180_p10), [#allocation3], 4096  }
  0x6e   : > { %7768 = vsyncadd (%p180_p10), [#allocation3], 4294963200  ;;  %s463_s17 = sand.u32 1, %s7956_s29   ;;  %s465_s21 = sand.u32 1, %s7783_s18  }
  0x6f   : > { %s7082_s28 = smul.u32 192, %s465_s21  ;;  %s464_s25 = scalar_lea.sflag [#allocation5], %s463_s17 }
  0x71   : > { %s8032_s26 = scalar_lea.vmem [#allocation4], %s7082_s28 }
  0x72   : > { %7770 = dma.done.wait (%p7965_p13), %s464_s25, 4096  }
  0x73   : > { %7772 = vsyncadd (%p7965_p13), %s464_s25, 4294963200  ;;  %s6459_s6 = sshll.u32 %s465_s21, 6  ;;  %s6460_s4 = sshll.u32 %s465_s21, 8 }
  0x74   : > { %s8038_s15 = scalar_lea.vmem [#allocation6], %s6459_s6  ;;  %s484_s19 = scalar_lea.sflag [#allocation8], %s463_s17 }
  0x75   : > { %s8040_s2 = scalar_lea.vmem [#allocation7], %s6460_s4 }
  0x76   : > { %7774 = dma.done.wait (%p7965_p13), %s484_s19, 6144  }
  0x77   : > { %7776 = vsyncadd (%p7965_p13), %s484_s19, 4294961152  ;;  %s6461_s13 = sshll.u32 %s465_s21, 7  ;;  %p553_p5 = scmp.lt.s32.totalorder %s7956_s29, 1 }
  0x78   : > { %s8058_s22 = scalar_lea.vmem [#allocation9], %s6461_s13  ;;  %562 = sbr.rel (%p6445_p0) target bundleno = 399 (0x18f), region = 88 }
  0x79   : > { %s8048_s16 = scalar_select %p553_p5, %s7956_s29, 1 }
  0x7b   : > { %s555_s9 = scalar_lea.vmem %s10331_s5, %s8048_s16  ;;  %s558_s12 = scalar_lea.vmem %s10334_s8, %s8048_s16 }
  0x7d   : > { %v563_v0 = vld [vmem:[%s10326_s0] sm:$0xff]  ;;  %v6975_v1 = vld [vmem:[#allocation2 + $0x38] sm:$0xff]  ;;  %v7800_v2 = vmov 0   ;;  %v6974_v6 = vld [vmem:[#allocation2 + $0x30] sm:$0xff]  ;;  %v565_v35 = vlaneseq  ;;  %v7801_v42 = vmov 1.0|1.0  }
  0x7e   : > { %7165 = vset.pattern.permute.xlu0 %v7800_v2  ;;  %v6983_v3 = vld [vmem:[#allocation2 + $0x78] sm:$0xff]  ;;  %860 = vmatpush.bf16.msra.mxu0 %v6975_v1  ;;  %v6982_v7 = vld [vmem:[#allocation2 + $0x70] sm:$0xff]  ;;  %v6973_v10 = vld [vmem:[#allocation2 + $0x28] sm:$0xff] }
  0x7f   : > { %v6991_v4 = vld [vmem:[#allocation2 + $0xb8] sm:$0xff]  ;;  %571 = vperm.xlu0 %7165, %v563_v0   ;;  %874 = vmatpush.bf16.msra.mxu1 %v6983_v3  ;;  %v6990_v8 = vld [vmem:[#allocation2 + $0xb0] sm:$0xff]  ;;  %v564_v11 = vld [vmem:[%s10326_s0 + $0x8] sm:$0xff]  ;;  %v566_v37 = vand.u32 127, %v565_v35 }
  0x80   : > { %v6999_v5 = vld [vmem:[#allocation2 + $0xf8] sm:$0xff]  ;;  %888 = vmatpush.bf16.msra.mxu2 %v6991_v4  ;;  %v6998_v9 = vld [vmem:[#allocation2 + $0xf0] sm:$0xff]  ;;  %v6981_v12 = vld [vmem:[#allocation2 + $0x68] sm:$0xff] }
  0x81   : > { %902 = vmatpush.bf16.msra.mxu3 %v6999_v5  ;;  %v6989_v13 = vld [vmem:[#allocation2 + $0xa8] sm:$0xff]  ;;  %v6972_v15 = vld [vmem:[#allocation2 + $0x20] sm:$0xff]  ;;  %v6971_v19 = vld [vmem:[#allocation2 + $0x18] sm:$0xff]  ;;  %v567_v38 = vadd.s32 128, %v566_v37  ;;  %v568_v39 = vadd.s32 256, %v566_v37  ;;  %v569_v41 = vadd.s32 384, %v566_v37 }
  0x82   : > { %861 = vmatpush.bf16.msra.mxu0 %v6974_v6  ;;  %v6997_v14 = vld [vmem:[#allocation2 + $0xe8] sm:$0xff]  ;;  %v6980_v16 = vld [vmem:[#allocation2 + $0x60] sm:$0xff]  ;;  %v6979_v20 = vld [vmem:[#allocation2 + $0x58] sm:$0xff] }
  0x83   : > { %875 = vmatpush.bf16.msra.mxu1 %v6982_v7  ;;  %v6988_v17 = vld [vmem:[#allocation2 + $0xa0] sm:$0xff]  ;;  %v6987_v21 = vld [vmem:[#allocation2 + $0x98] sm:$0xff]  ;;  %v6970_v23 = vld [vmem:[#allocation2 + $0x10] sm:$0xff] }
  0x84   : > { %889 = vmatpush.bf16.msra.mxu2 %v6990_v8  ;;  %v6996_v18 = vld [vmem:[#allocation2 + $0xe0] sm:$0xff]  ;;  %v6995_v22 = vld [vmem:[#allocation2 + $0xd8] sm:$0xff]  ;;  %v6978_v24 = vld [vmem:[#allocation2 + $0x50] sm:$0xff] }
  0x85   : > { %903 = vmatpush.bf16.msra.mxu3 %v6998_v9  ;;  %v6986_v25 = vld [vmem:[#allocation2 + $0x90] sm:$0xff]  ;;  %v6969_v27 = vld [vmem:[#allocation2 + $0x8] sm:$0xff]  ;;  %v6968_v31 = vld [vmem:[#allocation2] sm:$0xff] }
  0x86   : > { %862 = vmatpush.bf16.msra.mxu0 %v6973_v10  ;;  %v6994_v26 = vld [vmem:[#allocation2 + $0xd0] sm:$0xff]  ;;  %v6977_v28 = vld [vmem:[#allocation2 + $0x48] sm:$0xff]  ;;  %v6976_v32 = vld [vmem:[#allocation2 + $0x40] sm:$0xff] }
  0x87   : > { %574 = vperm.xlu0 %7165, %v564_v11   ;;  %876 = vmatpush.bf16.msra.mxu1 %v6981_v12  ;;  %v6985_v29 = vld [vmem:[#allocation2 + $0x88] sm:$0xff]  ;;  %v6984_v33 = vld [vmem:[#allocation2 + $0x80] sm:$0xff] }
  0x88   : > { %890 = vmatpush.bf16.msra.mxu2 %v6989_v13  ;;  %v6993_v30 = vld [vmem:[#allocation2 + $0xc8] sm:$0xff]  ;;  %v6992_v34 = vld [vmem:[#allocation2 + $0xc0] sm:$0xff] }
  0x89   : > { %904 = vmatpush.bf16.msra.mxu3 %v6997_v14 }
  0x8a   : > { %863 = vmatpush.bf16.msra.mxu0 %v6972_v15 }
  0x8b   : > { %877 = vmatpush.bf16.msra.mxu1 %v6980_v16 }
  0x8c   : > { %891 = vmatpush.bf16.msra.mxu2 %v6988_v17 }
  0x8d   : > { %905 = vmatpush.bf16.msra.mxu3 %v6996_v18 }
  0x8e   : > { %864 = vmatpush.bf16.msra.mxu0 %v6971_v19 }
  0x8f   : > { %878 = vmatpush.bf16.msra.mxu1 %v6979_v20 }
  0x90   : > { %892 = vmatpush.bf16.msra.mxu2 %v6987_v21 }
  0x91   : > { %906 = vmatpush.bf16.msra.mxu3 %v6995_v22 }
  0x92   : > { %865 = vmatpush.bf16.msra.mxu0 %v6970_v23 }
  0x93   : > { %879 = vmatpush.bf16.msra.mxu1 %v6978_v24 }
  0x94   : > { %893 = vmatpush.bf16.msra.mxu2 %v6986_v25 }
  0x95   : > { %907 = vmatpush.bf16.msra.mxu3 %v6994_v26 }
  0x96   : > { %866 = vmatpush.bf16.msra.mxu0 %v6969_v27 }
  0x97   : > { %880 = vmatpush.bf16.msra.mxu1 %v6977_v28 }
  0x98   : > { %894 = vmatpush.bf16.msra.mxu2 %v6985_v29 }
  0x99   : > { %908 = vmatpush.bf16.msra.mxu3 %v6993_v30 }
  0x9a   : > { %867 = vmatpush.bf16.msra.mxu0 %v6968_v31 }
  0x9b   : > { %881 = vmatpush.bf16.msra.mxu1 %v6976_v32 }
  0x9c   : > { %895 = vmatpush.bf16.msra.mxu2 %v6984_v33 }
  0x9d   : > { %909 = vmatpush.bf16.msra.mxu3 %v6992_v34 }
  0xf1   : > { %v572_v36 = vpop.permute.xlu0 %571 }
  0xf2   : > { %vm576_vm0 = vcmp.eq.s32.totalorder %v566_v37, %v572_v36  ;;  %vm577_vm5 = vcmp.eq.s32.totalorder %v567_v38, %v572_v36  ;;  %vm578_vm8 = vcmp.eq.s32.totalorder %v568_v39, %v572_v36  ;;  %vm579_vm10 = vcmp.eq.s32.totalorder %v569_v41, %v572_v36 }
  0xf9   : > { %v575_v40 = vpop.permute.xlu0 %574 }
  0xfa   : > { %vm580_vm1 = vcmp.eq.s32.totalorder %v566_v37, %v575_v40  ;;  %vm581_vm2 = vcmp.eq.s32.totalorder %v567_v38, %v575_v40  ;;  %vm582_vm3 = vcmp.eq.s32.totalorder %v568_v39, %v575_v40  ;;  %vm583_vm6 = vcmp.eq.s32.totalorder %v569_v41, %v575_v40 }
  0xfb   : > { %vm6599_vm4 = vmpackc.low %vm580_vm1, %vm576_vm0 }
  0xfc   : > { %6600 = vmatmul.msk.bf16.vlgmr.msra.gmra.mxu0 %vm6599_vm4, %v7801_v42  ;;  %vm6601_vm7 = vmpackc.low %vm581_vm2, %vm577_vm5 }
  0xfd   : > { %6602 = vmatmul.msk.bf16.vlgmr.msra.gmra.mxu1 %vm6601_vm7, %v7801_v42  ;;  %vm6603_vm9 = vmpackc.low %vm582_vm3, %vm578_vm8 }
  0xfe   : > { %6604 = vmatmul.msk.bf16.vlgmr.msra.gmra.mxu2 %vm6603_vm9, %v7801_v42  ;;  %vm6605_vm11 = vmpackc.low %vm583_vm6, %vm579_vm10 }
  0xff   : > { %6606 = vmatmul.msk.bf16.vlgmr.msra.gmra.mxu3 %vm6605_vm11, %v7801_v42 }
 0x179   : > { %v869_v43 = vpop.f32.mrf.mxu0 }
 0x17a   : > { %v883_v44 = vpop.f32.mrf.mxu1 }
 0x17b   : > { %v884_v45 = vadd.f32 %v883_v44, %v869_v43 }
 0x181   : > { %v897_v46 = vpop.f32.mrf.mxu2  ;;  %v871_v50 = vpop.f32.mrf.mxu0 }
 0x182   : > { %v898_v47 = vadd.f32 %v897_v46, %v884_v45  ;;  %v911_v48 = vpop.f32.mrf.mxu3  ;;  %v885_v51 = vpop.f32.mrf.mxu1 }
 0x183   : > { %v886_v52 = vadd.f32 %v885_v51, %v871_v50 }
 0x184   : > { %v912_v49 = vadd.f32 %v911_v48, %v898_v47 }
 0x186   : > { %916 = vst [vmem:[%s10337_s11] sm:$0xff] %v912_v49 }
 0x189   : > { %v899_v53 = vpop.f32.mrf.mxu2 }
 0x18a   : > { %v900_v54 = vadd.f32 %v899_v53, %v886_v52  ;;  %v913_v55 = vpop.f32.mrf.mxu3 }
 0x18c   : > { %v914_v56 = vadd.f32 %v913_v55, %v900_v54 }
 0x18e   : > { %917 = vst [vmem:[%s10337_s11 + $0x8] sm:$0xff] %v914_v56 }
 0x18f PF: > { %v8077_v57 = vld [vmem:[%s10337_s11] sm:$0xff]  ;;  %v6693_v61 = vld [vmem:[%s8032_s26 + $0xa8] sm:$0xf]  ;;  %v7022_v62 = vld [vmem:[%s8032_s26 + $0xb0] sm:$0xf0]  ;;  %v7802_v4 = vmov 128.0  }
 0x190   : > { %v921_v58 = vmul.f32 %v8077_v57, %v8077_v57  ;;  %v7021_v63 = vld [vmem:[%s8032_s26 + $0xac] sm:$0xf]  ;;  %v6694_v0 = vor.u32 %v7022_v62, %v6693_v61  ;;  %v6695_v1 = vld [vmem:[%s8032_s26 + $0xb4] sm:$0xf0]  ;;  %v6701_v2 = vld [vmem:[%s8032_s26 + $0xb0] sm:$0xf]  ;;  %7539 = vrcp.f32 %v7802_v4 }
 0x191   : > { %v7023_v3 = vld [vmem:[%s8032_s26 + $0xb8] sm:$0xf0]  ;;  %v6698_v5 = vor.u32 %v7021_v63, %v6695_v1  ;;  %v6681_v7 = vld [vmem:[%s8032_s26 + $0x90] sm:$0xf]  ;;  %v7018_v9 = vld [vmem:[%s8032_s26 + $0x94] sm:$0xf] }
 0x192   : > { %923 = vadd.xlane.f32.xlu0 %v921_v58  ;;  %v6702_v6 = vor.u32 %v7023_v3, %v6701_v2  ;;  %1126 = vmatpush.bf16.msra.mxu0 %v6694_v0  ;;  %v7019_v8 = vld [vmem:[%s8032_s26 + $0x98] sm:$0xf0]  ;;  %v6683_v11 = vld [vmem:[%s8032_s26 + $0x9c] sm:$0xf0]  ;;  %v6689_v12 = vld [vmem:[%s8032_s26 + $0x98] sm:$0xf] }
 0x193   : > { %1140 = vmatpush.bf16.msra.mxu1 %v6698_v5  ;;  %v6682_v10 = vor.u32 %v7019_v8, %v6681_v7  ;;  %v7020_v13 = vld [vmem:[%s8032_s26 + $0xa0] sm:$0xf0]  ;;  %v6686_v14 = vor.u32 %v7018_v9, %v6683_v11  ;;  %v6669_v17 = vld [vmem:[%s8032_s26 + $0x78] sm:$0xf]  ;;  %v7015_v19 = vld [vmem:[%s8032_s26 + $0x7c] sm:$0xf] }
 0x194   : > { %1154 = vmatpush.bf16.msra.mxu2 %v6702_v6  ;;  %v6690_v15 = vor.u32 %v7020_v13, %v6689_v12  ;;  %v7016_v18 = vld [vmem:[%s8032_s26 + $0x80] sm:$0xf0]  ;;  %v6671_v21 = vld [vmem:[%s8032_s26 + $0x84] sm:$0xf0]  ;;  %v6677_v22 = vld [vmem:[%s8032_s26 + $0x80] sm:$0xf] }
 0x195   : > { %v8084_v59 = vld [vmem:[%s10337_s11 + $0x8] sm:$0xff]  ;;  %v6670_v20 = vor.u32 %v7016_v18, %v6669_v17  ;;  %v6674_v24 = vor.u32 %v7015_v19, %v6671_v21  ;;  %v6657_v27 = vld [vmem:[%s8032_s26 + $0x60] sm:$0xf]  ;;  %v7012_v29 = vld [vmem:[%s8032_s26 + $0x64] sm:$0xf]  ;;  %s7803_s14 = smov 96  }
 0x196   : > { %v922_v60 = vmul.f32 %v8084_v59, %v8084_v59  ;;  %1127 = vmatpush.bf16.msra.mxu0 %v6682_v10  ;;  %v8100_v16 = vpop.eup %7539  ;;  %v7017_v23 = vld [vmem:[%s8032_s26 + $0x88] sm:$0xf0]  ;;  %v6659_v31 = vld [vmem:[%s8032_s26 + $0x6c] sm:$0xf0]  ;;  %v6665_v32 = vld [vmem:[%s8032_s26 + $0x68] sm:$0xf] }
 0x197   : > { %1141 = vmatpush.bf16.msra.mxu1 %v6686_v14  ;;  %v6678_v25 = vor.u32 %v7017_v23, %v6677_v22  ;;  %v928_v26 = vmul.f32 128.0, %v8100_v16  ;;  %v7013_v28 = vld [vmem:[%s8032_s26 + $0x68] sm:$0xf0]  ;;  %v7014_v33 = vld [vmem:[%s8032_s26 + $0x70] sm:$0xf0]  ;;  %v6662_v34 = vor.u32 %v7012_v29, %v6659_v31  ;;  %vm932_vm12 = vweird.f32 %v8100_v16  ;;  %s7804_s1 = smov 64  }
 0x198   : > { %1155 = vmatpush.bf16.msra.mxu2 %v6690_v15  ;;  %v6658_v30 = vor.u32 %v7013_v28, %v6657_v27  ;;  %v6666_v35 = vor.u32 %v7014_v33, %v6665_v32  ;;  %v6645_v37 = vld [vmem:[%s8032_s26 + $0x48] sm:$0xf]  ;;  %v7010_v38 = vld [vmem:[%s8032_s26 + $0x50] sm:$0xf0]  ;;  %v7009_v39 = vld [vmem:[%s8032_s26 + $0x4c] sm:$0xf] }
 0x199   : > { %v929_v36 = vsub.f32 1.0, %v928_v26  ;;  %v6646_v40 = vor.u32 %v7010_v38, %v6645_v37  ;;  %v6647_v41 = vld [vmem:[%s8032_s26 + $0x54] sm:$0xf0]  ;;  %v6653_v42 = vld [vmem:[%s8032_s26 + $0x50] sm:$0xf]  ;;  %vm1189_vm3 = vcmask 1047556  }
 0x19a   : > { %925 = vadd.xlane.f32.xlu0 %v922_v60  ;;  %1128 = vmatpush.bf16.msra.mxu0 %v6670_v20  ;;  %v7011_v43 = vld [vmem:[%s8032_s26 + $0x58] sm:$0xf0]  ;;  %v6650_v44 = vor.u32 %v7009_v39, %v6647_v41  ;;  %v6633_v47 = vld [vmem:[%s8032_s26 + $0x30] sm:$0xf]  ;;  %v7006_v49 = vld [vmem:[%s8032_s26 + $0x34] sm:$0xf] }
 0x19b   : > { %1142 = vmatpush.bf16.msra.mxu1 %v6674_v24  ;;  %v6654_v45 = vor.u32 %v7011_v43, %v6653_v42  ;;  %v930_v46 = vmul.f32 %v8100_v16, %v929_v36  ;;  %v7007_v48 = vld [vmem:[%s8032_s26 + $0x38] sm:$0xf0]  ;;  %v6635_v51 = vld [vmem:[%s8032_s26 + $0x3c] sm:$0xf0]  ;;  %v6641_v52 = vld [vmem:[%s8032_s26 + $0x38] sm:$0xf] }
 0x19c   : > { %1156 = vmatpush.bf16.msra.mxu2 %v6678_v25  ;;  %v6634_v50 = vor.u32 %v7007_v48, %v6633_v47  ;;  %v7008_v53 = vld [vmem:[%s8032_s26 + $0x40] sm:$0xf0]  ;;  %v6638_v54 = vor.u32 %v7006_v49, %v6635_v51  ;;  %v6621_v58 = vld [vmem:[%s8032_s26 + $0x18] sm:$0xf]  ;;  %v7003_v61 = vld [vmem:[%s8032_s26 + $0x1c] sm:$0xf] }
 0x19d   : > { %v6642_v55 = vor.u32 %v7008_v53, %v6641_v52  ;;  %v931_v56 = vadd.f32 %v8100_v16, %v930_v46  ;;  %v7004_v60 = vld [vmem:[%s8032_s26 + $0x20] sm:$0xf0]  ;;  %v6623_v63 = vld [vmem:[%s8032_s26 + $0x24] sm:$0xf0]  ;;  %v6629_v0 = vld [vmem:[%s8032_s26 + $0x20] sm:$0xf] }
 0x19e   : > { %1129 = vmatpush.bf16.msra.mxu0 %v6658_v30  ;;  %v6622_v62 = vor.u32 %v7004_v60, %v6621_v58  ;;  %v7005_v1 = vld [vmem:[%s8032_s26 + $0x28] sm:$0xf0]  ;;  %v6626_v2 = vor.u32 %v7003_v61, %v6623_v63  ;;  %v6609_v5 = vld [vmem:[%s8032_s26] sm:$0xf]  ;;  %v7000_v7 = vld [vmem:[%s8032_s26 + $0x4] sm:$0xf] }
 0x19f   : > { %1143 = vmatpush.bf16.msra.mxu1 %v6662_v34  ;;  %v6630_v3 = vor.u32 %v7005_v1, %v6629_v0  ;;  %v8137_v4 = vsel %vm932_vm12, %v8100_v16, %v931_v56  ;;  %v7001_v6 = vld [vmem:[%s8032_s26 + $0x8] sm:$0xf0]  ;;  %v6611_v9 = vld [vmem:[%s8032_s26 + $0xc] sm:$0xf0]  ;;  %v6617_v10 = vld [vmem:[%s8032_s26 + $0x8] sm:$0xf] }
 0x1a0   : > { %1157 = vmatpush.bf16.msra.mxu2 %v6666_v35  ;;  %10399 = vst [vmem:[#allocation16_spill] sm:$0xff] %v8137_v4  ;;  %v6610_v8 = vor.u32 %v7001_v6, %v6609_v5  ;;  %v7002_v11 = vld [vmem:[%s8032_s26 + $0x10] sm:$0xf0]  ;;  %v6614_v13 = vor.u32 %v7000_v7, %v6611_v9  ;;  %v7537_v34 = vld [vmem:[%s555_s9] ss:$0 sm:$0xff]  ;;  %s7805_s9 = smov 32  }
 0x1a1   : > { %v6618_v14 = vor.u32 %v7002_v11, %v6617_v10  ;;  %v7806_v42 = vmov 1983009808   ;;  %v7807_v52 = vmov 1934713408   ;;  %s10401_s3 = sld [smem:[#allocation46_spill]]  ;;  %s7808_s20 = smov 112  }
 0x1a2   : > { %1130 = vmatpush.bf16.msra.mxu0 %v6646_v40  ;;  %v1194_v43 = vunpack.c.l.s4 %v7806_v42  ;;  %v1218_v53 = vunpack.c.l.s4 %v7807_v52  ;;  %s7809_s29 = smov 16   ;;  %s10402_s28 = sld [smem:[#allocation47_spill]]  ;;  %vm1649_vm4 = vcmask 130048   ;;  %vm4674_vm5 = vcmask 261120  }
 0x1a3   : > { %1144 = vmatpush.bf16.msra.mxu1 %v6650_v44  ;;  %s10512_s26 = sld [smem:[#allocation48_spill]] }
 0x1a4   : > { %1158 = vmatpush.bf16.msra.mxu2 %v6654_v45  ;;  %v8183_v0 = vunpack.c.0.s8 %v1218_v53 }
 0x1a6   : > { %1131 = vmatpush.bf16.msra.mxu0 %v6634_v50  ;;  %v8177_v50 = vunpack.c.0.s8 %v1194_v43  ;;  %10400 = vst [vmem:[#allocation17_spill] sm:$0xff] %v8183_v0 }
 0x1a7   : > { %1145 = vmatpush.bf16.msra.mxu1 %v6638_v54 }
 0x1a8   : > { %1159 = vmatpush.bf16.msra.mxu2 %v6642_v55 }
 0x1aa   : > { %1132 = vmatpush.bf16.msra.mxu0 %v6622_v62 }
 0x1ab   : > { %1146 = vmatpush.bf16.msra.mxu1 %v6626_v2 }
 0x1ac   : > { %1160 = vmatpush.bf16.msra.mxu2 %v6630_v3 }
 0x1ae   : > { %1133 = vmatpush.bf16.msra.mxu0 %v6610_v8 }
 0x1af   : > { %1147 = vmatpush.bf16.msra.mxu1 %v6614_v13 }
 0x1b0   : > { %1161 = vmatpush.bf16.msra.mxu2 %v6618_v14 }
 0x205   : > { %v924_v12 = vpop.xlane.xlu0 %923 }
 0x206   : > { %v934_v15 = vmul.f32 %v8137_v4, %v924_v12  ;;  %v8195_v12 = vld [vmem:[%s10401_s3] sm:$0xff] }
 0x208   : > { %v936_v17 = vadd.f32 1e-06, %v934_v15  ;;  %v1457_v15 = vrot.slane %v8195_v12, 1 }
 0x20a   : > { %7541 = vrsqrt.f32 %v936_v17  ;;  %vm944_vm14 = vweird.f32 %v936_v17 }
 0x20d   : > { %v926_v16 = vpop.xlane.xlu0 %925 }
 0x20e   : > { %v935_v18 = vmul.f32 %v8137_v4, %v926_v16 }
 0x210   : > { %v7542_v19 = vpop.eup %7541  ;;  %v937_v20 = vadd.f32 1e-06, %v935_v18 }
 0x211   : > { %v939_v21 = vmul.f32 %v7542_v19, %v936_v17  ;;  %vm945_vm13 = vweird.f32 %v7542_v19 }
 0x212   : > { %7543 = vrsqrt.f32 %v937_v20  ;;  %vm946_vm15 = vmor %vm944_vm14, %vm945_vm13  ;;  %vm954_vm1 = vweird.f32 %v937_v20 }
 0x213   : > { %v940_v22 = vmul.f32 %v7542_v19, %v939_v21 }
 0x215   : > { %v941_v23 = vmul.f32 0.5, %v940_v22 }
 0x217   : > { %v942_v24 = vsub.f32 1.5, %v941_v23 }
 0x218   : > { %v7544_v25 = vpop.eup %7543 }
 0x219   : > { %v949_v26 = vmul.f32 %v7544_v25, %v937_v20  ;;  %v943_v27 = vmul.f32 %v7542_v19, %v942_v24  ;;  %vm955_vm0 = vweird.f32 %v7544_v25 }
 0x21a   : > { %vm956_vm2 = vmor %vm954_vm1, %vm955_vm0 }
 0x21b   : > { %v950_v28 = vmul.f32 %v7544_v25, %v949_v26  ;;  %v947_v30 = vsel %vm946_vm15, %v7542_v19, %v943_v27 }
 0x21c   : > { %v958_v33 = vmul.f32 %v947_v30, %v8077_v57 }
 0x21d   : > { %v951_v29 = vmul.f32 0.5, %v950_v28 }
 0x21e   : > { %v963_v37 = vmul.f32 %v7537_v34, %v958_v33  ;;  %v1462_v33 = vrot.slane %v8195_v12, 6 }
 0x21f   : > { %v952_v31 = vsub.f32 1.5, %v951_v29  ;;  %v1461_v29 = vrot.slane %v8195_v12, 5 }
 0x221   : > { %v953_v32 = vmul.f32 %v7544_v25, %v952_v31  ;;  %v8234_v43 = vperm.slane %v1461_v29, 0 }
 0x223   : > { %v957_v35 = vsel %vm956_vm2, %v7544_v25, %v953_v32  ;;  %v8223_v32 = vperm.slane %v1457_v15, 0 }
 0x224   : > { %v959_v36 = vmul.f32 %v957_v35, %v8084_v59 }
 0x226   : > { %v964_v38 = vmul.f32 %v7537_v34, %v959_v36  ;;  %v1463_v36 = vrot.slane %v8195_v12, 7 }
 0x228   : > { %v965_v39 = vpack.c.bf16 %v964_v38, %v963_v37 }
 0x22a   : > { %1134 = vmatmul.bf16.vlgmr.msra.gmra.mxu0 %v965_v39  ;;  %1148 = vmatmul.bf16.vlgmr.msra.gmra.mxu1 %v965_v39 }
 0x22b   : > { %1162 = vmatmul.bf16.vlgmr.msra.gmra.mxu2 %v965_v39 }
 0x2a7   : > { %v1135_v40 = vpop.f32.mrf.mxu0  ;;  %v1149_v41 = vpop.f32.mrf.mxu1 }
 0x2a8   : > { %1303 = vrot.lane.b32.xlu2 %v1149_v41, %s7803_s14  ;;  %1309 = vrot.lane.b32.xlu1 %v1149_v41, %s7804_s1  ;;  %v1323_v46 = vrot.slane %v1149_v41, 4  ;;  %v1191_v58 = vrot.slane %v1135_v40, 4 }
 0x2a9   : > { %1176 = vrot.lane.b32.xlu0 %v1135_v40, %s7804_s1 }
 0x2af   : > { %v8157_v57 = vpop.f32.mrf.mxu1  ;;  %v8163_v59 = vpop.f32.mrf.mxu0 }
 0x2b0   : > { %1315 = vrot.lane.b32.xlu1 %v1149_v41, %s7805_s9  ;;  %1170 = vrot.lane.b32.xlu2 %v1135_v40, %s7803_s14 }
 0x2b1   : > { %1317 = vrot.lane.b32.xlu0 %v8157_v57, %s7805_s9 }
 0x2b8   : > { %1311 = vrot.lane.b32.xlu2 %v8157_v57, %s7804_s1  ;;  %1182 = vrot.lane.b32.xlu1 %v1135_v40, %s7805_s9 }
 0x2b9   : > { %1178 = vrot.lane.b32.xlu0 %v8163_v59, %s7804_s1 }
 0x2c0   : > { %1305 = vrot.lane.b32.xlu1 %v8157_v57, %s7803_s14  ;;  %1172 = vrot.lane.b32.xlu2 %v8163_v59, %s7803_s14 }
 0x2c8   : > { %1184 = vrot.lane.b32.xlu1 %v8163_v59, %s7805_s9 }
 0x302   : > { %v1304_v47 = vpop.permute.xlu2 %1303 }
 0x303   : > { %v1335_v55 = vrot.slane %v1304_v47, 4 }
 0x30a   : > { %v1171_v6 = vpop.permute.xlu2 %1170 }
 0x30b   : > { %v1203_v20 = vrot.slane %v1171_v6, 4 }
 0x312   : > { %v8250_v53 = vpop.permute.xlu2 %1311 }
 0x31a   : > { %v1310_v44 = vpop.permute.xlu1 %1309 }
 0x31b   : > { %v1321_v45 = vrot.slane %v1310_v44, 4  ;;  %v1177_v48 = vpop.permute.xlu0 %1176  ;;  %v1324_v49 = vsel %vm1189_vm3, %v1310_v44, %v1323_v46 }
 0x31c   : > { %v1332_v54 = vperm.slane %v1324_v49, %v8177_v50  ;;  %v1188_v61 = vrot.slane %v1177_v48, 4  ;;  %v1192_v3 = vsel %vm1189_vm3, %v1177_v48, %v1191_v58  ;;  %v8242_v48 = vperm.slane %v1462_v33, 0 }
 0x31d   : > { %v1322_v51 = vsel %vm1189_vm3, %v1321_v45, %v1149_v41  ;;  %v1200_v17 = vperm.slane %v1192_v3, %v8177_v50 }
 0x31e   : > { %v1328_v56 = vperm.slane %v1322_v51, %v8177_v50  ;;  %v1359_v1 = vrot.slane %v1332_v54, 4  ;;  %v1190_v13 = vsel %vm1189_vm3, %v1188_v61, %v1135_v40 }
 0x31f   : > { %v1196_v22 = vperm.slane %v1190_v13, %v8177_v50  ;;  %v1227_v30 = vrot.slane %v1200_v17, 4 }
 0x320   : > { %v1347_v7 = vrot.slane %v1328_v56, 4 }
 0x321   : > { %v1215_v37 = vrot.slane %v1196_v22, 4 }
 0x322   : > { %v1316_v60 = vpop.permute.xlu1 %1315 }
 0x323   : > { %v1333_v62 = vrot.slane %v1316_v60, 4  ;;  %v1336_v63 = vsel %vm1189_vm3, %v1316_v60, %v1335_v55  ;;  %v8189_v10 = vpop.permute.xlu0 %1317  ;;  %v8254_v55 = vperm.slane %v1463_v36, 0 }
 0x324   : > { %v1344_v2 = vperm.slane %v1336_v63, %v8177_v50 }
 0x325   : > { %v1334_v5 = vsel %vm1189_vm3, %v1333_v62, %v1304_v47 }
 0x326   : > { %v1340_v8 = vperm.slane %v1334_v5, %v8177_v50  ;;  %v1357_v9 = vrot.slane %v1344_v2, 4  ;;  %v1360_v11 = vsel %vm1189_vm3, %v1344_v2, %v1359_v1  ;;  %v1458_v2 = vrot.slane %v8195_v12, 2 }
 0x327   : > { %v8199_v14 = vperm.slane %v1360_v11, %v8183_v0  ;;  %v1489_v11 = vperm.slane %v8195_v12, 0 }
 0x328   : > { %v1345_v16 = vrot.slane %v1340_v8, 4  ;;  %v1348_v18 = vsel %vm1189_vm3, %v1340_v8, %v1347_v7  ;;  %v1358_v19 = vsel %vm1189_vm3, %v1357_v9, %v1332_v54  ;;  %v8278_v9 = vperm.slane %v1458_v2, 0 }
 0x329   : > { %1774 = vrot.lane.b32.xlu2 %v8199_v14, %s7808_s20  ;;  %v8208_v21 = vperm.slane %v1348_v18, %v8183_v0  ;;  %v8213_v25 = vperm.slane %v1358_v19, %v8183_v0 }
 0x32a   : > { %v1183_v23 = vpop.permute.xlu1 %1182  ;;  %v1346_v24 = vsel %vm1189_vm3, %v1345_v16, %v1328_v56 }
 0x32b   : > { %v1201_v26 = vrot.slane %v1183_v23, 4  ;;  %v1204_v27 = vsel %vm1189_vm3, %v1183_v23, %v1203_v20  ;;  %1814 = vrot.lane.b32.xlu1 %v8208_v21, %s7809_s29  ;;  %v8219_v28 = vperm.slane %v1346_v24, %v8183_v0  ;;  %v1373_v40 = vrot.slane %v8213_v25, 4  ;;  %v8236_v45 = vpop.permute.xlu0 %1178  ;;  %v1173_v20 = vpop.permute.xlu2 %1172 }
 0x32c   : > { %v1212_v31 = vperm.slane %v1204_v27, %v8177_v50  ;;  %v1245_v60 = vrot.slane %v8236_v45, 4  ;;  %v8310_v27 = vld [vmem:[%s10401_s3 + $0x8] sm:$0xff] }
 0x32d   : > { %v1202_v34 = vsel %vm1189_vm3, %v1201_v26, %v1171_v6  ;;  %v1369_v35 = vrot.slane %v8219_v28, 4  ;;  %v1374_v56 = vsel %vm1189_vm3, 0.0, %v1373_v40  ;;  %v1460_v6 = vrot.slane %v8195_v12, 4 }
 0x32e   : > { %v1208_v38 = vperm.slane %v1202_v34, %v8177_v50  ;;  %v1228_v39 = vsel %vm1189_vm3, %v1212_v31, %v1227_v30  ;;  %v1225_v49 = vrot.slane %v1212_v31, 4  ;;  %v8269_v1 = vmul.f32 %v8234_v43, %v1374_v56 }
 0x32f   : > { %v1236_v41 = vperm.slane %v1228_v39, %v8183_v0  ;;  %v1370_v42 = vsel %vm1189_vm3, 0.0, %v1369_v35  ;;  %v1246_v7 = vsel %vm1189_vm3, %v1245_v60, %v8163_v59  ;;  %v8295_v18 = vperm.slane %v1460_v6, 0 }
 0x330   : > { %v1213_v44 = vrot.slane %v1208_v38, 4  ;;  %v1216_v46 = vsel %vm1189_vm3, %v1208_v38, %v1215_v37  ;;  %v8240_v47 = vmul.f32 %v8223_v32, %v1370_v42  ;;  %v1226_v3 = vsel %vm1189_vm3, %v1225_v49, %v1200_v17 }
 0x331   : > { %1822 = vrot.lane.b32.xlu2 %v8199_v14, %s7809_s29  ;;  %1565 = vrot.lane.b32.xlu0 %v1236_v41, %s7808_s20  ;;  %v8248_v51 = vperm.slane %v1216_v46, %v8183_v0  ;;  %v1243_v52 = vrot.slane %v1236_v41, 4  ;;  %v8258_v58 = vmul.f32 %v8242_v48, %v1236_v41  ;;  %v1232_v8 = vperm.slane %v1226_v3, %v8183_v0 }
 0x332   : > { %v8252_v54 = vpop.permute.xlu1 %1305  ;;  %v1214_v61 = vsel %vm1189_vm3, %v1213_v44, %v1196_v22  ;;  %v8285_v13 = vperm.slane %v1246_v7, %v8177_v50  ;;  %v1465_v31 = vrot.slane %v8310_v27, 2  ;;  %v1375_v35 = vrot.slane %v8199_v14, 4 }
 0x333   : > { %1557 = vrot.lane.b32.xlu1 %v8248_v51, %s7808_s20  ;;  %v1244_v62 = vsel %vm1189_vm3, 0.0, %v1243_v52  ;;  %v1220_v5 = vperm.slane %v1214_v61, %v8183_v0  ;;  %v8289_v17 = vmul.f32 %v8278_v9, %v8248_v51  ;;  %v8300_v22 = vmul.f32 %v8295_v18, %v1232_v8 }
 0x334   : > { %v8266_v63 = vmul.f32 %v8254_v55, %v1244_v62  ;;  %v1271_v24 = vrot.slane %v8285_v13, 4  ;;  %v8323_v33 = vperm.slane %v1465_v31, 0  ;;  %v8341_v36 = vsel %vm1189_vm3, 0.0, %v1375_v35 }
 0x335   : > { %v8293_v16 = vmul.f32 %v1489_v11, %v1220_v5  ;;  %v1377_v37 = vrot.slane %v8250_v53, 4  ;;  %v1389_v39 = vrot.slane %v8189_v10, 4  ;;  %v1237_v40 = vrot.slane %v1220_v5, 4 }
 0x336   : > { %v1241_v60 = vrot.slane %v1232_v8, 4  ;;  %v1371_v61 = vrot.slane %v8208_v21, 4  ;;  %v1734_v4 = vmul.f32 %v8295_v18, %v8213_v25 }
 0x337   : > { %v1378_v38 = vsel %vm1189_vm3, %v1377_v37, %v8157_v57  ;;  %v8359_v49 = vsel %vm1189_vm3, 0.0, %v1237_v40 }
 0x338   : > { %v1384_v44 = vperm.slane %v1378_v38, %v8177_v50  ;;  %v8375_v3 = vsel %vm1189_vm3, 0.0, %v1241_v60 }
 0x339   : > { %1766 = vrot.lane.b32.xlu2 %v8208_v21, %s7808_s20  ;;  %1613 = vrot.lane.b32.xlu0 %v1236_v41, %s7809_s29  ;;  %v1239_v41 = vrot.slane %v8248_v51, 4 }
 0x33a   : > { %v1185_v15 = vpop.permute.xlu1 %1184 }
 0x33b   : > { %v1257_v19 = vrot.slane %v1185_v15, 4  ;;  %1605 = vrot.lane.b32.xlu1 %v8248_v51, %s7809_s29  ;;  %v8362_v52 = vsel %vm1189_vm3, 0.0, %v1239_v41  ;;  %v1403_v51 = vrot.slane %v1384_v44, 4 }
 0x33d   : > { %v1258_v23 = vsel %vm1189_vm3, %v1257_v19, %v1173_v20  ;;  %v1391_v19 = vrot.slane %v8252_v54, 4 }
 0x33e   : > { %v8305_v26 = vperm.slane %v1258_v23, %v8177_v50 }
 0x340   : > { %v1272_v29 = vsel %vm1189_vm3, %v8305_v26, %v1271_v24  ;;  %v1247_v24 = vrot.slane %v8163_v59, 4 }
 0x341   : > { %1762 = vrot.lane.b32.xlu2 %v8219_v28, %s7808_s20  ;;  %1810 = vrot.lane.b32.xlu0 %v8219_v28, %s7809_s29  ;;  %v8319_v30 = vperm.slane %v1272_v29, %v8183_v0  ;;  %v1392_v29 = vsel %vm1189_vm3, %v8189_v10, %v1391_v19  ;;  %v8417_v10 = vld [vmem:[%s10402_s28] sm:$0xff] }
 0x342   : > { %v1480_v40 = vrot.slane %v8417_v10, 6 }
 0x343   : > { %1553 = vrot.lane.b32.xlu1 %v1220_v5, %s7808_s20  ;;  %v8327_v34 = vmul.f32 %v8323_v33, %v8319_v30 }
 0x349   : > { %1609 = vrot.lane.b32.xlu2 %v1232_v8, %s7809_s29  ;;  %1770 = vrot.lane.b32.xlu0 %v8213_v25, %s7808_s20 }
 0x34b   : > { %1601 = vrot.lane.b32.xlu1 %v1220_v5, %s7809_s29  ;;  %v8382_v5 = vsel %vm1189_vm3, 0.0, %v1371_v61 }
 0x351   : > { %1764 = vrot.lane.b32.xlu2 %v1370_v42, %s7808_s20  ;;  %1818 = vrot.lane.b32.xlu0 %v8213_v25, %s7809_s29 }
 0x353   : > { %1561 = vrot.lane.b32.xlu1 %v1232_v8, %s7808_s20  ;;  %v1379_v8 = vrot.slane %v8157_v57, 4  ;;  %v1248_v57 = vsel %vm1189_vm3, %v8236_v45, %v1247_v24 }
 0x354   : > { %v1256_v59 = vperm.slane %v1248_v57, %v8177_v50 }
 0x355   : > { %v1380_v23 = vsel %vm1189_vm3, %v8250_v53, %v1379_v8  ;;  %v1400_v53 = vperm.slane %v1392_v29, %v8177_v50 }
 0x356   : > { %v1388_v31 = vperm.slane %v1380_v23, %v8177_v50 }
 0x358   : > { %v1415_v45 = vrot.slane %v1388_v31, 4 }
 0x359   : > { %1812 = vrot.lane.b32.xlu2 %v1370_v42, %s7809_s29  ;;  %1615 = vrot.lane.b32.xlu0 %v1244_v62, %s7809_s29  ;;  %v1390_v42 = vsel %vm1189_vm3, %v1389_v39, %v8252_v54 }
 0x35a   : > { %v1396_v46 = vperm.slane %v1390_v42, %v8177_v50  ;;  %v1416_v39 = vsel %vm1189_vm3, %v1400_v53, %v1415_v45  ;;  %v1413_v42 = vrot.slane %v1400_v53, 4  ;;  %v1476_v45 = vrot.slane %v8417_v10, 2 }
 0x35b   : > { %1776 = vrot.lane.b32.xlu1 %v8341_v36, %s7808_s20 }
 0x35c   : > { %v1401_v6 = vrot.slane %v1396_v46, 4  ;;  %v1414_v60 = vsel %vm1189_vm3, %v1413_v42, %v1388_v31  ;;  %v1668_v42 = vperm.slane %v1476_v45, 0 }
 0x361   : > { %1772 = vrot.lane.b32.xlu2 %v1374_v56, %s7808_s20  ;;  %1820 = vrot.lane.b32.xlu0 %v1374_v56, %s7809_s29  ;;  %v1404_v56 = vsel %vm1189_vm3, %v1396_v46, %v1403_v51  ;;  %v1672_v46 = vperm.slane %v1480_v40, 0  ;;  %v1295_v40 = vrot.slane %v8319_v30, 4 }
 0x362   : > { %v8372_v2 = vperm.slane %v1404_v56, %v8183_v0 }
 0x363   : > { %1824 = vrot.lane.b32.xlu1 %v8341_v36, %s7809_s29 }
 0x364   : > { %v1427_v29 = vrot.slane %v8372_v2, 4 }
 0x369   : > { %1555 = vrot.lane.b32.xlu2 %v8359_v49, %s7808_s20  ;;  %1607 = vrot.lane.b32.xlu0 %v8362_v52, %s7809_s29 }
 0x36b   : > { %1567 = vrot.lane.b32.xlu1 %v1244_v62, %s7808_s20  ;;  %v1259_v62 = vrot.slane %v1173_v20, 4 }
 0x36d   : > { %v1260_v7 = vsel %vm1189_vm3, %v1185_v15, %v1259_v62  ;;  %v1402_v15 = vsel %vm1189_vm3, %v1401_v6, %v1384_v44  ;;  %v8428_v44 = vperm.slane %v1416_v39, %v8183_v0  ;;  %v1736_v6 = vmul.f32 %v8242_v48, %v8199_v14 }
 0x36e   : > { %v1268_v20 = vperm.slane %v1260_v7, %v8177_v50  ;;  %v8406_v54 = vperm.slane %v1402_v15, %v8183_v0  ;;  %v8442_v7 = vperm.slane %v1414_v60, %v8183_v0  ;;  %v1269_v14 = vrot.slane %v8305_v26, 4 }
 0x36f   : > { %v1431_v61 = vrot.slane %v8428_v44, 4  ;;  %v1283_v15 = vrot.slane %v1256_v59, 4 }
 0x370   : > { %v1281_v35 = vrot.slane %v1268_v20, 4  ;;  %v1270_v24 = vsel %vm1189_vm3, %v1269_v14, %v8285_v13  ;;  %v8498_v14 = vsel %vm1189_vm3, 0.0, %v1295_v40 }
 0x371   : > { %1563 = vrot.lane.b32.xlu2 %v8375_v3, %s7808_s20  ;;  %1782 = vrot.lane.b32.xlu0 %v8372_v2, %s7808_s20  ;;  %v8447_v19 = vsel %vm1189_vm3, 0.0, %v1431_v61  ;;  %v1284_v57 = vsel %vm1189_vm3, %v1268_v20, %v1283_v15  ;;  %v8467_v26 = vperm.slane %v1270_v24, %v8183_v0 }
 0x372   : > { %v1282_v38 = vsel %vm1189_vm3, %v1281_v35, %v1256_v59  ;;  %v8470_v35 = vsel %vm1189_vm3, 0.0, %v1427_v29  ;;  %v8477_v53 = vperm.slane %v1284_v57, %v8183_v0  ;;  %v1429_v29 = vrot.slane %v8442_v7, 4 }
 0x373   : > { %1768 = vrot.lane.b32.xlu1 %v8382_v5, %s7808_s20  ;;  %v8425_v41 = vperm.slane %v1282_v38, %v8183_v0 }
 0x374   : > { %v1299_v45 = vrot.slane %v8477_v53, 4 }
 0x379   : > { %1611 = vrot.lane.b32.xlu2 %v8375_v3, %s7809_s29  ;;  %1573 = vrot.lane.b32.xlu0 %v8319_v30, %s7808_s20 }
 0x37b   : > { %1816 = vrot.lane.b32.xlu1 %v8382_v5, %s7809_s29 }
 0x381   : > { %1778 = vrot.lane.b32.xlu2 %v8406_v54, %s7808_s20  ;;  %1621 = vrot.lane.b32.xlu0 %v8319_v30, %s7809_s29  ;;  %v1666_v30 = vperm.slane %v8417_v10, 0 }
 0x383   : > { %v1775_v37 = vpop.permute.xlu2 %1774  ;;  %1559 = vrot.lane.b32.xlu1 %v8362_v52, %s7808_s20 }
 0x389   : > { %1826 = vrot.lane.b32.xlu2 %v8406_v54, %s7809_s29  ;;  %1625 = vrot.lane.b32.xlu0 %v8425_v41, %s7809_s29 }
 0x38b   : > { %v1823_v51 = vpop.permute.xlu2 %1822  ;;  %1603 = vrot.lane.b32.xlu1 %v8359_v49, %s7809_s29 }
 0x38c   : > { %v1864_v56 = vsel %vm1649_vm4, %v1775_v37, %v1823_v51 }
 0x38d   : > { %v1880_v62 = vmul.f32 %v1864_v56, %v1672_v46 }
 0x38f   : > { %v8444_v8 = vadd.f32 %v1880_v62, %v1736_v6 }
 0x391   : > { %1786 = vrot.lane.b32.xlu2 %v8442_v7, %s7808_s20  ;;  %1792 = vrot.lane.b32.xlu0 %v8447_v19, %s7808_s20 }
 0x393   : > { %v1767_v23 = vpop.permute.xlu2 %1766  ;;  %1790 = vrot.lane.b32.xlu1 %v8428_v44, %s7808_s20 }
 0x399   : > { %1834 = vrot.lane.b32.xlu2 %v8442_v7, %s7809_s29  ;;  %1840 = vrot.lane.b32.xlu0 %v8447_v19, %s7809_s29 }
 0x39b   : > { %v1763_v48 = vpop.permute.xlu2 %1762  ;;  %1838 = vrot.lane.b32.xlu1 %v8428_v44, %s7809_s29 }
 0x39d   : > { %v1815_v31 = vpop.permute.xlu1 %1814 }
 0x39e   : > { %v1860_v6 = vsel %vm1649_vm4, %v1767_v23, %v1815_v31 }
 0x3a1   : > { %1569 = vrot.lane.b32.xlu2 %v8467_v26, %s7808_s20  ;;  %1784 = vrot.lane.b32.xlu0 %v8470_v35, %s7808_s20 }
 0x3a3   : > { %v8479_v13 = vpop.permute.xlu2 %1609  ;;  %v1566_v59 = vpop.permute.xlu0 %1565  ;;  %1581 = vrot.lane.b32.xlu1 %v8477_v53, %s7808_s20 }
 0x3a5   : > { %v1558_v20 = vpop.permute.xlu1 %1557 }
 0x3a9   : > { %1617 = vrot.lane.b32.xlu2 %v8467_v26, %s7809_s29  ;;  %1832 = vrot.lane.b32.xlu0 %v8470_v35, %s7809_s29 }
 0x3ab   : > { %v8488_v37 = vpop.permute.xlu2 %1764  ;;  %v1614_v38 = vpop.permute.xlu0 %1613  ;;  %1629 = vrot.lane.b32.xlu1 %v8477_v53, %s7809_s29 }
 0x3ac   : > { %v1656_v39 = vsel %vm1649_vm4, %v1566_v59, %v1614_v38  ;;  %v1730_v59 = vmul.f32 %v1489_v11, %v8219_v28  ;;  %v8536_v28 = vsel %vm1189_vm3, 0.0, %v1299_v45 }
 0x3ad   : > { %v1704_v51 = vmul.f32 %v1672_v46, %v1656_v39  ;;  %v1606_v56 = vpop.permute.xlu1 %1605  ;;  %v1876_v46 = vmul.f32 %v1860_v6, %v1668_v42 }
 0x3ae   : > { %v1652_v60 = vsel %vm1649_vm4, %v1558_v20, %v1606_v56  ;;  %v1732_v20 = vmul.f32 %v8278_v9, %v8208_v21 }
 0x3af   : > { %v1720_v61 = vadd.f32 %v1704_v51, %v8258_v58  ;;  %v1700_v62 = vmul.f32 %v1668_v42, %v1652_v60  ;;  %v1293_v42 = vrot.slane %v8467_v26, 4 }
 0x3b0   : > { %v8521_v39 = vadd.f32 %v1876_v46, %v1732_v20 }
 0x3b1   : > { %v1716_v15 = vadd.f32 %v1700_v62, %v8289_v17  ;;  %1575 = vrot.lane.b32.xlu0 %v8498_v14, %s7808_s20  ;;  %1577 = vrot.lane.b32.xlu2 %v8425_v41, %s7808_s20  ;;  %v1297_v17 = vrot.slane %v8425_v41, 4  ;;  %v8545_v62 = vsel %vm1189_vm3, 0.0, %v1293_v42 }
 0x3b3   : > { %v8506_v24 = vpop.permute.xlu2 %1812  ;;  %v1811_v58 = vpop.permute.xlu0 %1810  ;;  %1830 = vrot.lane.b32.xlu1 %v8372_v2, %s7809_s29  ;;  %v8527_v40 = vsel %vm1189_vm3, 0.0, %v1297_v17  ;;  %v1906_v6 = vrot.slane %v1716_v15, 4 }
 0x3b4   : > { %v1858_v23 = vsel %vm1649_vm4, %v1763_v48, %v1811_v58  ;;  %v8524_v48 = vsel %vm1189_vm3, 0.0, %v1429_v29  ;;  %v1478_v58 = vrot.slane %v8417_v10, 4 }
 0x3b5   : > { %v1874_v31 = vmul.f32 %v1858_v23, %v1666_v30  ;;  %v1554_v57 = vpop.permute.xlu1 %1553 }
 0x3b6   : > { %v1670_v15 = vperm.slane %v1478_v58, 0 }
 0x3b7   : > { %v8519_v38 = vadd.f32 %v1874_v31, %v1730_v59  ;;  %v1425_v31 = vrot.slane %v8406_v54, 4  ;;  %v1918_v59 = vrot.slane %v1720_v61, 4  ;;  %v1481_v61 = vrot.slane %v8417_v10, 7 }
 0x3b9   : > { %1836 = vrot.lane.b32.xlu2 %v8524_v48, %s7809_s29  ;;  %1579 = vrot.lane.b32.xlu0 %v8527_v40, %s7808_s20  ;;  %v8567_v45 = vsel %vm1189_vm3, 0.0, %v1425_v31  ;;  %v1526_v31 = vmul.f32 %v8234_v43, %v8375_v3 }
 0x3bb   : > { %v8538_v9 = vpop.permute.xlu2 %1772  ;;  %v1771_v11 = vpop.permute.xlu0 %1770  ;;  %1583 = vrot.lane.b32.xlu1 %v8536_v28, %s7808_s20 }
 0x3bd   : > { %v1602_v51 = vpop.permute.xlu1 %1601 }
 0x3be   : > { %v1650_v56 = vsel %vm1649_vm4, %v1554_v57, %v1602_v51 }
 0x3bf   : > { %v1698_v60 = vmul.f32 %v1666_v30, %v1650_v56 }
 0x3c1   : > { %v1714_v46 = vadd.f32 %v1698_v60, %v8293_v16  ;;  %1571 = vrot.lane.b32.xlu2 %v8545_v62, %s7808_s20  ;;  %1627 = vrot.lane.b32.xlu0 %v8527_v40, %s7809_s29  ;;  %v1479_v60 = vrot.slane %v8417_v10, 5 }
 0x3c3   : > { %v8554_v23 = vsel %vm1189_vm3, %v1906_v6, %v1714_v46  ;;  %v8556_v29 = vpop.permute.xlu2 %1555  ;;  %v1819_v30 = vpop.permute.xlu0 %1818  ;;  %1631 = vrot.lane.b32.xlu1 %v8536_v28, %s7809_s29 }
 0x3c4   : > { %10403 = vst [vmem:[#allocation18_spill] sm:$0xff] %v8554_v23  ;;  %v1862_v6 = vsel %vm1649_vm4, %v1771_v11, %v1819_v30  ;;  %v1737_v11 = vmul.f32 %v8254_v55, %v8341_v36 }
 0x3c5   : > { %v1562_v17 = vpop.permute.xlu1 %1561 }
 0x3c6   : > { %v1654_v16 = vsel %vm1649_vm4, %v1562_v17, %v8479_v13  ;;  %v1673_v17 = vperm.slane %v1481_v61, 0 }
 0x3c7   : > { %v1702_v57 = vmul.f32 %v1670_v15, %v1654_v16 }
 0x3c9   : > { %v1718_v20 = vadd.f32 %v1702_v57, %v8300_v22  ;;  %1619 = vrot.lane.b32.xlu2 %v8545_v62, %s7809_s29  ;;  %v8576_v22 = vperm.slane %v1479_v60, 0  ;;  %v1878_v57 = vmul.f32 %v1862_v6, %v1670_v15 }
 0x3cb   : > { %v8570_v42 = vsel %vm1189_vm3, %v1918_v59, %v1718_v20  ;;  %v1564_v51 = vpop.permute.xlu2 %1563  ;;  %v1616_v56 = vpop.permute.xlu0 %1615  ;;  %1780 = vrot.lane.b32.xlu1 %v8567_v45, %s7808_s20  ;;  %v1894_v61 = vadd.f32 %v1878_v57, %v1734_v4  ;;  %v10404_v4 = vpack.i.bf16 %v8519_v38, %v8521_v39  ;;  %v1477_v38 = vrot.slane %v8417_v10, 3 }
 0x3cd   : > { %v1777_v13 = vpop.permute.xlu1 %1776 }
 0x3d3   : > { %v1612_v46 = vpop.permute.xlu2 %1611  ;;  %v8579_v58 = vpop.permute.xlu0 %1820  ;;  %1828 = vrot.lane.b32.xlu1 %v8567_v45, %s7809_s29 }
 0x3d4   : > { %v1655_v16 = vsel %vm1649_vm4, %v1564_v51, %v1612_v46 }
 0x3d5   : > { %v1703_v59 = vmul.f32 %v8576_v22, %v1655_v16  ;;  %v1825_v20 = vpop.permute.xlu1 %1824 }
 0x3d6   : > { %v1865_v60 = vsel %vm1649_vm4, %v1777_v13, %v1825_v20 }
 0x3d7   : > { %v1719_v30 = vadd.f32 %v1703_v59, %v1526_v31  ;;  %v1881_v21 = vmul.f32 %v1865_v60, %v1673_v17  ;;  %v1459_v31 = vrot.slane %v8195_v12, 3 }
 0x3d9   : > { %v1897_v0 = vadd.f32 %v1881_v21, %v1737_v11  ;;  %v1492_v60 = vperm.slane %v1459_v31, 0  ;;  %v1669_v11 = vperm.slane %v1477_v38, 0  ;;  %v1522_v38 = vmul.f32 %v8223_v32, %v8359_v49 }
 0x3db   : > { %v8592_v51 = vpop.permute.xlu2 %1778  ;;  %v1608_v46 = vpop.permute.xlu0 %1607  ;;  %1788 = vrot.lane.b32.xlu1 %v8524_v48, %s7808_s20  ;;  %v7188_v43 = vpack.i.bf16 %v1897_v0, %v1894_v61 }
 0x3dd   : > { %v1568_v3 = vpop.permute.xlu1 %1567 }
 0x3de   : > { %v1657_v15 = vsel %vm1649_vm4, %v1568_v3, %v1616_v56 }
 0x3df   : > { %v1705_v13 = vmul.f32 %v1673_v17, %v1657_v15  ;;  %v1524_v15 = vmul.f32 %v1492_v60, %v8362_v52 }
 0x3e1   : > { %v1721_v55 = vadd.f32 %v1705_v13, %v8266_v63  ;;  %v8615_v63 = vld [vmem:[%s10402_s28 + $0x8] sm:$0xff] }
 0x3e2   : > { %v1483_v17 = vrot.slane %v8615_v63, 2 }
 0x3e3   : > { %v1924_v36 = vrot.slane %v1721_v55, 4  ;;  %v8598_v6 = vpop.permute.xlu2 %1826  ;;  %v8600_v16 = vpop.permute.xlu0 %1782  ;;  %1623 = vrot.lane.b32.xlu1 %v8498_v14, %s7809_s29  ;;  %7167 = vxpose.xlu0.b32.start.end [1/1] (short) (narrow) %v10404_v4, 32  ;;  %v1475_v55 = vrot.slane %v8417_v10, 1 }
 0x3e4   : > { %v8620_v39 = vperm.slane %v1483_v17, 0 }
 0x3e5   : > { %v8608_v0 = vsel %vm1189_vm3, %v1924_v36, %v1719_v30  ;;  %v1769_v25 = vpop.permute.xlu1 %1768  ;;  %v8630_v23 = vperm.slane %v1475_v55, 0  ;;  %v1485_v55 = vrot.slane %v8615_v63, 4 }
 0x3eb   : > { %v8610_v18 = vpop.permute.xlu2 %1786  ;;  %v1574_v21 = vpop.permute.xlu0 %1573 }
 0x3ed   : > { %v1817_v56 = vpop.permute.xlu1 %1816 }
 0x3f3   : > { %v8622_v57 = vpop.permute.xlu2 %1834  ;;  %v1622_v59 = vpop.permute.xlu0 %1621 }
 0x3f4   : > { %v1660_v20 = vsel %vm1649_vm4, %v1574_v21, %v1622_v59 }
 0x3f5   : > { %v1708_v30 = vmul.f32 %v8620_v39, %v1660_v20  ;;  %v1560_v61 = vpop.permute.xlu1 %1559  ;;  %v1497_v20 = vperm.slane %v8310_v27, 0 }
 0x3f6   : > { %v1653_v3 = vsel %vm1649_vm4, %v1560_v61, %v1608_v46 }
 0x3f7   : > { %v1724_v12 = vadd.f32 %v1708_v30, %v8327_v34  ;;  %v1701_v13 = vmul.f32 %v1669_v11, %v1653_v3  ;;  %v1674_v34 = vperm.slane %v8615_v63, 0  ;;  %v1529_v32 = vmul.f32 %v1497_v20, %v8467_v26 }
 0x3f8   : > { %v1861_v26 = vsel %vm1649_vm4, %v1769_v25, %v1817_v56 }
 0x3f9   : > { %v1717_v36 = vadd.f32 %v1701_v13, %v1524_v15  ;;  %v1488_v13 = vrot.slane %v8615_v63, 7 }
 0x3fb   : > { %v1570_v4 = vpop.permute.xlu2 %1569  ;;  %v1626_v17 = vpop.permute.xlu0 %1625  ;;  %v1912_v52 = vrot.slane %v1717_v36, 4  ;;  %v1962_v36 = vrot.slane %v1724_v12, 4 }
 0x3fd   : > { %v1604_v21 = vpop.permute.xlu1 %1603 }
 0x3fe   : > { %v1651_v31 = vsel %vm1649_vm4, %v8556_v29, %v1604_v21  ;;  %v1470_v29 = vrot.slane %v8310_v27, 7 }
 0x3ff   : > { %v1699_v46 = vmul.f32 %v8630_v23, %v1651_v31 }
 0x401   : > { %v1715_v59 = vadd.f32 %v1699_v46, %v1522_v38  ;;  %v8659_v38 = vperm.slane %v1488_v13, 0  ;;  %v8662_v46 = vperm.slane %v1485_v55, 0  ;;  %v1877_v13 = vmul.f32 %v1861_v26, %v1669_v11 }
 0x403   : > { %v8639_v10 = vsel %vm1189_vm3, %v1912_v52, %v1715_v59  ;;  %v1618_v30 = vpop.permute.xlu2 %1617  ;;  %v1793_v61 = vpop.permute.xlu0 %1792  ;;  %7189 = vxpose.xlu0.b32.start.end [1/1] (short) (narrow) %v7188_v43, 32  ;;  %v1467_v43 = vrot.slane %v8310_v27, 4 }
 0x404   : > { %v1658_v3 = vsel %vm1649_vm4, %v1570_v4, %v1618_v30  ;;  %v8654_v4 = vperm.slane %v1470_v29, 0 }
 0x405   : > { %v1706_v49 = vmul.f32 %v1674_v34, %v1658_v3  ;;  %v8649_v15 = vpop.permute.xlu1 %1790  ;;  %v8664_v59 = vperm.slane %v1467_v43, 0 }
 0x406   : > { %v1745_v29 = vmul.f32 %v8654_v4, %v8447_v19 }
 0x407   : > { %v1722_v21 = vadd.f32 %v1706_v49, %v1529_v32  ;;  %v1533_v49 = vmul.f32 %v8664_v59, %v8425_v41  ;;  %v1487_v41 = vrot.slane %v8615_v63, 6 }
 0x409   : > { %v8657_v31 = vsel %vm1189_vm3, %v1962_v36, %v1722_v21  ;;  %v1733_v21 = vmul.f32 %v1492_v60, %v8382_v5  ;;  %v1680_v26 = vperm.slane %v1487_v41, 0  ;;  %v1482_v5 = vrot.slane %v8615_v63, 1 }
 0x40b   : > { %v1841_v52 = vpop.permute.xlu0 %1840  ;;  %v1578_v30 = vpop.permute.xlu2 %1577 }
 0x40c   : > { %v1873_v12 = vsel %vm1649_vm4, %v1793_v61, %v1841_v52  ;;  %v1662_v3 = vsel %vm1649_vm4, %v1578_v30, %v1626_v17  ;;  %v1893_v61 = vadd.f32 %v1877_v13, %v1733_v21  ;;  %v1469_v30 = vrot.slane %v8310_v27, 6 }
 0x40d   : > { %v1889_v32 = vmul.f32 %v1873_v12, %v8659_v38  ;;  %v1710_v25 = vmul.f32 %v8662_v46, %v1662_v3  ;;  %v1839_v56 = vpop.permute.xlu1 %1838  ;;  %v8690_v13 = vperm.slane %v1482_v5, 0  ;;  %v1859_v21 = vsel %vm1649_vm4, %v8488_v37, %v8506_v24 }
 0x40e   : > { %v7210_v52 = vpack.i.bf16 %v8444_v8, %v1893_v61  ;;  %v1503_v3 = vperm.slane %v1469_v30, 0 }
 0x40f   : > { %v1726_v55 = vadd.f32 %v1710_v25, %v1533_v49  ;;  %v8674_v36 = vadd.f32 %v1889_v32, %v1745_v29  ;;  %v1464_v32 = vrot.slane %v8310_v27, 1 }
 0x410   : > { %v1535_v49 = vmul.f32 %v1503_v3, %v8477_v53 }
 0x411   : > { %v8695_v61 = vperm.slane %v1464_v32, 0 }
 0x413   : > { %v8677_v43 = vpop.permute.xlu0 %1784  ;;  %v8679_v17 = vpop.permute.xlu2 %1836  ;;  %v1530_v53 = vmul.f32 %v8695_v61, %v8545_v62  ;;  %v1872_v62 = vsel %vm1649_vm4, %v8649_v15, %v1839_v56 }
 0x415   : > { %v1582_v19 = vpop.permute.xlu1 %1581 }
 0x418   : > { %7211 = vxpose.xlu1.b32.start.end [1/1] (short) (narrow) %v7210_v52, 32 }
 0x41b   : > { %v8684_v12 = vpop.permute.xlu0 %1832  ;;  %v1572_v11 = vpop.permute.xlu2 %1571 }
 0x41d   : > { %v1630_v29 = vpop.permute.xlu1 %1629 }
 0x41e   : > { %v1664_v60 = vsel %vm1649_vm4, %v1582_v19, %v1630_v29  ;;  %v1875_v29 = vmul.f32 %v1859_v21, %v8630_v23  ;;  %v1863_v21 = vsel %vm1649_vm4, %v8538_v9, %v8579_v58 }
 0x41f   : > { %v1712_v8 = vmul.f32 %v1680_v26, %v1664_v60 }
 0x420   : > { %v1891_v23 = vadd.f32 %v1875_v29, %v8240_v47  ;;  %v1744_v47 = vmul.f32 %v1503_v3, %v8428_v44 }
 0x421   : > { %v1728_v25 = vadd.f32 %v1712_v8, %v1535_v49 }
 0x423   : > { %v1974_v52 = vrot.slane %v1728_v25, 4  ;;  %v8697_v41 = vpop.permute.xlu0 %1575  ;;  %v1620_v30 = vpop.permute.xlu2 %1619 }
 0x424   : > { %v1659_v19 = vsel %vm1649_vm4, %v1572_v11, %v1620_v30  ;;  %v1740_v11 = vmul.f32 %v8323_v33, %v8372_v2  ;;  %v1468_v30 = vrot.slane %v8310_v27, 5  ;;  %v1879_v33 = vmul.f32 %v1863_v21, %v8576_v22 }
 0x425   : > { %v8704_v5 = vsel %vm1189_vm3, %v1974_v52, %v1726_v55  ;;  %v1707_v60 = vmul.f32 %v8690_v13, %v1659_v19  ;;  %v1831_v49 = vpop.permute.xlu1 %1830  ;;  %v1486_v52 = vrot.slane %v8615_v63, 5  ;;  %v1536_v22 = vmul.f32 %v8654_v4, %v8536_v28 }
 0x426   : > { %v1868_v37 = vsel %vm1649_vm4, %v8600_v16, %v1831_v49  ;;  %v1502_v15 = vperm.slane %v1468_v30, 0  ;;  %v1929_v28 = vperm.slane %v8608_v0, %v8177_v50  ;;  %v1869_v4 = vsel %vm1649_vm4, %v8677_v43, %v8684_v12 }
 0x427   : > { %v8709_v24 = vadd.f32 %v1707_v60, %v1530_v53  ;;  %v1884_v32 = vmul.f32 %v1868_v37, %v8620_v39  ;;  %v1888_v39 = vmul.f32 %v1872_v62, %v1680_v26  ;;  %v1679_v2 = vperm.slane %v1486_v52, 0 }
 0x428   : > { %v1895_v53 = vadd.f32 %v1879_v33, %v8269_v1  ;;  %v1534_v9 = vmul.f32 %v1502_v15, %v8527_v40  ;;  %v1466_v1 = vrot.slane %v8310_v27, 3  ;;  %v1870_v21 = vsel %vm1649_vm4, %v8610_v18, %v8622_v57 }
 0x429   : > { %v1900_v8 = vadd.f32 %v1884_v32, %v1740_v11  ;;  %v1904_v19 = vadd.f32 %v1888_v39, %v1744_v47  ;;  %v1484_v32 = vrot.slane %v8615_v63, 3  ;;  %v1886_v43 = vmul.f32 %v1870_v21, %v8662_v46 }
 0x42a   : > { %v1739_v30 = vmul.f32 %v8695_v61, %v8567_v45  ;;  %v1738_v57 = vmul.f32 %v1497_v20, %v8406_v54  ;;  %v1742_v63 = vmul.f32 %v8664_v59, %v8442_v7 }
 0x42b   : > { %v1580_v55 = vpop.permute.xlu0 %1579  ;;  %v7254_v25 = vpack.i.bf16 %v1891_v23, %v1900_v8  ;;  %v7232_v49 = vpack.i.bf16 %v1895_v53, %v1904_v19  ;;  %v1923_v8 = vperm.slane %v8570_v42, %v8177_v50  ;;  %v1677_v62 = vperm.slane %v1484_v32, 0 }
 0x42c   : > { %v1942_v42 = vrot.slane %v1929_v28, 4  ;;  %v1902_v33 = vadd.f32 %v1886_v43, %v1742_v63 }
 0x42d   : > { %v1584_v16 = vpop.permute.xlu1 %1583  ;;  %7255 = vxpose.xlu2.b32.start.end [1/1] (short) (narrow) %v7254_v25, 32  ;;  %v1866_v25 = vsel %vm1649_vm4, %v8592_v51, %v8598_v6 }
 0x42e   : > { %v1882_v39 = vmul.f32 %v1866_v25, %v1674_v34  ;;  %v1943_v6 = vsel %vm1189_vm3, %v1942_v42, %v1923_v8 }
 0x430   : > { %v1898_v34 = vadd.f32 %v1882_v39, %v1738_v57 }
 0x433   : > { %v1628_v56 = vpop.permute.xlu0 %1627 }
 0x434   : > { %v1663_v29 = vsel %vm1649_vm4, %v1580_v55, %v1628_v56  ;;  %v1944_v55 = vrot.slane %v1923_v8, 4 }
 0x435   : > { %v1711_v58 = vmul.f32 %v1679_v2, %v1663_v29  ;;  %v1632_v60 = vpop.permute.xlu1 %1631 }
 0x436   : > { %v1665_v26 = vsel %vm1649_vm4, %v1584_v16, %v1632_v60  ;;  %v1885_v16 = vmul.f32 %v1869_v4, %v1677_v62  ;;  %v1945_v52 = vsel %vm1189_vm3, %v1929_v28, %v1944_v55  ;;  %v1979_v28 = vperm.slane %v8704_v5, %v8177_v50 }
 0x437   : > { %v1727_v37 = vadd.f32 %v1711_v58, %v1534_v9  ;;  %v1713_v44 = vmul.f32 %v8659_v38, %v1665_v26  ;;  %v1500_v38 = vperm.slane %v1466_v1, 0  ;;  %v10405_v58 = vld [vmem:[#allocation18_spill] sm:$0xff] }
 0x438   : > { %7233 = vxpose.xlu1.b32.start.end [1/1] (short) (narrow) %v7232_v49, 32  ;;  %v1911_v60 = vperm.slane %v10405_v58, %v8177_v50 }
 0x439   : > { %v1729_v3 = vadd.f32 %v1713_v44, %v1536_v22  ;;  %v1741_v0 = vmul.f32 %v1500_v38, %v8470_v35  ;;  %v1532_v59 = vmul.f32 %v1500_v38, %v8498_v14  ;;  %v2000_v38 = vrot.slane %v1979_v28, 4 }
 0x43b   : > { %v1980_v11 = vrot.slane %v1729_v3, 4  ;;  %v1901_v35 = vadd.f32 %v1885_v16, %v1741_v0 }
 0x43d   : > { %v8734_v40 = vsel %vm1189_vm3, %v1980_v11, %v1727_v37  ;;  %v1781_v23 = vpop.permute.xlu1 %1780  ;;  %v7276_v47 = vpack.i.bf16 %v1901_v35, %v1898_v34 }
 0x43e   : > { %v1985_v4 = vperm.slane %v8734_v40, %v8177_v50  ;;  %v1967_v40 = vperm.slane %v8657_v31, %v8177_v50 }
 0x440   : > { %v1998_v55 = vrot.slane %v1985_v4, 4  ;;  %v2001_v25 = vsel %vm1189_vm3, %v1985_v4, %v2000_v38 }
 0x442   : > { %v1999_v21 = vsel %vm1189_vm3, %v1998_v55, %v1979_v28 }
 0x445   : > { %v1829_v12 = vpop.permute.xlu1 %1828 }
 0x446   : > { %v1867_v51 = vsel %vm1649_vm4, %v1781_v23, %v1829_v12 }
 0x447   : > { %v1883_v18 = vmul.f32 %v1867_v51, %v8690_v13  ;;  %v1743_v13 = vmul.f32 %v1502_v15, %v8524_v48  ;;  %v1932_v15 = vrot.slane %v1911_v60, 4 }
 0x449   : > { %v1899_v46 = vadd.f32 %v1883_v18, %v1739_v30 }
 0x44b   : > { %v7298_v19 = vpack.i.bf16 %v1902_v33, %v1899_v46 }
 0x44d   : > { %v1789_v45 = vpop.permute.xlu1 %1788  ;;  %7277 = vxpose.xlu2.b32.start.end [1/1] (short) (narrow) %v7276_v47, 32  ;;  %7299 = vxpose.xlu0.b32.start.end [1/1] (short) (narrow) %v7298_v19, 32 }
 0x44e   : > { %v1871_v61 = vsel %vm1649_vm4, %v1789_v45, %v8679_v17  ;;  %v1917_v17 = vperm.slane %v8639_v10, %v8177_v50 }
 0x44f   : > { %v1887_v56 = vmul.f32 %v1871_v61, %v1679_v2  ;;  %v10406_v2 = vld [vmem:[#allocation17_spill] sm:$0xff] }
 0x450   : > { %v1930_v26 = vrot.slane %v1917_v17, 4  ;;  %v1933_v14 = vsel %vm1189_vm3, %v1917_v17, %v1932_v15 }
 0x451   : > { %v1903_v27 = vadd.f32 %v1887_v56, %v1743_v13  ;;  %v1941_v49 = vperm.slane %v1933_v14, %v10406_v2  ;;  %v1988_v56 = vrot.slane %v1967_v40, 4 }
 0x452   : > { %v1931_v37 = vsel %vm1189_vm3, %v1930_v26, %v1911_v60 }
 0x453   : > { %v7320_v54 = vpack.i.bf16 %v1903_v27, %v8674_v36  ;;  %v1953_v36 = vperm.slane %v1945_v52, %v10406_v2  ;;  %v1937_v44 = vperm.slane %v1931_v37, %v10406_v2 }
 0x455   : > { %v1624_v20 = vpop.permute.xlu1 %1623  ;;  %v1958_v22 = vrot.slane %v1953_v36, 4  ;;  %v1956_v32 = vrot.slane %v1937_v44, 4 }
 0x456   : > { %v1661_v7 = vsel %vm1649_vm4, %v8697_v41, %v1624_v20  ;;  %v1949_v41 = vperm.slane %v1943_v6, %v10406_v2 }
 0x457   : > { %v1709_v29 = vmul.f32 %v1677_v62, %v1661_v7  ;;  %v8784_v10 = vsel %vm1189_vm3, %v1958_v22, %v1941_v49  ;;  %v2005_v7 = vperm.slane %v1999_v21, %v10406_v2 }
 0x458   : > { %v1954_v3 = vrot.slane %v1949_v41, 4  ;;  %10407 = vst [vmem:[#allocation18_spill] sm:$0xff] %v8784_v10  ;;  %v8793_v23 = vsel %vm1189_vm3, %v1949_v41, %v1956_v32 }
 0x459   : > { %v1725_v53 = vadd.f32 %v1709_v29, %v1532_v59  ;;  %10410 = vst [vmem:[#allocation20_spill] sm:$0xff] %v8793_v23 }
 0x45a   : > { %v8787_v11 = vsel %vm1189_vm3, %v1954_v3, %v1937_v44 }
 0x45b   : > { %v1968_v9 = vrot.slane %v1725_v53, 4  ;;  %10408 = vst [vmem:[#allocation17_spill] sm:$0xff] %v8787_v11 }
 0x45d   : > { %v1969_v48 = vsel %vm1189_vm3, %v1968_v9, %v8709_v24  ;;  %v1960_v24 = vrot.slane %v1941_v49, 4  ;;  %v2010_v49 = vrot.slane %v2005_v7, 4 }
 0x45e   : > { %v1973_v57 = vperm.slane %v1969_v48, %v8177_v50  ;;  %v2009_v48 = vperm.slane %v2001_v25, %v10406_v2 }
 0x45f   : > { %v8790_v1 = vsel %vm1189_vm3, %v1953_v36, %v1960_v24 }
 0x460   : > { %10409 = vst [vmem:[#allocation19_spill] sm:$0xff] %v8790_v1  ;;  %v1986_v61 = vrot.slane %v1973_v57, 4  ;;  %v1989_v60 = vsel %vm1189_vm3, %v1973_v57, %v1988_v56 }
 0x462   : > { %v1987_v14 = vsel %vm1189_vm3, %v1986_v61, %v1967_v40 }
 0x463   : > { %v1993_v3 = vperm.slane %v1987_v14, %v10406_v2 }
 0x465   : > { %v2012_v38 = vrot.slane %v1993_v3, 4  ;;  %v8848_v55 = vsel %vm1189_vm3, %v2010_v49, %v1993_v3 }
 0x466   : > { %10412 = vst [vmem:[#allocation22_spill] sm:$0xff] %v8848_v55 }
 0x46d   : > { %7321 = vxpose.xlu2.b32.start.end [1/1] (short) (narrow) %v7320_v54, 32 }
 0x487   : > { %v7168_v8 = vpop.trf.xlu0 }
 0x488   : > { %v7172_v42 = vunpack.i.h.bf16 %v7168_v8  ;;  %v7169_v39 = vunpack.i.l.bf16 %v7168_v8  ;;  %v1997_v8 = vperm.slane %v1989_v60, %v10406_v2 }
 0x48a   : > { %v2532_v0 = vrot.slane %v7172_v42, 4  ;;  %v2530_v12 = vrot.slane %v7169_v39, 4 }
 0x48c   : > { %v2533_v30 = vsel %vm1189_vm3, %v7169_v39, %v2532_v0  ;;  %v2531_v63 = vsel %vm1189_vm3, %v2530_v12, %v7172_v42  ;;  %v8865_v12 = vsel %vm1189_vm3, %v2005_v7, %v2012_v38 }
 0x48d   : > { %v8808_v35 = vperm.slane %v2533_v30, %v8177_v50  ;;  %v8813_v13 = vperm.slane %v2531_v63, %v8177_v50  ;;  %10415 = vst [vmem:[#allocation25_spill] sm:$0xff] %v8865_v12 }
 0x48f   : > { %v7173_v62 = vpop.trf.xlu0  ;;  %10411 = vst [vmem:[#allocation21_spill] sm:$0xff] %v8808_v35  ;;  %v2592_v31 = vrot.slane %v8808_v35, 4 }
 0x490   : > { %v7177_v43 = vunpack.i.h.bf16 %v7173_v62  ;;  %v7174_v51 = vunpack.i.l.bf16 %v7173_v62  ;;  %v2014_v62 = vrot.slane %v2009_v48, 4 }
 0x492   : > { %v2756_v5 = vrot.slane %v7177_v43, 4  ;;  %v2754_v34 = vrot.slane %v7174_v51, 4  ;;  %v8858_v42 = vsel %vm1189_vm3, %v2014_v62, %v1997_v8 }
 0x493   : > { %10414 = vst [vmem:[#allocation24_spill] sm:$0xff] %v8858_v42 }
 0x494   : > { %v2757_v33 = vsel %vm1189_vm3, %v7174_v51, %v2756_v5  ;;  %v2755_v27 = vsel %vm1189_vm3, %v2754_v34, %v7177_v43 }
 0x495   : > { %v8818_v54 = vperm.slane %v2757_v33, %v8177_v50  ;;  %v8830_v36 = vperm.slane %v2755_v27, %v8177_v50 }
 0x497   : > { %v7178_v16 = vpop.trf.xlu0 }
 0x498   : > { %v7182_v6 = vunpack.i.h.bf16 %v7178_v16  ;;  %v7179_v46 = vunpack.i.l.bf16 %v7178_v16 }
 0x49a   : > { %v2980_v47 = vrot.slane %v7182_v6, 4  ;;  %v2978_v20 = vrot.slane %v7179_v46, 4 }
 0x49c   : > { %v2981_v29 = vsel %vm1189_vm3, %v7179_v46, %v2980_v47  ;;  %v2979_v26 = vsel %vm1189_vm3, %v2978_v20, %v7182_v6  ;;  %v2016_v46 = vrot.slane %v1997_v8, 4 }
 0x49d   : > { %v8835_v41 = vperm.slane %v2981_v29, %v8177_v50  ;;  %v8845_v28 = vperm.slane %v2979_v26, %v8177_v50 }
 0x49f   : > { %v7183_v52 = vpop.trf.xlu0 }
 0x4a0   : > { %v7187_v19 = vunpack.i.h.bf16 %v7183_v52  ;;  %v7184_v45 = vunpack.i.l.bf16 %v7183_v52 }
 0x4a2   : > { %v3204_v53 = vrot.slane %v7187_v19, 4  ;;  %v3202_v9 = vrot.slane %v7184_v45, 4 }
 0x4a4   : > { %v3203_v37 = vsel %vm1189_vm3, %v3202_v9, %v7187_v19  ;;  %v3205_v44 = vsel %vm1189_vm3, %v7184_v45, %v3204_v53 }
 0x4a5   : > { %v8852_v21 = vperm.slane %v3203_v37, %v8177_v50  ;;  %v8855_v16 = vperm.slane %v3205_v44, %v8177_v50  ;;  %v2580_v37 = vrot.slane %v8813_v13, 4 }
 0x4a7   : > { %v8802_v18 = vpop.trf.xlu0  ;;  %10413 = vst [vmem:[#allocation23_spill] sm:$0xff] %v8852_v21 }
 0x4a8   : > { %v7191_v15 = vunpack.i.l.bf16 %v8802_v18  ;;  %v10354_v39 = vunpack.i.h.bf16 %v8802_v18 }
 0x4aa   : > { %v2556_v4 = vrot.slane %v7191_v15, 4  ;;  %v8886_v20 = vrot.slane %v10354_v39, 4 }
 0x4af   : > { %v8824_v58 = vpop.trf.xlu0 }
 0x4b0   : > { %v10351_v43 = vunpack.i.h.bf16 %v8824_v58  ;;  %v7196_v57 = vunpack.i.l.bf16 %v8824_v58 }
 0x4b2   : > { %v8895_v9 = vrot.slane %v10351_v43, 4 }
 0x4b7   : > { %v8869_v5 = vpop.trf.xlu0 }
 0x4b8   : > { %v7201_v19 = vunpack.i.l.bf16 %v8869_v5  ;;  %v10349_v29 = vunpack.i.h.bf16 %v8869_v5 }
 0x4ba   : > { %v3004_v49 = vrot.slane %v7201_v19, 4 }
 0x4bc   : > { %v8821_v59 = vpop.trf.xlu1 }
 0x4bd   : > { %v7216_v17 = vunpack.i.h.bf16 %v8821_v59  ;;  %v7213_v22 = vunpack.i.l.bf16 %v8821_v59  ;;  %v2780_v59 = vrot.slane %v7196_v57, 4 }
 0x4bf   : > { %v2554_v32 = vrot.slane %v7216_v17, 4  ;;  %v2542_v52 = vrot.slane %v7213_v22, 4  ;;  %v2557_v40 = vsel %vm1189_vm3, %v7216_v17, %v2556_v4  ;;  %v8899_v17 = vsel %vm1189_vm3, %v2009_v48, %v2016_v46 }
 0x4c0   : > { %v8889_v7 = vperm.slane %v2557_v40, %v8177_v50  ;;  %10417 = vst [vmem:[#allocation27_spill] sm:$0xff] %v8899_v17  ;;  %v8913_v48 = vrot.slane %v10349_v29, 4 }
 0x4c1   : > { %v2555_v51 = vsel %vm1189_vm3, %v2554_v32, %v7191_v15 }
 0x4c2   : > { %v8878_v47 = vperm.slane %v2555_v51, %v8177_v50  ;;  %10416 = vst [vmem:[#allocation26_spill] sm:$0xff] %v8889_v7 }
 0x4c4   : > { %v8860_v0 = vpop.trf.xlu1 }
 0x4c5   : > { %v7221_v30 = vunpack.i.h.bf16 %v8860_v0  ;;  %v7218_v33 = vunpack.i.l.bf16 %v8860_v0 }
 0x4c6   : > { %v8871_v6 = vpop.trf.xlu2 }
 0x4c7   : > { %v2778_v63 = vrot.slane %v7221_v30, 4  ;;  %v7260_v34 = vunpack.i.h.bf16 %v8871_v6  ;;  %v2766_v15 = vrot.slane %v7218_v33, 4  ;;  %v10350_v32 = vunpack.i.l.bf16 %v8871_v6 }
 0x4c8   : > { %v2781_v62 = vsel %vm1189_vm3, %v7221_v30, %v2780_v59 }
 0x4c9   : > { %v2543_v45 = vsel %vm1189_vm3, %v2542_v52, %v7260_v34  ;;  %v2544_v61 = vrot.slane %v7260_v34, 4  ;;  %v2779_v60 = vsel %vm1189_vm3, %v2778_v63, %v7196_v57  ;;  %v8922_v57 = vpop.trf.xlu0  ;;  %v8929_v46 = vrot.slane %v10350_v32, 4 }
 0x4ca   : > { %v2549_v53 = vperm.slane %v2543_v45, %v8177_v50  ;;  %v8909_v4 = vperm.slane %v2779_v60, %v8177_v50  ;;  %v8933_v59 = vperm.slane %v2781_v62, %v8177_v50  ;;  %v2804_v32 = vrot.slane %v8830_v36, 4 }
 0x4cb   : > { %v2545_v44 = vsel %vm1189_vm3, %v7213_v22, %v2544_v61 }
 0x4cc   : > { %v7222_v26 = vpop.trf.xlu1  ;;  %v2578_v38 = vrot.slane %v2549_v53, 4  ;;  %v8917_v22 = vperm.slane %v2545_v44, %v8177_v50  ;;  %v2581_v34 = vsel %vm1189_vm3, %v2549_v53, %v2580_v37 }
 0x4cd   : > { %v7226_v3 = vunpack.i.h.bf16 %v7222_v26  ;;  %v7223_v51 = vunpack.i.l.bf16 %v7222_v26  ;;  %v7206_v26 = vunpack.i.l.bf16 %v8922_v57  ;;  %v8940_v37 = vperm.slane %v2581_v34, %v10406_v2 }
 0x4ce   : > { %v8905_v8 = vpop.trf.xlu2  ;;  %10418 = vst [vmem:[#allocation28_spill] sm:$0xff] %v8917_v22  ;;  %v2593_v44 = vsel %vm1189_vm3, %v8917_v22, %v2592_v31 }
 0x4cf   : > { %v3002_v52 = vrot.slane %v7226_v3, 4  ;;  %v7265_v0 = vunpack.i.h.bf16 %v8905_v8  ;;  %v8920_v40 = vsel %vm1189_vm3, %v7226_v3, %v3004_v49  ;;  %v10353_v3 = vunpack.i.l.bf16 %v8905_v8 }
 0x4d1   : > { %v2767_v30 = vsel %vm1189_vm3, %v2766_v15, %v7265_v0  ;;  %v3003_v63 = vsel %vm1189_vm3, %v3002_v52, %v7201_v19  ;;  %v2768_v45 = vrot.slane %v7265_v0, 4  ;;  %v2579_v15 = vsel %vm1189_vm3, %v2578_v38, %v8813_v13 }
 0x4d2   : > { %v2773_v61 = vperm.slane %v2767_v30, %v8177_v50  ;;  %v2990_v19 = vrot.slane %v7223_v51, 4  ;;  %v8951_v13 = vperm.slane %v3003_v63, %v8177_v50  ;;  %v10352_v38 = vunpack.i.h.bf16 %v8922_v57 }
 0x4d3   : > { %v2769_v52 = vsel %vm1189_vm3, %v7218_v33, %v2768_v45  ;;  %v3228_v30 = vrot.slane %v7206_v26, 4  ;;  %v8959_v29 = vperm.slane %v2579_v15, %v10406_v2  ;;  %v8966_v60 = vrot.slane %v10353_v3, 4 }
 0x4d4   : > { %v2802_v49 = vrot.slane %v2773_v61, 4  ;;  %v7227_v53 = vpop.trf.xlu1  ;;  %v2616_v3 = vrot.slane %v8889_v7, 4  ;;  %v2805_v39 = vsel %vm1189_vm3, %v2773_v61, %v2804_v32 }
 0x4d5   : > { %v7231_v62 = vunpack.i.h.bf16 %v7227_v53  ;;  %v7228_v31 = vunpack.i.l.bf16 %v7227_v53  ;;  %10419 = vst [vmem:[#allocation29_spill] sm:$0xff] %v8959_v29 }
 0x4d6   : > { %v8948_v0 = vpop.trf.xlu2  ;;  %v2803_v56 = vsel %vm1189_vm3, %v2802_v49, %v8830_v36  ;;  %v8971_v49 = vrot.slane %v10352_v38, 4 }
 0x4d7   : > { %v3226_v34 = vrot.slane %v7231_v62, 4  ;;  %v7270_v25 = vunpack.i.h.bf16 %v8948_v0  ;;  %v3229_v27 = vsel %vm1189_vm3, %v7231_v62, %v3228_v30  ;;  %v10355_v43 = vunpack.i.l.bf16 %v8948_v0 }
 0x4d8   : > { %v8974_v15 = vperm.slane %v2803_v56, %v10406_v2  ;;  %v3214_v53 = vrot.slane %v7228_v31, 4  ;;  %v8985_v30 = vperm.slane %v3229_v27, %v8177_v50  ;;  %v8989_v56 = vperm.slane %v2593_v44, %v10406_v2 }
 0x4d9   : > { %v2991_v33 = vsel %vm1189_vm3, %v2990_v19, %v7270_v25  ;;  %v2992_v45 = vrot.slane %v7270_v25, 4  ;;  %v3227_v63 = vsel %vm1189_vm3, %v3226_v34, %v7206_v26  ;;  %v8977_v19 = vperm.slane %v2769_v52, %v8177_v50 }
 0x4da   : > { %v2632_v26 = vrot.slane %v8940_v37, 4  ;;  %v2628_v34 = vrot.slane %v8959_v29, 4  ;;  %10420 = vst [vmem:[#allocation30_spill] sm:$0xff] %v8989_v56  ;;  %v8992_v52 = vperm.slane %v2991_v33, %v8177_v50  ;;  %v9002_v38 = vperm.slane %v3227_v63, %v8177_v50 }
 0x4db   : > { %v2993_v25 = vsel %vm1189_vm3, %v7223_v51, %v2992_v45  ;;  %v8997_v45 = vrot.slane %v10355_v43, 4  ;;  %v2640_v42 = vrot.slane %v8989_v56, 4  ;;  %v10422_v27 = vrot.slane %v8818_v54, 4 }
 0x4dc   : > { %v8982_v62 = vpop.trf.xlu1  ;;  %10421 = vst [vmem:[#allocation31_spill] sm:$0xff] %v9002_v38  ;;  %v10424_v43 = vrot.slane %v8878_v47, 4 }
 0x4dd   : > { %v7238_v51 = vunpack.i.h.bf16 %v8982_v62  ;;  %v2817_v1 = vsel %vm1189_vm3, %v8977_v19, %v10422_v27  ;;  %v9031_v27 = vperm.slane %v2805_v39, %v10406_v2 }
 0x4de   : > { %v8999_v36 = vpop.trf.xlu2 }
 0x4df   : > { %v2568_v44 = vrot.slane %v7238_v51, 4  ;;  %v2567_v33 = vsel %vm1189_vm3, %v8886_v20, %v7238_v51  ;;  %v7275_v14 = vunpack.i.h.bf16 %v8999_v36  ;;  %v10423_v20 = vunpack.i.h.bf16 %v8802_v18 }
 0x4e0   : > { %v2573_v24 = vperm.slane %v2567_v33, %v8177_v50  ;;  %v10425_v18 = vunpack.i.l.bf16 %v8982_v62 }
 0x4e1   : > { %v3215_v17 = vsel %vm1189_vm3, %v3214_v53, %v7275_v14  ;;  %v3216_v63 = vrot.slane %v7275_v14, 4  ;;  %v2569_v51 = vsel %vm1189_vm3, %v10423_v20, %v2568_v44  ;;  %v9026_v14 = vperm.slane %v2993_v25, %v8177_v50 }
 0x4e2   : > { %v2602_v61 = vrot.slane %v2573_v24, 4  ;;  %v2605_v33 = vsel %vm1189_vm3, %v2573_v24, %v10424_v43  ;;  %v2666_v44 = vrot.slane %v10425_v18, 4  ;;  %v9036_v20 = vperm.slane %v3215_v17, %v8177_v50 }
 0x4e3   : > { %v3217_v53 = vsel %vm1189_vm3, %v7228_v31, %v3216_v63  ;;  %v2613_v10 = vperm.slane %v2605_v33, %v10406_v2  ;;  %v9043_v43 = vperm.slane %v2817_v1, %v10406_v2  ;;  %v9047_v25 = vperm.slane %v2569_v51, %v8177_v50 }
 0x4e4   : > { %10426 = vst [vmem:[#allocation32_spill] sm:$0xff] %v9036_v20  ;;  %v9038_v32 = vpop.trf.xlu1  ;;  %v2603_v24 = vsel %vm1189_vm3, %v2602_v61, %v8878_v47  ;;  %v9050_v39 = vperm.slane %v3217_v53, %v8177_v50  ;;  %v10428_v63 = vunpack.i.l.bf16 %v8999_v36 }
 0x4e5   : > { %v7243_v31 = vunpack.i.h.bf16 %v9038_v32  ;;  %10427 = vst [vmem:[#allocation33_spill] sm:$0xff] %v9047_v25  ;;  %v9059_v18 = vperm.slane %v2603_v24, %v10406_v2  ;;  %v2630_v47 = vrot.slane %v2613_v10, 4  ;;  %v2617_v61 = vsel %vm1189_vm3, %v9047_v25, %v2616_v3 }
 0x4e6   : > { %v9054_v17 = vrot.slane %v10428_v63, 4  ;;  %v9056_v33 = vpop.trf.xlu2  ;;  %v10430_v63 = vunpack.i.h.bf16 %v8824_v58 }
 0x4e7   : > { %10429 = vst [vmem:[#allocation34_spill] sm:$0xff] %v9059_v18  ;;  %v2792_v1 = vrot.slane %v7243_v31, 4  ;;  %v2791_v51 = vsel %vm1189_vm3, %v8895_v9, %v7243_v31  ;;  %v7282_v55 = vunpack.i.h.bf16 %v9056_v33  ;;  %v7279_v12 = vunpack.i.l.bf16 %v9056_v33 }
 0x4e8   : > { %v2797_v53 = vperm.slane %v2791_v51, %v8177_v50  ;;  %v2629_v24 = vsel %vm1189_vm3, %v9059_v18, %v2628_v34  ;;  %v2631_v23 = vsel %vm1189_vm3, %v2630_v47, %v8940_v37  ;;  %v10431_v33 = vunpack.i.l.bf16 %v9038_v32 }
 0x4e9   : > { %v2793_v11 = vsel %vm1189_vm3, %v10430_v63, %v2792_v1  ;;  %v2643_v9 = vsel %vm1189_vm3, %v8929_v46, %v7279_v12  ;;  %v2644_v31 = vrot.slane %v7279_v12, 4  ;;  %v7342_v51 = vpack.i.bf16 %v2631_v23, %v2629_v24 }
 0x4ea   : > { %v2826_v29 = vrot.slane %v2797_v53, 4  ;;  %v9080_v58 = vrot.slane %v10431_v33, 4  ;;  %v9083_v1 = vperm.slane %v2643_v9, %v8177_v50  ;;  %v2633_v34 = vsel %vm1189_vm3, %v2613_v10, %v2632_v26 }
 0x4eb   : > { %v10432_v37 = vrot.slane %v8909_v4, 4  ;;  %v2654_v3 = vrot.slane %v7282_v55, 4  ;;  %v10433_v63 = vunpack.i.l.bf16 %v8871_v6  ;;  %7343 = vxpose.xlu0.b32.start [1/2] (short) (narrow) %v7342_v51, 8  ;;  %v9097_v24 = vperm.slane %v2617_v61, %v10406_v2 }
 0x4ec   : > { %v9092_v23 = vpop.trf.xlu1  ;;  %v2827_v46 = vsel %vm1189_vm3, %v2826_v29, %v8909_v4  ;;  %v10436_v29 = vrot.slane %v8974_v15, 4 }
 0x4ed   : > { %v2829_v47 = vsel %vm1189_vm3, %v2797_v53, %v10432_v37  ;;  %v2645_v12 = vsel %vm1189_vm3, %v10433_v63, %v2644_v31  ;;  %10434 = vst [vmem:[#allocation35_spill] sm:$0xff] %v9097_v24  ;;  %v7248_v26 = vunpack.i.h.bf16 %v9092_v23  ;;  %v9104_v53 = vperm.slane %v2793_v11, %v8177_v50 }
 0x4ee   : > { %v9100_v10 = vperm.slane %v2645_v12, %v8177_v50  ;;  %v9107_v9 = vpop.trf.xlu2  ;;  %v2833_v31 = vperm.slane %v2827_v46, %v10406_v2  ;;  %v9111_v51 = vperm.slane %v2829_v47, %v10406_v2  ;;  %v2641_v37 = vsel %vm1189_vm3, %v9097_v24, %v2640_v42 }
 0x4ef   : > { %v3016_v4 = vrot.slane %v7248_v26, 4  ;;  %v3015_v61 = vsel %vm1189_vm3, %v8913_v48, %v7248_v26  ;;  %v7284_v47 = vunpack.i.l.bf16 %v9107_v9  ;;  %v10437_v48 = vunpack.i.h.bf16 %v8869_v5 }
 0x4f0   : > { %10435 = vst [vmem:[#allocation36_spill] sm:$0xff] %v9100_v10  ;;  %v9121_v63 = vperm.slane %v3015_v61, %v8177_v50  ;;  %v2853_v6 = vsel %vm1189_vm3, %v2833_v31, %v10436_v29  ;;  %v10438_v11 = vunpack.i.l.bf16 %v9092_v23  ;;  %v2854_v21 = vrot.slane %v9111_v51, 4 }
 0x4f1   : > { %v7300_v46 = vpop.trf.xlu0  ;;  %v3017_v26 = vsel %vm1189_vm3, %v10437_v48, %v3016_v4  ;;  %v2867_v61 = vsel %vm1189_vm3, %v8966_v60, %v7284_v47  ;;  %v2868_v12 = vrot.slane %v7284_v47, 4  ;;  %v7369_v35 = vpack.i.bf16 %v2853_v6, %v2633_v34 }
 0x4f2   : > { %v9133_v33 = vrot.slane %v10438_v11, 4  ;;  %v7304_v42 = vunpack.i.h.bf16 %v7300_v46  ;;  %v7301_v18 = vunpack.i.l.bf16 %v7300_v46  ;;  %v9138_v56 = vperm.slane %v2867_v61, %v8177_v50 }
 0x4f3   : > { %v10439_v4 = vunpack.i.l.bf16 %v8905_v8  ;;  %v9151_v46 = vperm.slane %v3017_v26, %v8177_v50  ;;  %v10440_v61 = vunpack.i.h.bf16 %v9107_v9  ;;  %v10441_v6 = vunpack.i.l.bf16 %v8982_v62  ;;  %7370 = vxpose.xlu2.b32.start [1/2] (short) (narrow) %v7369_v35, 8 }
 0x4f4   : > { %v2667_v7 = vsel %vm1189_vm3, %v2666_v44, %v7304_v42  ;;  %v2668_v29 = vrot.slane %v7304_v42, 4  ;;  %v9141_v5 = vpop.trf.xlu1  ;;  %v2655_v60 = vsel %vm1189_vm3, %v2654_v3, %v7301_v18  ;;  %v2656_v47 = vrot.slane %v7301_v18, 4 }
 0x4f5   : > { %v2869_v11 = vsel %vm1189_vm3, %v10439_v4, %v2868_v12  ;;  %v9147_v48 = vperm.slane %v2667_v7, %v8177_v50  ;;  %v2878_v44 = vrot.slane %v10440_v61, 4  ;;  %v9166_v3 = vperm.slane %v2655_v60, %v8177_v50 }
 0x4f6   : > { %v9156_v34 = vperm.slane %v2869_v11, %v8177_v50  ;;  %v2669_v8 = vsel %vm1189_vm3, %v10441_v6, %v2668_v29  ;;  %v9161_v12 = vpop.trf.xlu2  ;;  %v2657_v18 = vsel %vm1189_vm3, %v7282_v55, %v2656_v47  ;;  %v7253_v26 = vunpack.i.h.bf16 %v9141_v5 }
 0x4f7   : > { %v9171_v4 = vperm.slane %v2669_v8, %v8177_v50  ;;  %v10363_v35 = vunpack.i.l.bf16 %v9141_v5  ;;  %v9179_v60 = vperm.slane %v2657_v18, %v8177_v50  ;;  %v2850_v6 = vrot.slane %v2833_v31, 4 }
 0x4f8   : > { %v3240_v29 = vrot.slane %v7253_v26, 4  ;;  %v3239_v11 = vsel %vm1189_vm3, %v8971_v49, %v7253_v26  ;;  %v2690_v8 = vrot.slane %v9166_v3, 4  ;;  %v7292_v7 = vunpack.i.h.bf16 %v9161_v12 }
 0x4f9   : > { %10442 = vst [vmem:[#allocation37_spill] sm:$0xff] %v9171_v4  ;;  %v7305_v61 = vpop.trf.xlu0  ;;  %v9182_v47 = vperm.slane %v3239_v11, %v8177_v50  ;;  %v10444_v42 = vunpack.i.h.bf16 %v8922_v57  ;;  %v9193_v49 = vrot.slane %v10363_v35, 4  ;;  %v2851_v18 = vsel %vm1189_vm3, %v2850_v6, %v8974_v15 }
 0x4fa   : > { %v7289_v26 = vunpack.i.l.bf16 %v9161_v12  ;;  %v7360_v11 = vpack.i.bf16 %v2851_v18, %v2641_v37  ;;  %v7309_v31 = vunpack.i.h.bf16 %v7305_v61  ;;  %v7306_v25 = vunpack.i.l.bf16 %v7305_v61 }
 0x4fb   : > { %10443 = vst [vmem:[#allocation38_spill] sm:$0xff] %v9182_v47  ;;  %v9189_v62 = vsel %vm1189_vm3, %v10444_v42, %v3240_v29  ;;  %v10445_v12 = vunpack.i.l.bf16 %v8948_v0  ;;  %v10446_v55 = vunpack.i.l.bf16 %v9038_v32 }
 0x4fc   : > { %v3091_v24 = vsel %vm1189_vm3, %v8997_v45, %v7289_v26  ;;  %v3092_v57 = vrot.slane %v7289_v26, 4  ;;  %7361 = vxpose.xlu1.b32.start [1/2] (short) (narrow) %v7360_v11, 8  ;;  %v2891_v15 = vsel %vm1189_vm3, %v9080_v58, %v7309_v31  ;;  %v2892_v6 = vrot.slane %v7309_v31, 4 }
 0x4fd   : > { %v9204_v29 = vperm.slane %v3091_v24, %v8177_v50  ;;  %v9213_v45 = vperm.slane %v2891_v15, %v8177_v50  ;;  %v2879_v61 = vsel %vm1189_vm3, %v2878_v44, %v7306_v25  ;;  %v2880_v26 = vrot.slane %v7306_v25, 4 }
 0x4fe   : > { %v9201_v42 = vpop.trf.xlu2  ;;  %v3093_v18 = vsel %vm1189_vm3, %v10445_v12, %v3092_v57  ;;  %v3102_v11 = vrot.slane %v7292_v7, 4  ;;  %v2893_v58 = vsel %vm1189_vm3, %v10446_v55, %v2892_v6  ;;  %v9223_v31 = vperm.slane %v2879_v61, %v8177_v50 }
 0x4ff   : > { %v10364_v37 = vunpack.i.h.bf16 %v9201_v42  ;;  %v9217_v24 = vperm.slane %v3093_v18, %v8177_v50  ;;  %v9227_v15 = vperm.slane %v2893_v58, %v8177_v50  ;;  %v10447_v44 = vunpack.i.h.bf16 %v9107_v9 }
 0x500   : > { %v2691_v12 = vsel %vm1189_vm3, %v2690_v8, %v9083_v1  ;;  %v7294_v18 = vunpack.i.l.bf16 %v9201_v42  ;;  %v10449_v9 = vunpack.i.l.bf16 %v8999_v36 }
 0x501   : > { %v7310_v0 = vpop.trf.xlu0  ;;  %v2881_v25 = vsel %vm1189_vm3, %v10447_v44, %v2880_v26  ;;  %v3326_v6 = vrot.slane %v10364_v37, 4 }
 0x502   : > { %v9236_v55 = vperm.slane %v2881_v25, %v8177_v50  ;;  %v7314_v61 = vunpack.i.h.bf16 %v7310_v0  ;;  %v7311_v57 = vunpack.i.l.bf16 %v7310_v0  ;;  %v3315_v26 = vsel %vm1189_vm3, %v9054_v17, %v7294_v18 }
 0x503   : > { %v3316_v8 = vrot.slane %v7294_v18, 4  ;;  %v9248_v35 = vperm.slane %v3315_v26, %v8177_v50  ;;  %v10450_v18 = vunpack.i.l.bf16 %v9092_v23 }
 0x504   : > { %v3115_v44 = vsel %vm1189_vm3, %v9133_v33, %v7314_v61  ;;  %v3116_v25 = vrot.slane %v7314_v61, 4  ;;  %v3103_v58 = vsel %vm1189_vm3, %v3102_v11, %v7311_v57  ;;  %v3104_v22 = vrot.slane %v7311_v57, 4 }
 0x505   : > { %10448 = vst [vmem:[#allocation39_spill] sm:$0xff] %v9248_v35  ;;  %v9251_v37 = vperm.slane %v3115_v44, %v8177_v50  ;;  %v3317_v17 = vsel %vm1189_vm3, %v10449_v9, %v3316_v8  ;;  %v9266_v47 = vperm.slane %v3103_v58, %v8177_v50  ;;  %v10451_v57 = vrot.slane %v9083_v1, 4 }
 0x506   : > { %v7322_v32 = vpop.trf.xlu2  ;;  %v3117_v33 = vsel %vm1189_vm3, %v10450_v18, %v3116_v25  ;;  %v9262_v26 = vperm.slane %v3317_v17, %v8177_v50  ;;  %v3105_v23 = vsel %vm1189_vm3, %v7292_v7, %v3104_v22 }
 0x507   : > { %v7326_v61 = vunpack.i.h.bf16 %v7322_v32  ;;  %v2693_v36 = vsel %vm1189_vm3, %v9166_v3, %v10451_v57  ;;  %v9273_v9 = vperm.slane %v3117_v33, %v8177_v50  ;;  %v9278_v17 = vperm.slane %v3105_v23, %v8177_v50 }
 0x508   : > { %v7323_v18 = vunpack.i.l.bf16 %v7322_v32 }
 0x509   : > { %v7315_v11 = vpop.trf.xlu0  ;;  %v2680_v8 = vrot.slane %v7326_v61, 4 }
 0x50a   : > { %v7319_v58 = vunpack.i.h.bf16 %v7315_v11  ;;  %v7316_v44 = vunpack.i.l.bf16 %v7315_v11  ;;  %v2678_v57 = vrot.slane %v7323_v18, 4 }
 0x50b   : > { %v2681_v33 = vsel %vm1189_vm3, %v7323_v18, %v2680_v8  ;;  %v10454_v8 = vunpack.i.l.bf16 %v9141_v5 }
 0x50c   : > { %v3339_v22 = vsel %vm1189_vm3, %v9193_v49, %v7319_v58  ;;  %v3340_v7 = vrot.slane %v7319_v58, 4  ;;  %v3327_v25 = vsel %vm1189_vm3, %v3326_v6, %v7316_v44  ;;  %v2679_v32 = vsel %vm1189_vm3, %v2678_v57, %v7326_v61 }
 0x50d   : > { %v9289_v11 = vperm.slane %v3339_v22, %v8177_v50  ;;  %v3328_v0 = vrot.slane %v7316_v44, 4  ;;  %v9292_v1 = vperm.slane %v3327_v25, %v8177_v50  ;;  %v2685_v3 = vperm.slane %v2679_v32, %v8177_v50 }
 0x50e   : > { %v7327_v23 = vpop.trf.xlu2  ;;  %v3341_v18 = vsel %vm1189_vm3, %v10454_v8, %v3340_v7  ;;  %v9299_v58 = vperm.slane %v2691_v12, %v10406_v2  ;;  %v9302_v6 = vperm.slane %v2681_v33, %v8177_v50  ;;  %v10456_v25 = vunpack.i.h.bf16 %v9201_v42 }
 0x50f   : > { %10452 = vst [vmem:[#allocation40_spill] sm:$0xff] %v9289_v11  ;;  %v7331_v49 = vunpack.i.h.bf16 %v7327_v23  ;;  %v9305_v61 = vperm.slane %v3341_v18, %v8177_v50  ;;  %v2714_v22 = vrot.slane %v2685_v3, 4  ;;  %v7328_v32 = vunpack.i.l.bf16 %v7327_v23 }
 0x510   : > { %10453 = vst [vmem:[#allocation41_spill] sm:$0xff] %v9292_v1  ;;  %v3329_v57 = vsel %vm1189_vm3, %v10456_v25, %v3328_v0  ;;  %v2701_v12 = vperm.slane %v2693_v36, %v10406_v2  ;;  %v10457_v8 = vrot.slane %v9147_v48, 4  ;;  %v2740_v0 = vrot.slane %v9299_v58, 4 }
 0x511   : > { %10455 = vst [vmem:[#allocation42_spill] sm:$0xff] %v9299_v58  ;;  %v2904_v7 = vrot.slane %v7331_v49, 4  ;;  %v9317_v18 = vperm.slane %v3329_v57, %v8177_v50  ;;  %v2715_v44 = vsel %vm1189_vm3, %v2714_v22, %v9147_v48  ;;  %v2902_v25 = vrot.slane %v7328_v32, 4 }
 0x512   : > { %v2717_v33 = vsel %vm1189_vm3, %v2685_v3, %v10457_v8  ;;  %v9325_v23 = vperm.slane %v2715_v44, %v10406_v2  ;;  %v10459_v36 = vrot.slane %v9223_v31, 4  ;;  %v2744_v22 = vrot.slane %v2701_v12, 4 }
 0x513   : > { %v2725_v42 = vperm.slane %v2717_v33, %v10406_v2  ;;  %v2905_v5 = vsel %vm1189_vm3, %v7328_v32, %v2904_v7  ;;  %v10460_v33 = vrot.slane %v8933_v59, 4  ;;  %v2903_v7 = vsel %vm1189_vm3, %v2902_v25, %v7331_v49 }
 0x514   : > { %10458 = vst [vmem:[#allocation43_spill] sm:$0xff] %v9325_v23  ;;  %v2915_v3 = vsel %vm1189_vm3, %v10459_v36, %v9138_v56  ;;  %v9332_v57 = vperm.slane %v2905_v5, %v8177_v50  ;;  %v9340_v32 = vperm.slane %v2903_v7, %v8177_v50  ;;  %v2741_v36 = vsel %vm1189_vm3, %v9325_v23, %v2740_v0 }
 0x515   : > { %v2742_v48 = vrot.slane %v2725_v42, 4  ;;  %v2841_v58 = vsel %vm1189_vm3, %v9104_v53, %v10460_v33  ;;  %v2921_v5 = vperm.slane %v2915_v3, %v10406_v2  ;;  %v2745_v20 = vsel %vm1189_vm3, %v2725_v42, %v2744_v22 }
 0x516   : > { %v7332_v8 = vpop.trf.xlu2  ;;  %v2938_v33 = vrot.slane %v9340_v32, 4  ;;  %v2849_v7 = vperm.slane %v2841_v58, %v10406_v2  ;;  %v2864_v0 = vrot.slane %v9043_v43, 4  ;;  %v10461_v3 = vrot.slane %v9100_v10, 4 }
 0x517   : > { %v7336_v44 = vunpack.i.h.bf16 %v7332_v8  ;;  %v7333_v11 = vunpack.i.l.bf16 %v7332_v8  ;;  %v2743_v38 = vsel %vm1189_vm3, %v2742_v48, %v2701_v12  ;;  %v2964_v58 = vrot.slane %v2921_v5, 4 }
 0x518   : > { %v7344_v25 = vpack.i.bf16 %v2743_v38, %v2741_v36  ;;  %v2705_v1 = vsel %vm1189_vm3, %v9179_v60, %v10461_v3  ;;  %v2939_v38 = vsel %vm1189_vm3, %v2938_v33, %v9213_v45  ;;  %v2855_v48 = vsel %vm1189_vm3, %v2854_v21, %v9031_v27 }
 0x519   : > { %v3128_v35 = vrot.slane %v7336_v44, 4  ;;  %v3126_v49 = vrot.slane %v7333_v11, 4  ;;  %v2865_v22 = vsel %vm1189_vm3, %v2849_v7, %v2864_v0  ;;  %v2728_v33 = vrot.slane %v9171_v4, 4 }
 0x51a   : > { %7345 = vxpose.xlu0.b32.end [2/2] (short) (narrow) %v7344_v25, 8  ;;  %v7351_v25 = vpack.i.bf16 %v2865_v22, %v2855_v48  ;;  %v2814_v36 = vrot.slane %v8977_v19, 4  ;;  %v2838_v4 = vrot.slane %v9104_v53, 4 }
 0x51b   : > { %v3129_v8 = vsel %vm1189_vm3, %v7333_v11, %v3128_v35  ;;  %v3127_v12 = vsel %vm1189_vm3, %v3126_v49, %v7336_v44  ;;  %v9364_v35 = vperm.slane %v2705_v1, %v10406_v2  ;;  %v2945_v11 = vperm.slane %v2939_v38, %v10406_v2 }
 0x51c   : > { %v9359_v42 = vperm.slane %v3129_v8, %v8177_v50  ;;  %v9371_v44 = vperm.slane %v3127_v12, %v8177_v50  ;;  %v2729_v21 = vsel %vm1189_vm3, %v9302_v6, %v2728_v33 }
 0x51d   : > { %10462 = vst [vmem:[#allocation44_spill] sm:$0xff] %v9364_v35  ;;  %v2752_v1 = vrot.slane %v9364_v35, 4  ;;  %v2965_v38 = vsel %vm1189_vm3, %v2945_v11, %v2964_v58  ;;  %v2962_v23 = vrot.slane %v2945_v11, 4  ;;  %v9380_v12 = vperm.slane %v2729_v21, %v10406_v2 }
 0x51e   : > { %v7337_v49 = vpop.trf.xlu2  ;;  %v7371_v10 = vpack.i.bf16 %v2965_v38, %v2745_v20  ;;  %v2862_v35 = vrot.slane %v2849_v7, 4  ;;  %v2815_v20 = vsel %vm1189_vm3, %v2814_v36, %v8818_v54  ;;  %v10463_v11 = vrot.slane %v9138_v56, 4 }
 0x51f   : > { %v7341_v8 = vunpack.i.h.bf16 %v7337_v49  ;;  %v7338_v3 = vunpack.i.l.bf16 %v7337_v49  ;;  %v2963_v22 = vsel %vm1189_vm3, %v2962_v23, %v2921_v5  ;;  %v2753_v58 = vsel %vm1189_vm3, %v9380_v12, %v2752_v1 }
 0x520   : > { %7372 = vxpose.xlu2.b32.end [2/2] (short) (narrow) %v7371_v10, 8  ;;  %v2917_v19 = vsel %vm1189_vm3, %v9223_v31, %v10463_v11  ;;  %v3162_v33 = vrot.slane %v9371_v44, 4  ;;  %v7362_v53 = vpack.i.bf16 %v2963_v22, %v2753_v58  ;;  %v9397_v5 = vperm.slane %v2815_v20, %v10406_v2 }
 0x521   : > { %v3352_v0 = vrot.slane %v7341_v8, 4  ;;  %v3350_v48 = vrot.slane %v7338_v3, 4  ;;  %v2839_v54 = vsel %vm1189_vm3, %v2838_v4, %v8933_v59  ;;  %v2863_v56 = vsel %vm1189_vm3, %v2862_v35, %v9043_v43 }
 0x522   : > { %7352 = vxpose.xlu0.b32.start [1/2] (short) (narrow) %v7351_v25, 8  ;;  %7363 = vxpose.xlu1.b32.end [2/2] (short) (narrow) %v7362_v53, 8  ;;  %v9410_v31 = vperm.slane %v2839_v54, %v10406_v2  ;;  %v2860_v36 = vrot.slane %v9397_v5, 4  ;;  %v9414_v25 = vperm.slane %v2917_v19, %v10406_v2  ;;  %v10465_v43 = vrot.slane %v9213_v45, 4 }
 0x523   : > { %v3353_v49 = vsel %vm1189_vm3, %v7338_v3, %v3352_v0  ;;  %v3351_v23 = vsel %vm1189_vm3, %v3350_v48, %v7341_v8  ;;  %v10464_v8 = vrot.slane %v9156_v34, 4  ;;  %v2952_v35 = vrot.slane %v9227_v15, 4 }
 0x524   : > { %v9400_v10 = vperm.slane %v3351_v23, %v8177_v50  ;;  %v9403_v7 = vperm.slane %v3353_v49, %v8177_v50  ;;  %v2941_v4 = vsel %vm1189_vm3, %v9340_v32, %v10465_v43  ;;  %v2861_v38 = vsel %vm1189_vm3, %v9410_v31, %v2860_v36 }
 0x525   : > { %v2929_v1 = vsel %vm1189_vm3, %v9236_v55, %v10464_v8  ;;  %v9430_v21 = vperm.slane %v2941_v4, %v10406_v2  ;;  %v9434_v0 = vperm.slane %v8920_v40, %v8177_v50  ;;  %v3026_v48 = vrot.slane %v8992_v52, 4 }
 0x526   : > { %v3386_v3 = vrot.slane %v9400_v10, 4  ;;  %v2937_v59 = vperm.slane %v2929_v1, %v10406_v2  ;;  %v7378_v22 = vpack.i.bf16 %v2863_v56, %v2861_v38  ;;  %v2953_v45 = vsel %vm1189_vm3, %v9332_v57, %v2952_v35 }
 0x527   : > { %v3038_v32 = vrot.slane %v9026_v14, 4  ;;  %v2961_v58 = vperm.slane %v2953_v45, %v10406_v2  ;;  %v2966_v20 = vrot.slane %v9430_v21, 4  ;;  %v3027_v11 = vsel %vm1189_vm3, %v3026_v48, %v8845_v28 }
 0x528   : > { %v2976_v49 = vrot.slane %v2937_v59, 4  ;;  %v10466_v40 = vrot.slane %v9121_v63, 4  ;;  %7379 = vxpose.xlu2.b32.start [1/2] (short) (narrow) %v7378_v22, 8  ;;  %v3033_v23 = vperm.slane %v3027_v11, %v10406_v2  ;;  %v3062_v56 = vrot.slane %v9151_v46, 4 }
 0x529   : > { %v3039_v53 = vsel %vm1189_vm3, %v3038_v32, %v8835_v41  ;;  %v2967_v36 = vsel %vm1189_vm3, %v2966_v20, %v9414_v25  ;;  %v10467_v43 = vrot.slane %v9236_v55, 4  ;;  %v10468_v32 = vrot.slane %v9332_v57, 4 }
 0x52a   : > { %v3051_v19 = vsel %vm1189_vm3, %v10466_v40, %v8951_v13  ;;  %v2977_v8 = vsel %vm1189_vm3, %v2961_v58, %v2976_v49  ;;  %v9457_v1 = vperm.slane %v3039_v53, %v10406_v2  ;;  %v3063_v38 = vsel %vm1189_vm3, %v3062_v56, %v9434_v0 }
 0x52b   : > { %v3057_v54 = vperm.slane %v3051_v19, %v10406_v2  ;;  %v2927_v4 = vsel %vm1189_vm3, %v10467_v43, %v9156_v34  ;;  %v7353_v35 = vpack.i.bf16 %v2977_v8, %v2967_v36  ;;  %v9469_v45 = vperm.slane %v3063_v38, %v10406_v2 }
 0x52c   : > { %v9466_v22 = vperm.slane %v2927_v4, %v10406_v2  ;;  %v3084_v49 = vrot.slane %v9457_v1, 4  ;;  %v2951_v55 = vsel %vm1189_vm3, %v10468_v32, %v9227_v15  ;;  %v2974_v20 = vrot.slane %v2961_v58, 4 }
 0x52d   : > { %v3074_v48 = vrot.slane %v3057_v54, 4  ;;  %7354 = vxpose.xlu0.b32.end [2/2] (short) (narrow) %v7353_v35, 8  ;;  %v9478_v11 = vperm.slane %v2951_v55, %v10406_v2  ;;  %v2856_v19 = vrot.slane %v9031_v27, 4  ;;  %v9487_v57 = vperm.slane %v9189_v62, %v8177_v50 }
 0x52e   : > { %v2972_v40 = vrot.slane %v9466_v22, 4  ;;  %v3085_v53 = vsel %vm1189_vm3, %v9469_v45, %v3084_v49  ;;  %v2975_v56 = vsel %vm1189_vm3, %v2974_v20, %v2937_v59  ;;  %v10469_v15 = vrot.slane %v8855_v16, 4 }
 0x52f   : > { %v3075_v34 = vsel %vm1189_vm3, %v3074_v48, %v3033_v23  ;;  %v2857_v27 = vsel %vm1189_vm3, %v9111_v51, %v2856_v19  ;;  %v3288_v4 = vrot.slane %v8985_v30, 4  ;;  %v10470_v62 = vrot.slane %v9266_v47, 4 }
 0x530   : > { %v3265_v58 = vsel %vm1189_vm3, %v9050_v39, %v10469_v15  ;;  %v7396_v36 = vpack.i.bf16 %v3085_v53, %v3075_v34  ;;  %v2973_v8 = vsel %vm1189_vm3, %v9478_v11, %v2972_v40  ;;  %v10471_v38 = vrot.slane %v9278_v17, 4 }
 0x531   : > { %v9498_v43 = vperm.slane %v3265_v58, %v10406_v2  ;;  %v7380_v59 = vpack.i.bf16 %v2975_v56, %v2973_v8  ;;  %v3139_v35 = vsel %vm1189_vm3, %v10470_v62, %v9204_v29  ;;  %v3163_v55 = vsel %vm1189_vm3, %v3162_v33, %v9251_v37 }
 0x532   : > { %v3151_v48 = vsel %vm1189_vm3, %v10471_v38, %v9217_v24  ;;  %7397 = vxpose.xlu1.b32.start [1/2] (short) (narrow) %v7396_v36, 8  ;;  %v3145_v51 = vperm.slane %v3139_v35, %v10406_v2  ;;  %v3289_v20 = vsel %vm1189_vm3, %v9487_v57, %v3288_v4  ;;  %v3169_v34 = vperm.slane %v3163_v55, %v10406_v2 }
 0x533   : > { %v3312_v49 = vrot.slane %v9498_v43, 4  ;;  %v9512_v32 = vperm.slane %v3151_v48, %v10406_v2  ;;  %7381 = vxpose.xlu2.b32.end [2/2] (short) (narrow) %v7380_v59, 8  ;;  %v10472_v40 = vrot.slane %v9359_v42, 4  ;;  %v3028_v53 = vrot.slane %v8845_v28, 4 }
 0x534   : > { %v9527_v56 = vperm.slane %v3289_v20, %v10406_v2  ;;  %v10473_v58 = vrot.slane %v8951_v13, 4  ;;  %v3186_v8 = vrot.slane %v3169_v34, 4  ;;  %v3076_v28 = vrot.slane %v3033_v23, 4 }
 0x535   : > { %v3175_v19 = vsel %vm1189_vm3, %v10472_v40, %v9273_v9  ;;  %v3196_v33 = vrot.slane %v9512_v32, 4  ;;  %v3029_v59 = vsel %vm1189_vm3, %v8992_v52, %v3028_v53  ;;  %v2968_v13 = vrot.slane %v9414_v25, 4 }
 0x536   : > { %v9530_v15 = vperm.slane %v3175_v19, %v10406_v2  ;;  %v3053_v36 = vsel %vm1189_vm3, %v9121_v63, %v10473_v58  ;;  %v3313_v62 = vsel %vm1189_vm3, %v9527_v56, %v3312_v49  ;;  %v3037_v38 = vperm.slane %v3029_v59, %v10406_v2  ;;  %v10477_v58 = vld [vmem:[#allocation32_spill] sm:$0xff] }
 0x537   : > { %v3061_v4 = vperm.slane %v3053_v36, %v10406_v2  ;;  %v7414_v48 = vpack.i.bf16 %v2857_v27, %v3313_v62  ;;  %v3187_v63 = vsel %vm1189_vm3, %v3186_v8, %v3145_v51  ;;  %v3077_v55 = vsel %vm1189_vm3, %v3057_v54, %v3076_v28  ;;  %v10475_v54 = vld [vmem:[#allocation23_spill] sm:$0xff] }
 0x538   : > { %v3197_v35 = vsel %vm1189_vm3, %v9530_v15, %v3196_v33  ;;  %v2969_v23 = vsel %vm1189_vm3, %v9430_v21, %v2968_v13  ;;  %v10474_v40 = vrot.slane %v9262_v26, 4  ;;  %v3400_v19 = vrot.slane %v9305_v61, 4  ;;  %v10478_v28 = vld [vmem:[#allocation31_spill] sm:$0xff] }
 0x539   : > { %v3078_v20 = vrot.slane %v3061_v4, 4  ;;  %v7398_v52 = vpack.i.bf16 %v3197_v35, %v3187_v63  ;;  %7415 = vxpose.xlu0.b32.start [1/2] (short) (narrow) %v7414_v48, 8  ;;  %v3080_v53 = vrot.slane %v3037_v38, 4  ;;  %v10476_v33 = vrot.slane %v10475_v54, 4 }
 0x53a   : > { %v3377_v49 = vsel %vm1189_vm3, %v9317_v18, %v10474_v40  ;;  %v3401_v8 = vsel %vm1189_vm3, %v9403_v7, %v3400_v19  ;;  %v3276_v62 = vrot.slane %v10478_v28, 4  ;;  %v10479_v48 = vrot.slane %v9204_v29, 4 }
 0x53b   : > { %v3079_v25 = vsel %vm1189_vm3, %v3078_v20, %v3037_v38  ;;  %v9557_v27 = vperm.slane %v3377_v49, %v10406_v2  ;;  %v3253_v36 = vsel %vm1189_vm3, %v10477_v58, %v10476_v33  ;;  %7399 = vxpose.xlu1.b32.end [2/2] (short) (narrow) %v7398_v52, 8  ;;  %v9568_v35 = vperm.slane %v3401_v8, %v10406_v2 }
 0x53c   : > { %v7387_v21 = vpack.i.bf16 %v3079_v25, %v3077_v55  ;;  %v3261_v59 = vperm.slane %v3253_v36, %v10406_v2  ;;  %v3081_v38 = vsel %vm1189_vm3, %v3061_v4, %v3080_v53  ;;  %v3141_v63 = vsel %vm1189_vm3, %v9266_v47, %v10479_v48  ;;  %v10480_v55 = vld [vmem:[#allocation38_spill] sm:$0xff] }
 0x53d   : > { %v3424_v13 = vrot.slane %v9557_v27, 4  ;;  %v3277_v20 = vsel %vm1189_vm3, %v10480_v55, %v3276_v62  ;;  %v3149_v40 = vperm.slane %v3141_v63, %v10406_v2  ;;  %v10481_v49 = vrot.slane %v9251_v37, 4 }
 0x53e   : > { %7388 = vxpose.xlu2.b32.start [1/2] (short) (narrow) %v7387_v21, 8  ;;  %v3304_v52 = vrot.slane %v3261_v59, 4  ;;  %v3285_v29 = vperm.slane %v3277_v20, %v10406_v2  ;;  %v3188_v47 = vrot.slane %v3145_v51, 4  ;;  %v10482_v33 = vrot.slane %v8835_v41, 4  ;;  %v10484_v20 = vld [vmem:[#allocation39_spill] sm:$0xff] }
 0x53f   : > { %v3165_v19 = vsel %vm1189_vm3, %v9371_v44, %v10481_v49  ;;  %v3425_v4 = vsel %vm1189_vm3, %v9568_v35, %v3424_v13  ;;  %v3064_v21 = vrot.slane %v9434_v0, 4  ;;  %v3250_v37 = vrot.slane %v10477_v58, 4 }
 0x540   : > { %v3173_v25 = vperm.slane %v3165_v19, %v10406_v2  ;;  %v7416_v53 = vpack.i.bf16 %v2969_v23, %v3425_v4  ;;  %v3041_v36 = vsel %vm1189_vm3, %v9026_v14, %v10482_v33  ;;  %v3305_v44 = vsel %vm1189_vm3, %v3285_v29, %v3304_v52  ;;  %v10487_v4 = vld [vmem:[#allocation40_spill] sm:$0xff] }
 0x541   : > { %v3189_v8 = vsel %vm1189_vm3, %v3169_v34, %v3188_v47  ;;  %v9596_v13 = vperm.slane %v3041_v36, %v10406_v2  ;;  %v7405_v48 = vpack.i.bf16 %v3081_v38, %v3305_v44  ;;  %v3065_v51 = vsel %vm1189_vm3, %v9151_v46, %v3064_v21 }
 0x542   : > { %v3190_v62 = vrot.slane %v3173_v25, 4  ;;  %v3251_v41 = vsel %vm1189_vm3, %v3250_v37, %v10475_v54  ;;  %v10483_v14 = vrot.slane %v10480_v55, 4  ;;  %7417 = vxpose.xlu0.b32.end [2/2] (short) (narrow) %v7416_v53, 8  ;;  %v9608_v34 = vperm.slane %v3065_v51, %v10406_v2  ;;  %v10486_v55 = vld [vmem:[#allocation41_spill] sm:$0xff] }
 0x543   : > { %v3088_v58 = vrot.slane %v9596_v13, 4  ;;  %v3257_v38 = vperm.slane %v3251_v41, %v10406_v2  ;;  %7406 = vxpose.xlu1.b32.start [1/2] (short) (narrow) %v7405_v48, 8  ;;  %v3192_v54 = vrot.slane %v3149_v40, 4  ;;  %v10485_v52 = vrot.slane %v10484_v20, 4 }
 0x544   : > { %v3275_v0 = vsel %vm1189_vm3, %v10483_v14, %v10478_v28  ;;  %v3191_v23 = vsel %vm1189_vm3, %v3190_v62, %v3149_v40  ;;  %v10488_v47 = vrot.slane %v10487_v4, 4  ;;  %v3302_v37 = vrot.slane %v3285_v29, 4 }
 0x545   : > { %v7389_v46 = vpack.i.bf16 %v3191_v23, %v3189_v8  ;;  %v3281_v63 = vperm.slane %v3275_v0, %v10406_v2  ;;  %v3365_v28 = vsel %vm1189_vm3, %v10486_v55, %v10485_v52  ;;  %v3089_v49 = vsel %vm1189_vm3, %v9608_v34, %v3088_v58  ;;  %v10492_v52 = vld [vmem:[#allocation33_spill] sm:$0xff] }
 0x546   : > { %v3373_v19 = vperm.slane %v3365_v28, %v10406_v2  ;;  %v3389_v53 = vsel %vm1189_vm3, %v9400_v10, %v10488_v47  ;;  %v3300_v33 = vrot.slane %v3257_v38, 4  ;;  %v3193_v40 = vsel %vm1189_vm3, %v3173_v25, %v3192_v54  ;;  %v10491_v54 = vld [vmem:[#allocation28_spill] sm:$0xff]  ;;  %v10495_v10 = vld [vmem:[#allocation26_spill] sm:$0xff] }
 0x547   : > { %7390 = vxpose.xlu2.b32.end [2/2] (short) (narrow) %v7389_v46, 8  ;;  %v3298_v36 = vrot.slane %v3281_v63, 4  ;;  %v3397_v21 = vperm.slane %v3389_v53, %v10406_v2  ;;  %v10489_v62 = vrot.slane %v9217_v24, 4  ;;  %v3176_v51 = vrot.slane %v9273_v9, 4 }
 0x548   : > { %v3416_v44 = vrot.slane %v3373_v19, 4  ;;  %v3301_v8 = vsel %vm1189_vm3, %v3281_v63, %v3300_v33  ;;  %v3303_v14 = vsel %vm1189_vm3, %v3302_v37, %v3261_v59  ;;  %v10490_v29 = vrot.slane %v10486_v55, 4  ;;  %v10494_v33 = vld [vmem:[#allocation21_spill] sm:$0xff] }
 0x549   : > { %v3153_v48 = vsel %vm1189_vm3, %v9278_v17, %v10489_v62  ;;  %v3299_v41 = vsel %vm1189_vm3, %v3298_v36, %v3257_v38  ;;  %v7450_v58 = vpack.i.bf16 %v3303_v14, %v3301_v8  ;;  %v3177_v17 = vsel %vm1189_vm3, %v9359_v42, %v3176_v51 }
 0x54a   : > { %v9635_v0 = vperm.slane %v3153_v48, %v10406_v2  ;;  %v3363_v25 = vsel %vm1189_vm3, %v10490_v29, %v10484_v20  ;;  %v7423_v23 = vpack.i.bf16 %v3299_v41, %v3089_v49  ;;  %v3417_v24 = vsel %vm1189_vm3, %v3397_v21, %v3416_v44  ;;  %v10493_v49 = vld [vmem:[#allocation35_spill] sm:$0xff]  ;;  %v10496_v48 = vld [vmem:[#allocation36_spill] sm:$0xff]  ;;  %v10497_v29 = vld [vmem:[#allocation30_spill] sm:$0xff] }
 0x54b   : > { %v7407_v9 = vpack.i.bf16 %v3193_v40, %v3417_v24  ;;  %v9645_v38 = vperm.slane %v3177_v17, %v10406_v2  ;;  %v3369_v59 = vperm.slane %v3363_v25, %v10406_v2  ;;  %v2702_v46 = vrot.slane %v9179_v60, 4  ;;  %v10498_v17 = vld [vmem:[#allocation37_spill] sm:$0xff] }
 0x54c   : > { %7424 = vxpose.xlu0.b32.start [1/2] (short) (narrow) %v7423_v23, 8  ;;  %v3387_v63 = vsel %vm1189_vm3, %v3386_v3, %v10487_v4  ;;  %v2590_v20 = vrot.slane %v10491_v54, 4  ;;  %v2614_v55 = vrot.slane %v10492_v52, 4  ;;  %v3200_v42 = vrot.slane %v9635_v0, 4 }
 0x54d   : > { %7408 = vxpose.xlu1.b32.end [2/2] (short) (narrow) %v7407_v9, 8  ;;  %v3393_v28 = vperm.slane %v3387_v63, %v10406_v2  ;;  %v2638_v47 = vrot.slane %v10493_v49, 4  ;;  %v3414_v53 = vrot.slane %v3397_v21, 4  ;;  %v2726_v60 = vrot.slane %v9302_v6, 4  ;;  %v10499_v63 = vld [vmem:[#allocation34_spill] sm:$0xff] }
 0x54e   : > { %v2591_v36 = vsel %vm1189_vm3, %v2590_v20, %v10494_v33  ;;  %v2615_v3 = vsel %vm1189_vm3, %v2614_v55, %v10495_v10  ;;  %v3412_v4 = vrot.slane %v3369_v59, 4  ;;  %v3201_v40 = vsel %vm1189_vm3, %v9645_v38, %v3200_v42 }
 0x54f   : > { %7451 = vxpose.xlu2.b32.start [1/2] (short) (narrow) %v7450_v58, 8  ;;  %v3410_v37 = vrot.slane %v3393_v28, 4  ;;  %v9666_v44 = vperm.slane %v2591_v36, %v10406_v2  ;;  %v9669_v8 = vperm.slane %v2615_v3, %v10406_v2  ;;  %v3415_v21 = vsel %vm1189_vm3, %v3414_v53, %v3373_v19  ;;  %v10502_v36 = vld [vmem:[#allocation42_spill] sm:$0xff] }
 0x550   : > { %v3413_v6 = vsel %vm1189_vm3, %v3393_v28, %v3412_v4  ;;  %v3082_v62 = vrot.slane %v9469_v45, 4  ;;  %v2703_v51 = vsel %vm1189_vm3, %v2702_v46, %v10496_v48  ;;  %v2639_v25 = vsel %vm1189_vm3, %v2638_v47, %v10497_v29  ;;  %v10501_v47 = vld [vmem:[#allocation44_spill] sm:$0xff] }
 0x551   : > { %v3411_v41 = vsel %vm1189_vm3, %v3410_v37, %v3369_v59  ;;  %v2636_v14 = vrot.slane %v9666_v44, 4  ;;  %v2709_v23 = vperm.slane %v2703_v51, %v10406_v2  ;;  %v2727_v19 = vsel %vm1189_vm3, %v2726_v60, %v10498_v17 }
 0x552   : > { %v7425_v24 = vpack.i.bf16 %v3411_v41, %v3201_v40  ;;  %v3083_v58 = vsel %vm1189_vm3, %v3082_v62, %v9457_v1  ;;  %v2750_v45 = vrot.slane %v9380_v12, 4  ;;  %v3398_v9 = vrot.slane %v9403_v7, 4  ;;  %v10500_v12 = vld [vmem:[#allocation43_spill] sm:$0xff] }
 0x553   : > { %v2637_v59 = vsel %vm1189_vm3, %v9669_v8, %v2636_v14  ;;  %v7452_v46 = vpack.i.bf16 %v3415_v21, %v3413_v6  ;;  %v2626_v54 = vrot.slane %v10499_v63, 4  ;;  %v2733_v52 = vperm.slane %v2727_v19, %v10406_v2 }
 0x554   : > { %7426 = vxpose.xlu0.b32.end [2/2] (short) (narrow) %v7425_v24, 8  ;;  %v7441_v20 = vpack.i.bf16 %v2639_v25, %v2637_v59  ;;  %v3086_v55 = vrot.slane %v9608_v34, 4  ;;  %v3262_v1 = vrot.slane %v9050_v39, 4  ;;  %v2748_v42 = vrot.slane %v2709_v23, 4 }
 0x555   : > { %v3286_v28 = vrot.slane %v9487_v57, 4  ;;  %v2738_v49 = vrot.slane %v10500_v12, 4  ;;  %v3194_v7 = vrot.slane %v9530_v15, 4  ;;  %v2751_v53 = vsel %vm1189_vm3, %v2750_v45, %v10501_v47 }
 0x556   : > { %7442 = vxpose.xlu1.b32.start [1/2] (short) (narrow) %v7441_v20, 8  ;;  %v3087_v60 = vsel %vm1189_vm3, %v3086_v55, %v9596_v13  ;;  %v3263_v33 = vsel %vm1189_vm3, %v3262_v1, %v8855_v16  ;;  %v3310_v34 = vrot.slane %v9527_v56, 4  ;;  %v2749_v3 = vsel %vm1189_vm3, %v2733_v52, %v2748_v42  ;;  %v10503_v56 = vld [vmem:[#allocation29_spill] sm:$0xff] }
 0x557   : > { %7453 = vxpose.xlu2.b32.end [2/2] (short) (narrow) %v7452_v46, 8  ;;  %v3269_v39 = vperm.slane %v3263_v33, %v10406_v2  ;;  %v3287_v57 = vsel %vm1189_vm3, %v3286_v28, %v8985_v30  ;;  %v2739_v15 = vsel %vm1189_vm3, %v2738_v49, %v10502_v36  ;;  %v3195_v10 = vsel %vm1189_vm3, %v3194_v7, %v9512_v32 }
 0x558   : > { %v3293_v13 = vperm.slane %v3287_v57, %v10406_v2  ;;  %v7434_v4 = vpack.i.bf16 %v2739_v15, %v3195_v10  ;;  %v3311_v16 = vsel %vm1189_vm3, %v3310_v34, %v9498_v43  ;;  %v2627_v40 = vsel %vm1189_vm3, %v2626_v54, %v10503_v56 }
 0x559   : > { %v3308_v37 = vrot.slane %v3269_v39, 4  ;;  %v3374_v30 = vrot.slane %v9317_v18, 4  ;;  %v3399_v6 = vsel %vm1189_vm3, %v3398_v9, %v9305_v61  ;;  %v7432_v21 = vpack.i.bf16 %v2627_v40, %v3083_v58 }
 0x55a   : > { %v3306_v62 = vrot.slane %v3293_v13, 4  ;;  %v3198_v32 = vrot.slane %v9645_v38, 4  ;;  %v3405_v48 = vperm.slane %v3399_v6, %v10406_v2  ;;  %v7443_v51 = vpack.i.bf16 %v2751_v53, %v2749_v3 }
 0x55b   : > { %v3309_v41 = vsel %vm1189_vm3, %v3293_v13, %v3308_v37  ;;  %v3375_v43 = vsel %vm1189_vm3, %v3374_v30, %v9262_v26  ;;  %v2858_v14 = vrot.slane %v9410_v31, 4  ;;  %v2746_v58 = vrot.slane %v2733_v52, 4 }
 0x55c   : > { %7433 = vxpose.xlu0.b32.start [1/2] (short) (narrow) %v7432_v21, 8  ;;  %v3307_v18 = vsel %vm1189_vm3, %v3306_v62, %v3269_v39  ;;  %v7459_v29 = vpack.i.bf16 %v3311_v16, %v3309_v41  ;;  %v3381_v61 = vperm.slane %v3375_v43, %v10406_v2  ;;  %v3418_v25 = vrot.slane %v3405_v48, 4 }
 0x55d   : > { %v7468_v24 = vpack.i.bf16 %v3307_v18, %v3087_v60  ;;  %v2859_v38 = vsel %vm1189_vm3, %v2858_v14, %v9397_v5  ;;  %v3199_v17 = vsel %vm1189_vm3, %v3198_v32, %v9635_v0  ;;  %v2970_v31 = vrot.slane %v9478_v11, 4 }
 0x55e   : > { %7444 = vxpose.xlu1.b32.end [2/2] (short) (narrow) %v7443_v51, 8  ;;  %v3419_v26 = vsel %vm1189_vm3, %v3418_v25, %v3381_v61  ;;  %v2747_v45 = vsel %vm1189_vm3, %v2746_v58, %v2709_v23  ;;  %v3422_v5 = vrot.slane %v9568_v35, 4  ;;  %v3420_v46 = vrot.slane %v3381_v61, 4 }
 0x55f   : > { %7469 = vxpose.xlu2.b32.start [1/2] (short) (narrow) %v7468_v24, 8  ;;  %v7470_v19 = vpack.i.bf16 %v3419_v26, %v3199_v17  ;;  %v2971_v9 = vsel %vm1189_vm3, %v2970_v31, %v9466_v22  ;;  %v2634_v0 = vrot.slane %v9669_v8, 4 }
 0x560   : > { %v7479_v59 = vpack.i.bf16 %v2747_v45, %v2971_v9  ;;  %v3421_v63 = vsel %vm1189_vm3, %v3405_v48, %v3420_v46  ;;  %v3423_v11 = vsel %vm1189_vm3, %v3422_v5, %v9557_v27 }
 0x561   : > { %v7461_v54 = vpack.i.bf16 %v3423_v11, %v3421_v63  ;;  %v2635_v23 = vsel %vm1189_vm3, %v2634_v0, %v9666_v44 }
 0x562   : > { %v7477_v20 = vpack.i.bf16 %v2635_v23, %v2859_v38 }
 0x564   : > { %7435 = vxpose.xlu0.b32.end [2/2] (short) (narrow) %v7434_v4, 8 }
 0x566   : > { %7460 = vxpose.xlu1.b32.start [1/2] (short) (narrow) %v7459_v29, 8 }
 0x567   : > { %7471 = vxpose.xlu2.b32.end [2/2] (short) (narrow) %v7470_v19, 8 }
 0x56e   : > { %7462 = vxpose.xlu1.b32.end [2/2] (short) (narrow) %v7461_v54, 8 }
 0x56f   : > { %7478 = vxpose.xlu2.b32.start [1/2] (short) (narrow) %v7477_v20, 8 }
 0x577   : > { %7480 = vxpose.xlu2.b32.end [2/2] (short) (narrow) %v7479_v59, 8 }
 0x5b1   : > { %v7373_v22 = vpop.trf.xlu2 }
 0x5b2   : > { %v7374_v35 = vunpack.i.l.bf16 %v7373_v22  ;;  %v7377_v34 = vunpack.i.h.bf16 %v7373_v22 }
 0x5b4   : > { %v4456_v52 = vrot.slane %v7374_v35, 4 }
 0x5b6   : > { %v7346_v55 = vpop.trf.xlu0 }
 0x5b7   : > { %v7347_v1 = vunpack.i.l.bf16 %v7346_v55  ;;  %v7350_v14 = vunpack.i.h.bf16 %v7346_v55 }
 0x5b9   : > { %v4457_v8 = vsel %vm1189_vm3, %v4456_v52, %v7347_v1  ;;  %v4450_v20 = vrot.slane %v7350_v14, 4 }
 0x5ba   : > { %v4461_v35 = vperm.slane %v4457_v8, %v8177_v50 }
 0x5be   : > { %v7364_v42 = vpop.trf.xlu1 }
 0x5bf   : > { %v7368_v56 = vunpack.i.h.bf16 %v7364_v42  ;;  %v7365_v61 = vunpack.i.l.bf16 %v7364_v42 }
 0x5c1   : > { %v4468_v22 = vrot.slane %v7365_v61, 4 }
 0x5c4   : > { %v9744_v28 = vpop.trf.xlu2 }
 0x5c5   : > { %v7383_v24 = vunpack.i.l.bf16 %v9744_v28  ;;  %v7386_v52 = vunpack.i.h.bf16 %v9744_v28 }
 0x5c9   : > { %v7355_v12 = vpop.trf.xlu0 }
 0x5ca   : > { %v7356_v39 = vunpack.i.l.bf16 %v7355_v12  ;;  %v7359_v48 = vunpack.i.h.bf16 %v7355_v12 }
 0x5cc   : > { %v4506_v40 = vrot.slane %v7356_v39, 4  ;;  %v4524_v31 = vrot.slane %v7359_v48, 4 }
 0x5ce   : > { %v4507_v18 = vsel %vm1189_vm3, %v4506_v40, %v7368_v56  ;;  %v4525_v55 = vsel %vm1189_vm3, %v4524_v31, %v7383_v24 }
 0x5cf   : > { %v4511_v19 = vperm.slane %v4507_v18, %v8177_v50  ;;  %v4529_v8 = vperm.slane %v4525_v55, %v8177_v50 }
 0x5d7   : > { %v7400_v49 = vpop.trf.xlu1 }
 0x5d8   : > { %v7391_v27 = vpop.trf.xlu2  ;;  %v7401_v6 = vunpack.i.l.bf16 %v7400_v49  ;;  %v7404_v25 = vunpack.i.h.bf16 %v7400_v49 }
 0x5d9   : > { %v7395_v15 = vunpack.i.h.bf16 %v7391_v27  ;;  %v7392_v4 = vunpack.i.l.bf16 %v7391_v27 }
 0x5db   : > { %v4562_v21 = vrot.slane %v7395_v15, 4 }
 0x5dd   : > { %v4563_v17 = vsel %vm1189_vm3, %v4562_v21, %v7401_v6 }
 0x5de   : > { %v9746_v7 = vpop.trf.xlu0  ;;  %v9769_v0 = vperm.slane %v4563_v17, %v8177_v50 }
 0x5df   : > { %v7422_v53 = vunpack.i.h.bf16 %v9746_v7  ;;  %v7419_v27 = vunpack.i.l.bf16 %v9746_v7 }
 0x5e0   : > { %v4588_v18 = vrot.slane %v9769_v0, 4 }
 0x5e1   : > { %v4512_v57 = vrot.slane %v7422_v53, 4  ;;  %v4532_v53 = vrot.slane %v4511_v19, 4 }
 0x5e3   : > { %v4513_v37 = vsel %vm1189_vm3, %v4512_v57, %v7377_v34 }
 0x5e4   : > { %v4517_v51 = vperm.slane %v4513_v37, %v8177_v50 }
 0x5e6   : > { %v4530_v59 = vrot.slane %v4517_v51, 4  ;;  %v4533_v39 = vsel %vm1189_vm3, %v4517_v51, %v4532_v53  ;;  %v4542_v51 = vrot.slane %v4529_v8, 4 }
 0x5e8   : > { %v7454_v44 = vpop.trf.xlu2  ;;  %v4531_v11 = vsel %vm1189_vm3, %v4530_v59, %v4511_v19  ;;  %v4541_v19 = vperm.slane %v4533_v39, %v10406_v2 }
 0x5e9   : > { %v7409_v47 = vpop.trf.xlu1  ;;  %v7455_v3 = vunpack.i.l.bf16 %v7454_v44  ;;  %v7458_v16 = vunpack.i.h.bf16 %v7454_v44 }
 0x5ea   : > { %v7410_v60 = vunpack.i.l.bf16 %v7409_v47  ;;  %v7413_v33 = vunpack.i.h.bf16 %v7409_v47 }
 0x5eb   : > { %v4618_v43 = vrot.slane %v7458_v16, 4  ;;  %v4636_v16 = vrot.slane %v7419_v27, 4 }
 0x5ec   : > { %v4624_v36 = vrot.slane %v7410_v60, 4  ;;  %v4568_v13 = vrot.slane %v7413_v33, 4 }
 0x5ee   : > { %v4625_v30 = vsel %vm1189_vm3, %v4624_v36, %v7455_v3  ;;  %v4569_v62 = vsel %vm1189_vm3, %v4568_v13, %v7392_v4  ;;  %v4537_v3 = vperm.slane %v4531_v11, %v10406_v2  ;;  %v4474_v13 = vrot.slane %v4461_v35, 4 }
 0x5ef   : > { %v9755_v29 = vperm.slane %v4625_v30, %v8177_v50  ;;  %v9759_v38 = vperm.slane %v4569_v62, %v8177_v50  ;;  %v4518_v4 = vrot.slane %v7386_v52, 4  ;;  %v4560_v52 = vrot.slane %v4541_v19, 4 }
 0x5f0   : > { %v7427_v10 = vpop.trf.xlu0 }
 0x5f1   : > { %v7428_v32 = vunpack.i.l.bf16 %v7427_v10  ;;  %v7431_v41 = vunpack.i.h.bf16 %v7427_v10  ;;  %v4642_v46 = vrot.slane %v9755_v29, 4  ;;  %v4586_v63 = vrot.slane %v9759_v38, 4 }
 0x5f3   : > { %v4580_v26 = vrot.slane %v7428_v32, 4  ;;  %v4619_v45 = vsel %vm1189_vm3, %v4618_v43, %v7431_v41  ;;  %v4587_v47 = vsel %vm1189_vm3, %v4586_v63, %v9769_v0  ;;  %v4556_v43 = vrot.slane %v4537_v3, 4 }
 0x5f4   : > { %v4623_v23 = vperm.slane %v4619_v45, %v8177_v50  ;;  %v9792_v15 = vperm.slane %v4587_v47, %v10406_v2 }
 0x5f5   : > { %v4581_v54 = vsel %vm1189_vm3, %v4580_v26, %v7404_v25 }
 0x5f6   : > { %v4643_v12 = vsel %vm1189_vm3, %v4642_v46, %v4623_v23  ;;  %v4585_v49 = vperm.slane %v4581_v54, %v8177_v50  ;;  %v4612_v48 = vrot.slane %v9792_v15, 4  ;;  %v4644_v14 = vrot.slane %v4623_v23, 4 }
 0x5f7   : > { %v9785_v34 = vperm.slane %v4643_v12, %v10406_v2 }
 0x5f8   : > { %v9761_v58 = vpop.trf.xlu2  ;;  %v4598_v40 = vrot.slane %v4585_v49, 4  ;;  %v4645_v0 = vsel %vm1189_vm3, %v9755_v29, %v4644_v14 }
 0x5f9   : > { %v7473_v5 = vunpack.i.l.bf16 %v9761_v58  ;;  %v7476_v56 = vunpack.i.h.bf16 %v9761_v58  ;;  %v4668_v32 = vrot.slane %v9785_v34, 4 }
 0x5fa   : > { %v7445_v9 = vpop.trf.xlu1 }
 0x5fb   : > { %v7446_v1 = vunpack.i.l.bf16 %v7445_v9  ;;  %v4574_v42 = vrot.slane %v7473_v5, 4  ;;  %v7449_v28 = vunpack.i.h.bf16 %v7445_v9 }
 0x5fd   : > { %v4469_v57 = vsel %vm1189_vm3, %v4468_v22, %v7446_v1  ;;  %v4462_v62 = vrot.slane %v7449_v28, 4 }
 0x5fe   : > { %v4473_v37 = vperm.slane %v4469_v57, %v8177_v50 }
 0x600   : > { %v7436_v44 = vpop.trf.xlu0  ;;  %v4486_v26 = vrot.slane %v4473_v37, 4 }
 0x601   : > { %v7440_v60 = vunpack.i.h.bf16 %v7436_v44  ;;  %v7437_v33 = vunpack.i.l.bf16 %v7436_v44 }
 0x603   : > { %v4451_v7 = vsel %vm1189_vm3, %v4450_v20, %v7440_v60  ;;  %v4575_v36 = vsel %vm1189_vm3, %v4574_v42, %v7437_v33 }
 0x604   : > { %v4455_v10 = vperm.slane %v4451_v7, %v8177_v50  ;;  %v4579_v30 = vperm.slane %v4575_v36, %v8177_v50 }
 0x606   : > { %v4475_v6 = vsel %vm1189_vm3, %v4474_v13, %v4455_v10  ;;  %v4476_v21 = vrot.slane %v4455_v10, 4  ;;  %v4599_v17 = vsel %vm1189_vm3, %v4598_v40, %v4579_v30  ;;  %v4600_v31 = vrot.slane %v4579_v30, 4 }
 0x607   : > { %v4481_v46 = vperm.slane %v4475_v6, %v10406_v2  ;;  %v4605_v22 = vperm.slane %v4599_v17, %v10406_v2 }
 0x608   : > { %v7481_v41 = vpop.trf.xlu2  ;;  %v4477_v61 = vsel %vm1189_vm3, %v4461_v35, %v4476_v21  ;;  %v4601_v35 = vsel %vm1189_vm3, %v4585_v49, %v4600_v31 }
 0x609   : > { %v7485_v25 = vunpack.i.h.bf16 %v7481_v41  ;;  %v7482_v24 = vunpack.i.l.bf16 %v7481_v41  ;;  %v4500_v53 = vrot.slane %v4481_v46, 4  ;;  %v4485_v49 = vperm.slane %v4477_v61, %v10406_v2 }
 0x60a   : > { %v7463_v58 = vpop.trf.xlu1  ;;  %v4589_v61 = vsel %vm1189_vm3, %v9759_v38, %v4588_v18  ;;  %v10504_v38 = vld [vmem:[#allocation20_spill] sm:$0xff] }
 0x60b   : > { %v7467_v45 = vunpack.i.h.bf16 %v7463_v58  ;;  %v7464_v9 = vunpack.i.l.bf16 %v7463_v58  ;;  %v4463_v59 = vsel %vm1189_vm3, %v4462_v62, %v7485_v25  ;;  %v4519_v5 = vsel %vm1189_vm3, %v4518_v4, %v7482_v24 }
 0x60c   : > { %v4523_v54 = vperm.slane %v4519_v5, %v8177_v50  ;;  %v4467_v23 = vperm.slane %v4463_v59, %v8177_v50  ;;  %v4504_v14 = vrot.slane %v4485_v49, 4  ;;  %v4597_v31 = vperm.slane %v4589_v61, %v10406_v2 }
 0x60d   : > { %v4630_v63 = vrot.slane %v7467_v45, 4  ;;  %v4637_v11 = vsel %vm1189_vm3, %v4636_v16, %v7464_v9  ;;  %v4610_v16 = vrot.slane %v4605_v22, 4 }
 0x60e   : > { %v4641_v20 = vperm.slane %v4637_v11, %v8177_v50  ;;  %v4543_v1 = vsel %vm1189_vm3, %v4542_v51, %v4523_v54  ;;  %v4487_v29 = vsel %vm1189_vm3, %v4486_v26, %v4467_v23  ;;  %v4544_v42 = vrot.slane %v4523_v54, 4  ;;  %v10508_v11 = vld [vmem:[#allocation18_spill] sm:$0xff]  ;;  %v10509_v54 = vld [vmem:[#allocation19_spill] sm:$0xff] }
 0x60f   : > { %v4631_v55 = vsel %vm1189_vm3, %v4630_v63, %v7476_v56  ;;  %v4549_v44 = vperm.slane %v4543_v1, %v10406_v2  ;;  %v4493_v47 = vperm.slane %v4487_v29, %v10406_v2  ;;  %v4488_v33 = vrot.slane %v4467_v23, 4  ;;  %v10507_v63 = vld [vmem:[#allocation22_spill] sm:$0xff]  ;;  %v10510_v23 = vld [vmem:[#allocation24_spill] sm:$0xff] }
 0x610   : > { %v4635_v12 = vperm.slane %v4631_v55, %v8177_v50  ;;  %v4654_v27 = vrot.slane %v4641_v20, 4  ;;  %v4545_v60 = vsel %vm1189_vm3, %v4529_v8, %v4544_v42  ;;  %v4611_v17 = vsel %vm1189_vm3, %v4610_v16, %v9792_v15  ;;  %v10505_v15 = vld [vmem:[#allocation17_spill] sm:$0xff] }
 0x611   : > { %v4557_v57 = vsel %vm1189_vm3, %v4549_v44, %v4556_v43  ;;  %v4554_v7 = vrot.slane %v4549_v44, 4  ;;  %v4501_v10 = vsel %vm1189_vm3, %v4493_v47, %v4500_v53  ;;  %v4498_v13 = vrot.slane %v4493_v47, 4 }
 0x612   : > { %v4655_v28 = vsel %vm1189_vm3, %v4654_v27, %v4635_v12  ;;  %v4656_v39 = vrot.slane %v4635_v12, 4  ;;  %v4553_v4 = vperm.slane %v4545_v60, %v10406_v2  ;;  %v4489_v40 = vsel %vm1189_vm3, %v4473_v37, %v4488_v33  ;;  %v4800_v27 = vld [vmem:[%s10512_s26 + $0x8] sm:$0xff] }
 0x613   : > { %v4661_v36 = vperm.slane %v4655_v28, %v10406_v2  ;;  %v4555_v56 = vsel %vm1189_vm3, %v4554_v7, %v4537_v3  ;;  %v4499_v62 = vsel %vm1189_vm3, %v4498_v13, %v4481_v46  ;;  %v4497_v41 = vperm.slane %v4489_v40, %v10406_v2 }
 0x614   : > { %v4657_v8 = vsel %vm1189_vm3, %v4641_v20, %v4656_v39  ;;  %v4558_v51 = vrot.slane %v4553_v4, 4  ;;  %v4561_v43 = vsel %vm1189_vm3, %v4553_v4, %v4560_v52  ;;  %v4613_v37 = vsel %vm1189_vm3, %v4605_v22, %v4612_v48  ;;  %v10511_v20 = vld [vmem:[#allocation27_spill] sm:$0xff] }
 0x615   : > { %v4669_v30 = vsel %vm1189_vm3, %v4661_v36, %v4668_v32  ;;  %v4666_v6 = vrot.slane %v4661_v36, 4  ;;  %v4665_v21 = vperm.slane %v4657_v8, %v10406_v2  ;;  %v4609_v32 = vperm.slane %v4601_v35, %v10406_v2  ;;  %v4799_v35 = vld [vmem:[%s10512_s26] sm:$0xff] }
 0x616   : > { %4722 = vmatpush.msra.mxu3 %v4669_v30  ;;  %v4559_v25 = vsel %vm1189_vm3, %v4558_v51, %v4541_v19  ;;  %v4502_v24 = vrot.slane %v4497_v41, 4  ;;  %v4505_v58 = vsel %vm1189_vm3, %v4497_v41, %v4504_v14  ;;  %v4616_v5 = vrot.slane %v4597_v31, 4 }
 0x617   : > { %v4667_v3 = vsel %vm1189_vm3, %v4666_v6, %v9785_v34  ;;  %v4653_v34 = vperm.slane %v4645_v0, %v10406_v2  ;;  %v4670_v26 = vrot.slane %v4665_v21, 4  ;;  %v4614_v45 = vrot.slane %v4609_v32, 4  ;;  %v10506_v0 = vld [vmem:[#allocation25_spill] sm:$0xff] }
 0x618   : > { %4693 = vmatpush.msrb.mxu0 %v4667_v3  ;;  %4723 = vmatpush.msra.mxu3 %v4613_v37  ;;  %v4503_v48 = vsel %vm1189_vm3, %v4502_v24, %v4485_v49  ;;  %v4617_v46 = vsel %vm1189_vm3, %v4609_v32, %v4616_v5 }
 0x619   : > { %v4671_v18 = vsel %vm1189_vm3, %v4670_v26, %v4653_v34  ;;  %v4672_v19 = vrot.slane %v4653_v34, 4  ;;  %v4615_v9 = vsel %vm1189_vm3, %v4614_v45, %v4597_v31 }
 0x61a   : > { %4694 = vmatpush.msrb.mxu0 %v4611_v17  ;;  %4724 = vmatpush.msra.mxu3 %v4557_v57 }
 0x61b   : > { %v4673_v59 = vsel %vm1189_vm3, %v4665_v21, %v4672_v19 }
 0x61c   : > { %4695 = vmatpush.msrb.mxu0 %v4555_v56  ;;  %4725 = vmatpush.msra.mxu3 %v4501_v10 }
 0x61d   : > { %6705 = vmatmul.msk.f32.vlgmr.msra.gmra.mxu3 %vm4674_vm5, %v10504_v38 }
 0x61e   : > { %4751 = vmatpush.msrb.mxu3 %v4671_v18  ;;  %4696 = vmatpush.msrb.mxu0 %v4499_v62  ;;  %v9889_v62 = vpop.f32.mrf.mxu2 }
 0x61f   : > { %6703 = vmatmul.msk.f32.vlgmr.msrb.gmra.mxu0 %vm4674_vm5, %v10505_v15 }
 0x620   : > { %4752 = vmatpush.msrb.mxu3 %v4615_v9  ;;  %4780 = vmatpush.msra.mxu0 %v4673_v59 }
 0x622   : > { %4753 = vmatpush.msrb.mxu3 %v4559_v25  ;;  %4781 = vmatpush.msra.mxu0 %v4617_v46 }
 0x624   : > { %4754 = vmatpush.msrb.mxu3 %v4503_v48  ;;  %4782 = vmatpush.msra.mxu0 %v4561_v43 }
 0x625   : > { %6706 = vmatmul.msk.f32.gmra.mxu3 %vm4674_vm5, %v10506_v0 }
 0x626   : > { %4783 = vmatpush.msra.mxu0 %v4505_v58  ;;  %v9893_v51 = vpop.f32.mrf.mxu2 }
 0x627   : > { %6704 = vmatmul.msk.f32.gmra.mxu0 %vm4674_vm5, %v10507_v63 }
 0x62d   : > { %6707 = vmatmul.msk.f32.vlgmr.msrb.gmra.mxu3 %vm4674_vm5, %v10508_v11 }
 0x62f   : > { %6709 = vmatmul.msk.f32.vlgmr.msra.gmra.mxu0 %vm4674_vm5, %v10509_v54 }
 0x635   : > { %6708 = vmatmul.msk.f32.gmra.mxu3 %vm4674_vm5, %v10510_v23 }
 0x637   : > { %6710 = vmatmul.msk.f32.gmra.mxu0 %vm4674_vm5, %v10511_v20 }
 0x69c   : > { %v4698_v22 = vpop.f32.mrf.mxu0 }
 0x69d   : > { %v4791_v52 = vmul.f32 0.17677669, %v4698_v22 }
 0x69f   : > { %v4801_v55 = vadd.f32 %v4799_v35, %v4791_v52 }
 0x6a0   : > { %v4727_v1 = vpop.f32.mrf.mxu3 }
 0x6a1   : > { %v4793_v29 = vmul.f32 0.17677669, %v4727_v1  ;;  %v4809_v42 = vsel %vm1649_vm4, %v4801_v55, -inf }
 0x6a2   : > { %4810 = vmax.xlane.f32.xlu0 %v4809_v42 }
 0x6a3   : > { %v4803_v47 = vadd.f32 %v4799_v35, %v4793_v29 }
 0x6a4   : > { %v4701_v12 = vpop.f32.mrf.mxu0 }
 0x6a5   : > { %v4792_v44 = vmul.f32 0.17677669, %v4701_v12  ;;  %v4815_v33 = vsel %vm1649_vm4, %v4803_v47, -inf }
 0x6a7   : > { %v4802_v53 = vadd.f32 %v4800_v27, %v4792_v44 }
 0x6a8   : > { %v4730_v60 = vpop.f32.mrf.mxu3 }
 0x6a9   : > { %v4794_v49 = vmul.f32 0.17677669, %v4730_v60  ;;  %v4812_v28 = vsel %vm1649_vm4, %v4802_v53, -inf }
 0x6aa   : > { %4816 = vmax.xlane.f32.xlu0 %v4815_v33  ;;  %4813 = vmax.xlane.f32.xlu1 %v4812_v28 }
 0x6ab   : > { %v4804_v39 = vadd.f32 %v4800_v27, %v4794_v49 }
 0x6ac   : > { %v4785_v57 = vpop.f32.mrf.mxu0 }
 0x6ad   : > { %v4797_v36 = vmul.f32 0.17677669, %v4785_v57  ;;  %v4818_v13 = vsel %vm1649_vm4, %v4804_v39, -inf }
 0x6af   : > { %v9884_v56 = vadd.f32 %v4799_v35, %v4797_v36 }
 0x6b0   : > { %v4756_v7 = vpop.f32.mrf.mxu3 }
 0x6b1   : > { %v4795_v10 = vmul.f32 0.17677669, %v4756_v7  ;;  %v4827_v30 = vsel %vm1649_vm4, %v9884_v56, -inf }
 0x6b2   : > { %4819 = vmax.xlane.f32.xlu1 %v4818_v13 }
 0x6b3   : > { %v4805_v4 = vadd.f32 %v4799_v35, %v4795_v10 }
 0x6b4   : > { %v4788_v41 = vpop.f32.mrf.mxu0 }
 0x6b5   : > { %v4821_v16 = vsel %vm1649_vm4, %v4805_v4, -inf  ;;  %v4798_v43 = vmul.f32 0.17677669, %v4788_v41 }
 0x6b6   : > { %4822 = vmax.xlane.f32.xlu2 %v4821_v16 }
 0x6b7   : > { %v4808_v14 = vadd.f32 %v4800_v27, %v4798_v43 }
 0x6b8   : > { %v4759_v8 = vpop.f32.mrf.mxu3 }
 0x6b9   : > { %v4796_v40 = vmul.f32 0.17677669, %v4759_v8  ;;  %v4830_v3 = vsel %vm1649_vm4, %v4808_v14, -inf }
 0x6ba   : > { %4828 = vmax.xlane.f32.xlu1 %v4827_v30 }
 0x6bb   : > { %v4806_v6 = vadd.f32 %v4800_v27, %v4796_v40 }
 0x6bd   : > { %v4824_v21 = vsel %vm1649_vm4, %v4806_v6, -inf }
 0x6be   : > { %4825 = vmax.xlane.f32.xlu0 %v4824_v21 }
 0x6ce   : > { %1441 = vrot.lane.b32.xlu2 %v9889_v62, %s7804_s1 }
 0x6d2   : > { %1435 = vrot.lane.b32.xlu0 %v9889_v62, %s7803_s14 }
 0x6d3   : > { %1443 = vrot.lane.b32.xlu1 %v9893_v51, %s7804_s1 }
 0x6fd   : > { %4831 = vmax.xlane.f32.xlu1 %v4830_v3 }
 0x715   : > { %v4811_v37 = vpop.xlane.xlu0 %4810 }
 0x716   : > { %v4833_v32 = vsub.f32 %v4801_v55, %v4811_v37 }
 0x718   : > { %v4841_v61 = vmul.f32 1.442695, %v4833_v32 }
 0x71a   : > { %7545 = vpow2.f32 %v4841_v61 }
 0x71d   : > { %v4817_v25 = vpop.xlane.xlu0 %4816  ;;  %v4814_v24 = vpop.xlane.xlu1 %4813 }
 0x71e   : > { %v4835_v58 = vsub.f32 %v4803_v47, %v4817_v25  ;;  %v4834_v17 = vsub.f32 %v4802_v53, %v4814_v24 }
 0x720   : > { %v9900_v34 = vpop.eup %7545  ;;  %v4845_v26 = vmul.f32 1.442695, %v4835_v58  ;;  %v4843_v48 = vmul.f32 1.442695, %v4834_v17 }
 0x721   : > { %v4857_v31 = vsel %vm1649_vm4, %v9900_v34, 0.0 }
 0x722   : > { %7547 = vpow2.f32 %v4845_v26  ;;  %4858 = vadd.xlane.f32.xlu2 %v4857_v31 }
 0x723   : > { %7549 = vpow2.f32 %v4843_v48 }
 0x725   : > { %v4820_v45 = vpop.xlane.xlu1 %4819 }
 0x726   : > { %v4836_v38 = vsub.f32 %v4804_v39, %v4820_v45 }
 0x728   : > { %v9904_v18 = vpop.eup %7547  ;;  %v4847_v19 = vmul.f32 1.442695, %v4836_v38 }
 0x729   : > { %v9906_v15 = vpop.eup %7549  ;;  %v4823_v9 = vpop.xlane.xlu2 %4822  ;;  %v4863_v59 = vsel %vm1649_vm4, %v9904_v18, 0.0 }
 0x72a   : > { %7551 = vpow2.f32 %v4847_v19  ;;  %v4837_v5 = vsub.f32 %v4805_v4, %v4823_v9  ;;  %v4860_v46 = vsel %vm1649_vm4, %v9906_v15, 0.0  ;;  %4864 = vadd.xlane.f32.xlu1 %v4863_v59 }
 0x72b   : > { %4861 = vadd.xlane.f32.xlu0 %v4860_v46 }
 0x72c   : > { %v4849_v0 = vmul.f32 1.442695, %v4837_v5 }
 0x72d   : > { %v4829_v1 = vpop.xlane.xlu1 %4828 }
 0x72e   : > { %7553 = vpow2.f32 %v4849_v0  ;;  %v4839_v44 = vsub.f32 %v9884_v56, %v4829_v1 }
 0x730   : > { %v9912_v63 = vpop.eup %7551  ;;  %v4853_v53 = vmul.f32 1.442695, %v4839_v44 }
 0x731   : > { %v4826_v11 = vpop.xlane.xlu0 %4825  ;;  %v4866_v54 = vsel %vm1649_vm4, %v9912_v63, 0.0  ;;  %v1442_v39 = vpop.permute.xlu2 %1441 }
 0x732   : > { %v4838_v23 = vsub.f32 %v4806_v6, %v4826_v11 }
 0x733   : > { %4867 = vadd.xlane.f32.xlu0 %v4866_v54 }
 0x734   : > { %v9916_v20 = vpop.eup %7553  ;;  %v4851_v22 = vmul.f32 1.442695, %v4838_v23 }
 0x735   : > { %v4869_v35 = vsel %vm1649_vm4, %v9916_v20, 0.0 }
 0x736   : > { %7555 = vpow2.f32 %v4851_v22  ;;  %4870 = vadd.xlane.f32.xlu1 %v4869_v35 }
 0x73c   : > { %v9920_v52 = vpop.eup %7555 }
 0x73d   : > { %v4872_v55 = vsel %vm1649_vm4, %v9920_v52, 0.0 }
 0x73e   : > { %4873 = vadd.xlane.f32.xlu2 %v4872_v55 }
 0x744   : > { %v1436_v29 = vpop.permute.xlu0 %1435 }
 0x745   : > { %v1444_v42 = vpop.permute.xlu1 %1443 }
 0x74f   : > { %1437 = vrot.lane.b32.xlu1 %v9893_v51, %s7803_s14 }
 0x757   : > { %1447 = vrot.lane.b32.xlu1 %v9889_v62, %s7805_s9 }
 0x75f   : > { %1449 = vrot.lane.b32.xlu1 %v9893_v51, %s7805_s9 }
 0x767   : > { %5033 = vxpose.xlu2.b32.start [1/2] (short) (narrow) %v1436_v29, 32 }
 0x770   : > { %v4832_v12 = vpop.xlane.xlu1 %4831 }
 0x771   : > { %v4840_v27 = vsub.f32 %v4808_v14, %v4832_v12 }
 0x773   : > { %v4855_v47 = vmul.f32 1.442695, %v4840_v27 }
 0x775   : > { %7557 = vpow2.f32 %v4855_v47 }
 0x776   : > { %7559 = vpow2.f32 %v4853_v53 }
 0x77b   : > { %v9931_v60 = vpop.eup %7557 }
 0x77c   : > { %v4878_v49 = vsel %vm1649_vm4, %v9931_v60, 0.0  ;;  %v9935_v33 = vpop.eup %7559 }
 0x77d   : > { %4879 = vadd.xlane.f32.xlu0 %v4878_v49  ;;  %v4875_v28 = vsel %vm1649_vm4, %v9935_v33, 0.0 }
 0x785   : > { %4876 = vadd.xlane.f32.xlu0 %v4875_v28 }
 0x794   : > { %5065 = vxpose.xlu1.b32.start [1/2] (short) (narrow) %v1442_v39, 32 }
 0x795   : > { %v4859_v57 = vpop.xlane.xlu2 %4858 }
 0x796   : > { %7561 = vrcp.f32 %v4859_v57  ;;  %vm4886_vm8 = vweird.f32 %v4859_v57  ;;  %v4892_v61 = vand.u32 2147483648, %v4859_v57  ;;  %v4890_v58 = vand.u32 2147483647, %v4859_v57 }
 0x798   : > { %v4893_v19 = vor.u32 1.1754944e-38, %v4892_v61  ;;  %vm4891_vm13 = vcmp.eq.f32.partialorder %v4890_v58, 8.507059e+37 }
 0x79c   : > { %v7562_v7 = vpop.eup %7561  ;;  %5066 = vxpose.xlu1.b32.end [2/2] (short) (narrow) %v1444_v42, 32 }
 0x79d   : > { %v4882_v36 = vmul.f32 %v7562_v7, %v4859_v57  ;;  %v9939_v10 = vpop.xlane.xlu1 %4864  ;;  %vm4887_vm6 = vweird.f32 %v7562_v7 }
 0x79e   : > { %v4862_v13 = vpop.xlane.xlu0 %4861  ;;  %7563 = vrcp.f32 %v9939_v10  ;;  %vm9949_vm10 = vmor %vm4886_vm8, %vm4887_vm6  ;;  %vm4916_vm0 = vweird.f32 %v9939_v10  ;;  %v4920_v42 = vand.u32 2147483647, %v9939_v10 }
 0x79f   : > { %7565 = vrcp.f32 %v4862_v13  ;;  %v4883_v4 = vsub.f32 1.0, %v4882_v36  ;;  %v4907_v41 = vand.u32 2147483648, %v4862_v13  ;;  %v4905_v14 = vand.u32 2147483647, %v4862_v13 }
 0x7a0   : > { %vm4901_vm9 = vweird.f32 %v4862_v13  ;;  %vm4921_vm8 = vcmp.eq.f32.partialorder %v4920_v42, 8.507059e+37 }
 0x7a1   : > { %v4884_v8 = vmul.f32 %v7562_v7, %v4883_v4  ;;  %v4908_v26 = vor.u32 1.1754944e-38, %v4907_v41  ;;  %vm4906_vm12 = vcmp.eq.f32.partialorder %v4905_v14, 8.507059e+37 }
 0x7a3   : > { %v4885_v3 = vadd.f32 %v7562_v7, %v4884_v8 }
 0x7a4   : > { %v9942_v16 = vpop.eup %7563 }
 0x7a5   : > { %v7566_v56 = vpop.eup %7565  ;;  %v4912_v30 = vmul.f32 %v9942_v16, %v9939_v10  ;;  %v4889_v38 = vsel %vm9949_vm10, %v7562_v7, %v4885_v3  ;;  %vm4917_vm14 = vweird.f32 %v9942_v16 }
 0x7a6   : > { %v4897_v40 = vmul.f32 %v7566_v56, %v4862_v13  ;;  %v4868_v6 = vpop.xlane.xlu0 %4867  ;;  %vm4902_vm7 = vweird.f32 %v7566_v56  ;;  %vm9970_vm2 = vmor %vm4916_vm0, %vm4917_vm14 }
 0x7a7   : > { %7567 = vrcp.f32 %v4868_v6  ;;  %v4913_v32 = vsub.f32 1.0, %v4912_v30  ;;  %vm4903_vm11 = vmor %vm4901_vm9, %vm4902_vm7  ;;  %v4937_v0 = vand.u32 2147483648, %v4868_v6  ;;  %v4935_v23 = vand.u32 2147483647, %v4868_v6 }
 0x7a8   : > { %v4898_v21 = vsub.f32 1.0, %v4897_v40  ;;  %vm4931_vm1 = vweird.f32 %v4868_v6 }
 0x7a9   : > { %v9946_v43 = vpop.xlane.xlu1 %4870  ;;  %v4914_v48 = vmul.f32 %v9942_v16, %v4913_v32  ;;  %v4938_v12 = vor.u32 1.1754944e-38, %v4937_v0  ;;  %vm4936_vm7 = vcmp.eq.f32.partialorder %v4935_v23, 8.507059e+37 }
 0x7aa   : > { %v4899_v37 = vmul.f32 %v7566_v56, %v4898_v21  ;;  %7569 = vrcp.f32 %v9946_v43  ;;  %v4950_v8 = vand.u32 2147483647, %v9946_v43 }
 0x7ab   : > { %v4915_v35 = vadd.f32 %v9942_v16, %v4914_v48 }
 0x7ac   : > { %v4900_v25 = vadd.f32 %v7566_v56, %v4899_v37  ;;  %vm4951_vm0 = vcmp.eq.f32.partialorder %v4950_v8, 8.507059e+37 }
 0x7ad   : > { %v7568_v17 = vpop.eup %7567 }
 0x7ae   : > { %v4927_v31 = vmul.f32 %v7568_v17, %v4868_v6  ;;  %5001 = vxpose.xlu0.b32.start [1/2] (short) (narrow) %v9889_v62, 32  ;;  %v4904_v45 = vsel %vm4903_vm11, %v7566_v56, %v4900_v25  ;;  %v4894_v62 = vsel %vm4891_vm13, %v4893_v19, %v4889_v38  ;;  %vm4932_vm15 = vweird.f32 %v7568_v17 }
 0x7af   : > { %v4909_v9 = vsel %vm4906_vm12, %v4908_v26, %v4904_v45  ;;  %v4895_v55 = vmul.f32 %v9900_v34, %v4894_v62  ;;  %vm4933_vm6 = vmor %vm4931_vm1, %vm4932_vm15  ;;  %v4919_v34 = vsel %vm9970_vm2, %v9942_v16, %v4915_v35  ;;  %vm4946_vm11 = vweird.f32 %v9946_v43 }
 0x7b0   : > { %v9957_v59 = vpop.eup %7569  ;;  %v4928_v5 = vsub.f32 1.0, %v4927_v31  ;;  %v4910_v46 = vmul.f32 %v9906_v15, %v4909_v9  ;;  %v4922_v15 = vand.u32 2147483648, %v9939_v10 }
 0x7b1   : > { %v4942_v11 = vmul.f32 %v9957_v59, %v9946_v43  ;;  %v4874_v54 = vpop.xlane.xlu2 %4873  ;;  %vm4947_vm9 = vweird.f32 %v9957_v59 }
 0x7b2   : > { %v4929_v22 = vmul.f32 %v7568_v17, %v4928_v5  ;;  %7571 = vrcp.f32 %v4874_v54  ;;  %6711 = vmatpush.xpose.msk.msrb.mxu1 %vm1649_vm4, %v4910_v46  ;;  %v4923_v47 = vor.u32 1.1754944e-38, %v4922_v15  ;;  %v4965_v16 = vand.u32 2147483647, %v4874_v54  ;;  %vm9989_vm12 = vmor %vm4946_vm11, %vm4947_vm9 }
 0x7b3   : > { %v4943_v27 = vsub.f32 1.0, %v4942_v11  ;;  %vm4961_vm13 = vweird.f32 %v4874_v54 }
 0x7b4   : > { %v4930_v1 = vadd.f32 %v7568_v17, %v4929_v22  ;;  %v4924_v7 = vsel %vm4921_vm8, %v4923_v47, %v4919_v34  ;;  %vm4966_vm15 = vcmp.eq.f32.partialorder %v4965_v16, 8.507059e+37 }
 0x7b5   : > { %v4944_v39 = vmul.f32 %v9957_v59, %v4943_v27  ;;  %v4925_v10 = vmul.f32 %v9904_v18, %v4924_v7 }
 0x7b6   : > { %6712 = vmatpush.xpose.msk.msrb.mxu1 %vm1649_vm4, %v4895_v55  ;;  %5002 = vxpose.xlu0.b32.end [2/2] (short) (narrow) %v9893_v51, 32  ;;  %v4934_v44 = vsel %vm4933_vm6, %v7568_v17, %v4930_v1  ;;  %v4967_v51 = vand.u32 2147483648, %v4874_v54 }
 0x7b7   : > { %v4939_v53 = vsel %vm4936_vm7, %v4938_v12, %v4934_v44  ;;  %v4945_v13 = vadd.f32 %v9957_v59, %v4944_v39 }
 0x7b8   : > { %v7572_v49 = vpop.eup %7571  ;;  %v4940_v28 = vmul.f32 %v9912_v63, %v4939_v53  ;;  %v4952_v63 = vand.u32 2147483648, %v9946_v43  ;;  %v4968_v18 = vor.u32 1.1754944e-38, %v4967_v51 }
 0x7b9   : > { %v4957_v57 = vmul.f32 %v7572_v49, %v4874_v54  ;;  %vm4962_vm10 = vweird.f32 %v7572_v49  ;;  %v4949_v21 = vsel %vm9989_vm12, %v9957_v59, %v4945_v13  ;;  %vm5694_vm12 = vcmask 785408  }
 0x7ba   : > { %6717 = vmatpush.xpose.msk.msrb.mxu2 %vm1649_vm4, %v4940_v28  ;;  %vm4963_vm14 = vmor %vm4961_vm13, %vm4962_vm10  ;;  %v4953_v41 = vor.u32 1.1754944e-38, %v4952_v63 }
 0x7bb   : > { %v4958_v36 = vsub.f32 1.0, %v4957_v57 }
 0x7bc   : > { %v4954_v37 = vsel %vm4951_vm0, %v4953_v41, %v4949_v21 }
 0x7bd   : > { %v4959_v4 = vmul.f32 %v7572_v49, %v4958_v36  ;;  %v4955_v43 = vmul.f32 %v9916_v20, %v4954_v37 }
 0x7be   : > { %6718 = vmatpush.xpose.msk.msrb.mxu2 %vm1649_vm4, %v4925_v10 }
 0x7bf   : > { %v4960_v40 = vadd.f32 %v7572_v49, %v4959_v4 }
 0x7c1   : > { %v4964_v30 = vsel %vm4963_vm14, %v7572_v49, %v4960_v40  ;;  %v1438_v6 = vpop.permute.xlu1 %1437 }
 0x7c2   : > { %v4969_v14 = vsel %vm4966_vm15, %v4968_v18, %v4964_v30  ;;  %5034 = vxpose.xlu2.b32.end [2/2] (short) (narrow) %v1438_v6, 32 }
 0x7c3   : > { %v4970_v3 = vmul.f32 %v9920_v52, %v4969_v14 }
 0x7c5   : > { %6723 = vmatpush.xpose.msk.msra.mxu3 %vm1649_vm4, %v4970_v3 }
 0x7c9   : > { %6724 = vmatpush.xpose.msk.msra.mxu3 %vm1649_vm4, %v4955_v43  ;;  %v1448_v32 = vpop.permute.xlu1 %1447 }
 0x7d1   : > { %v1450_v61 = vpop.permute.xlu1 %1449 }
 0x7da   : > { %5097 = vxpose.xlu2.b32.start [1/2] (short) (narrow) %v1448_v32, 32 }
 0x7e2   : > { %5098 = vxpose.xlu2.b32.end [2/2] (short) (narrow) %v1450_v61, 32 }
 0x7f0   : > { %v4880_v25 = vpop.xlane.xlu0 %4879 }
 0x7f1   : > { %7573 = vrcp.f32 %v4880_v25  ;;  %v4997_v48 = vand.u32 2147483648, %v4880_v25  ;;  %v4995_v31 = vand.u32 2147483647, %v4880_v25  ;;  %vm4991_vm2 = vweird.f32 %v4880_v25 }
 0x7f3   : > { %v4998_v38 = vor.u32 1.1754944e-38, %v4997_v48  ;;  %vm4996_vm7 = vcmp.eq.f32.partialorder %v4995_v31, 8.507059e+37 }
 0x7f7   : > { %v7574_v24 = vpop.eup %7573 }
 0x7f8   : > { %v4987_v58 = vmul.f32 %v7574_v24, %v4880_v25  ;;  %v4877_v17 = vpop.xlane.xlu0 %4876  ;;  %vm4992_vm1 = vweird.f32 %v7574_v24 }
 0x7f9   : > { %7575 = vrcp.f32 %v4877_v17  ;;  %vm4993_vm6 = vmor %vm4991_vm2, %vm4992_vm1  ;;  %v4982_v0 = vand.u32 2147483648, %v4877_v17  ;;  %v4980_v54 = vand.u32 2147483647, %v4877_v17  ;;  %vm4976_vm9 = vweird.f32 %v4877_v17 }
 0x7fa   : > { %v4988_v26 = vsub.f32 1.0, %v4987_v58 }
 0x7fb   : > { %v4983_v23 = vor.u32 1.1754944e-38, %v4982_v0  ;;  %vm4981_vm11 = vcmp.eq.f32.partialorder %v4980_v54, 8.507059e+37 }
 0x7fc   : > { %v4989_v52 = vmul.f32 %v7574_v24, %v4988_v26 }
 0x7fe   : > { %v4990_v45 = vadd.f32 %v7574_v24, %v4989_v52 }
 0x7ff   : > { %v7576_v20 = vpop.eup %7575 }
 0x800   : > { %v4994_v19 = vsel %vm4993_vm6, %v7574_v24, %v4990_v45  ;;  %v4972_v9 = vmul.f32 %v7576_v20, %v4877_v17  ;;  %vm4977_vm8 = vweird.f32 %v7576_v20 }
 0x801   : > { %v4999_v59 = vsel %vm4996_vm7, %v4998_v38, %v4994_v19  ;;  %vm4978_vm10 = vmor %vm4976_vm9, %vm4977_vm8 }
 0x802   : > { %v4973_v5 = vsub.f32 1.0, %v4972_v9  ;;  %v5000_v46 = vmul.f32 %v9931_v60, %v4999_v59 }
 0x804   : > { %v4974_v11 = vmul.f32 %v7576_v20, %v4973_v5  ;;  %6729 = vmatpush.xpose.msk.msrb.mxu0 %vm1649_vm4, %v5000_v46 }
 0x806   : > { %v4975_v62 = vadd.f32 %v7576_v20, %v4974_v11 }
 0x808   : > { %v4979_v22 = vsel %vm4978_vm10, %v7576_v20, %v4975_v62 }
 0x809   : > { %v4984_v35 = vsel %vm4981_vm11, %v4983_v23, %v4979_v22 }
 0x80a   : > { %v4985_v15 = vmul.f32 %v9935_v33, %v4984_v35 }
 0x80c   : > { %6730 = vmatpush.xpose.msk.msrb.mxu0 %vm1649_vm4, %v4985_v15 }
 0x838   : > { %v5081_v55 = vpop.trf.xlu1 }
 0x839   : > { %6725 = vmatmul.msk.f32.vlgmr.msra.gmra.mxu3 %vm1649_vm4, %v5081_v55 }
 0x840   : > { %v5082_v29 = vpop.trf.xlu1 }
 0x841   : > { %6726 = vmatmul.msk.f32.gmra.mxu3 %vm1649_vm4, %v5082_v29 }
 0x848   : > { %v5083_v27 = vpop.trf.xlu1 }
 0x849   : > { %6727 = vmatmul.msk.f32.gmra.mxu3 %vm1649_vm4, %v5083_v27 }
 0x850   : > { %v5084_v34 = vpop.trf.xlu1 }
 0x851   : > { %6728 = vmatmul.msk.f32.gmra.mxu3 %vm1649_vm4, %v5084_v34 }
 0x852   : > { %v5017_v60 = vpop.trf.xlu0 }
 0x853   : > { %v5049_v1 = vpop.trf.xlu2  ;;  %6713 = vmatmul.msk.f32.vlgmr.msrb.gmra.mxu1 %vm1649_vm4, %v5017_v60 }
 0x854   : > { %6719 = vmatmul.msk.f32.vlgmr.msrb.gmra.mxu2 %vm1649_vm4, %v5049_v1 }
 0x85a   : > { %v5018_v42 = vpop.trf.xlu0 }
 0x85b   : > { %v5050_v12 = vpop.trf.xlu2  ;;  %6714 = vmatmul.msk.f32.gmra.mxu1 %vm1649_vm4, %v5018_v42 }
 0x85c   : > { %6720 = vmatmul.msk.f32.gmra.mxu2 %vm1649_vm4, %v5050_v12 }
 0x862   : > { %v5019_v33 = vpop.trf.xlu0 }
 0x863   : > { %v5051_v44 = vpop.trf.xlu2  ;;  %6715 = vmatmul.msk.f32.gmra.mxu1 %vm1649_vm4, %v5019_v33  ;;  %v7031_v33 = vld [vmem:[%s8038_s15 + $0x38] sm:$0xff] }
 0x864   : > { %6721 = vmatmul.msk.f32.gmra.mxu2 %vm1649_vm4, %v5051_v44  ;;  %5762 = vmatpush.bf16.msra.mxu1 %v7031_v33 }
 0x86a   : > { %v5020_v47 = vpop.trf.xlu0 }
 0x86b   : > { %v5052_v53 = vpop.trf.xlu2  ;;  %6716 = vmatmul.msk.f32.gmra.mxu1 %vm1649_vm4, %v5020_v47 }
 0x86c   : > { %6722 = vmatmul.msk.f32.gmra.mxu2 %vm1649_vm4, %v5052_v53 }
 0x873   : > { %v5113_v49 = vpop.trf.xlu2 }
 0x874   : > { %6731 = vmatmul.msk.f32.vlgmr.msrb.gmra.mxu0 %vm1649_vm4, %v5113_v49 }
 0x87b   : > { %v5114_v28 = vpop.trf.xlu2 }
 0x87c   : > { %6732 = vmatmul.msk.f32.gmra.mxu0 %vm1649_vm4, %v5114_v28 }
 0x883   : > { %v5115_v39 = vpop.trf.xlu2 }
 0x884   : > { %6733 = vmatmul.msk.f32.gmra.mxu0 %vm1649_vm4, %v5115_v39 }
 0x88b   : > { %v5116_v57 = vpop.trf.xlu2 }
 0x88c   : > { %6734 = vmatmul.msk.f32.gmra.mxu0 %vm1649_vm4, %v5116_v57  ;;  %vm5691_vm4 = vcmask 523264  }
 0x8bc   : > { %v5258_v7 = vpop.f32.mrf.mxu3 }
 0x8c4   : > { %v5261_v10 = vpop.f32.mrf.mxu3 }
 0x8cc   : > { %v5264_v16 = vpop.f32.mrf.mxu3 }
 0x8d0   : > { %v5164_v36 = vpop.f32.mrf.mxu1 }
 0x8d1   : > { %v7504_v51 = vpack.i.bf16 %v5164_v36, %v5258_v7 }
 0x8d3   : > { %7505 = vxpose.xlu1.b32.start [1/4] (short) (narrow) %v7504_v51, 16 }
 0x8d4   : > { %v5267_v8 = vpop.f32.mrf.mxu3 }
 0x8d7   : > { %v5211_v30 = vpop.f32.mrf.mxu2 }
 0x8d8   : > { %v5167_v13 = vpop.f32.mrf.mxu1 }
 0x8d9   : > { %v7506_v4 = vpack.i.bf16 %v5167_v13, %v5261_v10 }
 0x8db   : > { %7507 = vxpose.xlu1.b32.cont [2/4] (short) (narrow) %v7506_v4, 16 }
 0x8df   : > { %v5214_v41 = vpop.f32.mrf.mxu2 }
 0x8e0   : > { %v5170_v63 = vpop.f32.mrf.mxu1 }
 0x8e1   : > { %v7508_v56 = vpack.i.bf16 %v5170_v63, %v5264_v16 }
 0x8e3   : > { %7509 = vxpose.xlu1.b32.cont [3/4] (short) (narrow) %v7508_v56, 16 }
 0x8e7   : > { %v5217_v37 = vpop.f32.mrf.mxu2 }
 0x8e8   : > { %v5173_v40 = vpop.f32.mrf.mxu1 }
 0x8e9   : > { %v7510_v18 = vpack.i.bf16 %v5173_v40, %v5267_v8 }
 0x8eb   : > { %7511 = vxpose.xlu1.b32.end [4/4] (short) (narrow) %v7510_v18, 16 }
 0x8ef   : > { %v5220_v61 = vpop.f32.mrf.mxu2 }
 0x8f1   : > { %v5305_v6 = vpop.f32.mrf.mxu0 }
 0x8f2   : > { %v7486_v21 = vpack.i.bf16 %v5211_v30, %v5305_v6 }
 0x8f4   : > { %7487 = vxpose.xlu0.b32.start [1/4] (short) (narrow) %v7486_v21, 16 }
 0x8f9   : > { %v5308_v14 = vpop.f32.mrf.mxu0 }
 0x8fa   : > { %v7488_v3 = vpack.i.bf16 %v5214_v41, %v5308_v14 }
 0x8fc   : > { %7489 = vxpose.xlu0.b32.cont [2/4] (short) (narrow) %v7488_v3, 16 }
 0x901   : > { %v5311_v43 = vpop.f32.mrf.mxu0 }
 0x902   : > { %v7490_v32 = vpack.i.bf16 %v5217_v37, %v5311_v43 }
 0x904   : > { %7491 = vxpose.xlu0.b32.cont [3/4] (short) (narrow) %v7490_v32, 16 }
 0x909   : > { %v5314_v25 = vpop.f32.mrf.mxu0 }
 0x90a   : > { %v7492_v24 = vpack.i.bf16 %v5220_v61, %v5314_v25 }
 0x90c   : > { %7493 = vxpose.xlu0.b32.end [4/4] (short) (narrow) %v7492_v24, 16 }
 0x977   : > { %v7512_v58 = vpop.trf.xlu1 }
 0x978   : > { %v7516_v26 = vunpack.i.h.bf16 %v7512_v58  ;;  %v7513_v48 = vunpack.i.l.bf16 %v7512_v58 }
 0x97a   : > { %v5447_v52 = vrot.slane %v7516_v26, 4  ;;  %v5445_v31 = vrot.slane %v7513_v48, 4 }
 0x97c   : > { %v5446_v38 = vsel %vm1189_vm3, %v5445_v31, %v7516_v26  ;;  %v5448_v19 = vsel %vm1189_vm3, %v7513_v48, %v5447_v52 }
 0x97d   : > { %v5452_v11 = vperm.slane %v5446_v38, %v8177_v50  ;;  %v5456_v54 = vperm.slane %v5448_v19, %v8177_v50 }
 0x97f   : > { %v7517_v17 = vpop.trf.xlu1  ;;  %v5471_v60 = vrot.slane %v5452_v11, 4  ;;  %v5483_v1 = vrot.slane %v5456_v54, 4 }
 0x980   : > { %v7521_v45 = vunpack.i.h.bf16 %v7517_v17  ;;  %v7518_v20 = vunpack.i.l.bf16 %v7517_v17 }
 0x982   : > { %v5503_v59 = vrot.slane %v7521_v45, 4  ;;  %v5501_v5 = vrot.slane %v7518_v20, 4 }
 0x984   : > { %v5502_v22 = vsel %vm1189_vm3, %v5501_v5, %v7521_v45  ;;  %v5504_v35 = vsel %vm1189_vm3, %v7518_v20, %v5503_v59 }
 0x985   : > { %v5508_v12 = vperm.slane %v5502_v22, %v8177_v50  ;;  %v5512_v27 = vperm.slane %v5504_v35, %v8177_v50 }
 0x987   : > { %v5527_v63 = vrot.slane %v5508_v12, 4  ;;  %v5539_v56 = vrot.slane %v5512_v27, 4 }
 0x998   : > { %v7494_v9 = vpop.trf.xlu0 }
 0x999   : > { %v7498_v46 = vunpack.i.h.bf16 %v7494_v9  ;;  %v7495_v0 = vunpack.i.l.bf16 %v7494_v9 }
 0x99b   : > { %v5459_v62 = vrot.slane %v7498_v46, 4  ;;  %v5457_v23 = vrot.slane %v7495_v0, 4 }
 0x99d   : > { %v5458_v15 = vsel %vm1189_vm3, %v5457_v23, %v7498_v46  ;;  %v5460_v55 = vsel %vm1189_vm3, %v7495_v0, %v5459_v62 }
 0x99e   : > { %v5464_v29 = vperm.slane %v5458_v15, %v8177_v50  ;;  %v5468_v42 = vperm.slane %v5460_v55, %v8177_v50 }
 0x9a0   : > { %v5469_v44 = vrot.slane %v5464_v29, 4  ;;  %v5472_v34 = vsel %vm1189_vm3, %v5464_v29, %v5471_v60  ;;  %v5481_v47 = vrot.slane %v5468_v42, 4  ;;  %v5484_v53 = vsel %vm1189_vm3, %v5468_v42, %v5483_v1  ;;  %v7499_v49 = vpop.trf.xlu0 }
 0x9a1   : > { %v5480_v28 = vperm.slane %v5472_v34, %v10406_v2  ;;  %v5492_v39 = vperm.slane %v5484_v53, %v10406_v2  ;;  %v7503_v57 = vunpack.i.h.bf16 %v7499_v49  ;;  %v7500_v51 = vunpack.i.l.bf16 %v7499_v49 }
 0x9a2   : > { %v5470_v7 = vsel %vm1189_vm3, %v5469_v44, %v5452_v11  ;;  %v5482_v36 = vsel %vm1189_vm3, %v5481_v47, %v5456_v54 }
 0x9a3   : > { %v5476_v10 = vperm.slane %v5470_v7, %v10406_v2  ;;  %v5488_v13 = vperm.slane %v5482_v36, %v10406_v2  ;;  %v5495_v4 = vrot.slane %v5480_v28, 4  ;;  %v5499_v16 = vrot.slane %v5492_v39, 4 }
 0x9a4   : > { %v5515_v8 = vrot.slane %v7503_v57, 4  ;;  %v5513_v40 = vrot.slane %v7500_v51, 4 }
 0x9a5   : > { %v5493_v18 = vrot.slane %v5476_v10, 4  ;;  %v5496_v30 = vsel %vm1189_vm3, 0.0, %v5495_v4  ;;  %v5497_v6 = vrot.slane %v5488_v13, 4  ;;  %v5500_v21 = vsel %vm1189_vm3, 0.0, %v5499_v16 }
 0x9a6   : > { %v5557_v41 = vsel %vm1189_vm3, %v5495_v4, %v5476_v10  ;;  %v5562_v14 = vrot.slane %v5496_v30, 4  ;;  %v5573_v3 = vrot.slane %v5500_v21, 4  ;;  %v5514_v37 = vsel %vm1189_vm3, %v5513_v40, %v7503_v57 }
 0x9a7   : > { %v5494_v43 = vsel %vm1189_vm3, 0.0, %v5493_v18  ;;  %v5516_v32 = vsel %vm1189_vm3, %v7500_v51, %v5515_v8  ;;  %v5520_v61 = vperm.slane %v5514_v37, %v8177_v50  ;;  %v5498_v25 = vsel %vm1189_vm3, 0.0, %v5497_v6 }
 0x9a8   : > { %v5524_v24 = vperm.slane %v5516_v32, %v8177_v50  ;;  %v5561_v58 = vperm.slane %v5557_v41, %v8177_v50  ;;  %v5563_v17 = vsel %vm1189_vm3, %v5562_v14, %v5494_v43  ;;  %v5568_v26 = vsel %vm1189_vm3, %v5499_v16, %v5488_v13 }
 0x9a9   : > { %v5525_v48 = vrot.slane %v5520_v61, 4  ;;  %v5528_v52 = vsel %vm1189_vm3, %v5520_v61, %v5527_v63  ;;  %v5567_v31 = vperm.slane %v5563_v17, %v8177_v50  ;;  %v5572_v45 = vperm.slane %v5568_v26, %v8177_v50 }
 0x9aa   : > { %v5536_v20 = vperm.slane %v5528_v52, %v10406_v2  ;;  %v5537_v38 = vrot.slane %v5524_v24, 4  ;;  %v5540_v19 = vsel %vm1189_vm3, %v5524_v24, %v5539_v56  ;;  %v5574_v9 = vsel %vm1189_vm3, %v5573_v3, %v5498_v25 }
 0x9ab   : > { %v5526_v59 = vsel %vm1189_vm3, %v5525_v48, %v5508_v12  ;;  %v5548_v5 = vperm.slane %v5540_v19, %v10406_v2  ;;  %v5578_v46 = vperm.slane %v5574_v9, %v8177_v50  ;;  %v5581_v0 = vrot.slane %v5561_v58, 4 }
 0x9ac   : > { %v5532_v11 = vperm.slane %v5526_v59, %v10406_v2  ;;  %v5538_v54 = vsel %vm1189_vm3, %v5537_v38, %v5512_v27  ;;  %v5551_v62 = vrot.slane %v5536_v20, 4  ;;  %v5593_v23 = vrot.slane %v5572_v45, 4 }
 0x9ad   : > { %v5544_v22 = vperm.slane %v5538_v54, %v10406_v2  ;;  %v5555_v35 = vrot.slane %v5548_v5, 4  ;;  %v5582_v15 = vsel %vm1189_vm3, %v5567_v31, %v5581_v0  ;;  %v5579_v29 = vrot.slane %v5567_v31, 4  ;;  %v7030_v5 = vld [vmem:[%s8038_s15 + $0x30] sm:$0xff]  ;;  %v7028_v0 = vld [vmem:[%s8038_s15 + $0x20] sm:$0xff] }
 0x9ae   : > { %v5549_v55 = vrot.slane %v5532_v11, 4  ;;  %v5552_v60 = vsel %vm1189_vm3, 0.0, %v5551_v62  ;;  %v5611_v1 = vsel %vm1189_vm3, %v5551_v62, %v5532_v11  ;;  %v5594_v44 = vsel %vm1189_vm3, %v5578_v46, %v5593_v23  ;;  %5763 = vmatpush.bf16.msra.mxu1 %v7030_v5  ;;  %v7027_v11 = vld [vmem:[%s8038_s15 + $0x18] sm:$0xff]  ;;  %v7026_v54 = vld [vmem:[%s8038_s15 + $0x10] sm:$0xff]  ;;  %v7025_v62 = vld [vmem:[%s8038_s15 + $0x8] sm:$0xff] }
 0x9af   : > { %v5553_v42 = vrot.slane %v5544_v22, 4  ;;  %v5556_v12 = vsel %vm1189_vm3, 0.0, %v5555_v35  ;;  %v5616_v33 = vrot.slane %v5552_v60, 4  ;;  %v5590_v47 = vperm.slane %v5582_v15, %v10406_v2  ;;  %v7024_v23 = vld [vmem:[%s8038_s15] sm:$0xff] }
 0x9b0   : > { %v5550_v27 = vsel %vm1189_vm3, 0.0, %v5549_v55  ;;  %v5627_v34 = vrot.slane %v5556_v12, 4  ;;  %v5615_v49 = vperm.slane %v5611_v1, %v8177_v50  ;;  %v5622_v39 = vsel %vm1189_vm3, %v5555_v35, %v5544_v22 }
 0x9b1   : > { %v5554_v53 = vsel %vm1189_vm3, 0.0, %v5553_v42  ;;  %v5617_v28 = vsel %vm1189_vm3, %v5616_v33, %v5550_v27  ;;  %v5602_v57 = vperm.slane %v5594_v44, %v10406_v2  ;;  %v5626_v36 = vperm.slane %v5622_v39, %v8177_v50 }
 0x9b2   : > { %v5621_v7 = vperm.slane %v5617_v28, %v8177_v50  ;;  %v5628_v51 = vsel %vm1189_vm3, %v5627_v34, %v5554_v53  ;;  %v5635_v13 = vrot.slane %v5615_v49, 4  ;;  %v5580_v4 = vsel %vm1189_vm3, %v5579_v29, %v5561_v58 }
 0x9b3   : > { %v5632_v10 = vperm.slane %v5628_v51, %v8177_v50  ;;  %v5647_v16 = vrot.slane %v5626_v36, 4  ;;  %v5586_v63 = vperm.slane %v5580_v4, %v10406_v2  ;;  %v5591_v56 = vrot.slane %v5578_v46, 4  ;;  %v7029_v46 = vld [vmem:[%s8038_s15 + $0x28] sm:$0xff] }
 0x9b4   : > { %v5633_v8 = vrot.slane %v5621_v7, 4  ;;  %v5609_v40 = vrot.slane %v5590_v47, 4  ;;  %v5636_v18 = vsel %vm1189_vm3, %v5621_v7, %v5635_v13  ;;  %v5607_v41 = vrot.slane %v5602_v57, 4  ;;  %5764 = vmatpush.bf16.msra.mxu1 %v7029_v46  ;;  %v7597_v7 = vld [vmem:[%s10337_s11] sm:$0xff]  ;;  %v7598_v13 = vld [vmem:[%s10337_s11 + $0x8] sm:$0xff] }
 0x9b5   : > { %v5645_v30 = vrot.slane %v5632_v10, 4  ;;  %v5644_v6 = vperm.slane %v5636_v18, %v10406_v2  ;;  %v5648_v21 = vsel %vm1189_vm3, %v5632_v10, %v5647_v16  ;;  %v5592_v50 = vsel %vm1189_vm3, %v5591_v56, %v5572_v45  ;;  %v7062_v56 = vld [vmem:[%s8040_s2 + $0xec] sm:$0xf0]  ;;  %v6883_v18 = vld [vmem:[%s8040_s2 + $0xf0] sm:$0xf0] }
 0x9b6   : > { %v5656_v14 = vperm.slane %v5648_v21, %v10406_v2  ;;  %v5634_v3 = vsel %vm1189_vm3, %v5633_v8, %v5615_v49  ;;  %v5605_v32 = vrot.slane %v5586_v63, 4  ;;  %v5610_v24 = vsel %vm1189_vm3, %v5602_v57, %v5609_v40  ;;  %v7060_v8 = vld [vmem:[%s8040_s2 + $0xe4] sm:$0xf] }
 0x9b7   : > { %v5646_v37 = vsel %vm1189_vm3, %v5645_v30, %v5626_v36  ;;  %v5663_v43 = vrot.slane %v5644_v6, 4  ;;  %v5640_v61 = vperm.slane %v5634_v3, %v10406_v2  ;;  %v5598_v26 = vperm.slane %v5592_v50, %v10406_v2  ;;  %v6889_v30 = vld [vmem:[%s8040_s2 + $0xe8] sm:$0xf]  ;;  %v6891_v50 = vld [vmem:[%s8040_s2 + $0xf8] sm:$0xf0] }
 0x9b8   : > { %v5652_v25 = vperm.slane %v5646_v37, %v10406_v2  ;;  %v5661_v58 = vrot.slane %v5656_v14, 4  ;;  %v5608_v45 = vsel %vm1189_vm3, %v5607_v41, %v5590_v47  ;;  %5765 = vmatpush.bf16.msra.mxu1 %v7028_v0  ;;  %v6886_v21 = vor.u32 %v7060_v8, %v6883_v18  ;;  %v6865_v37 = vld [vmem:[%s8040_s2 + $0xc0] sm:$0xf] }
 0x9b9   : > { %v5664_v17 = vsel %vm1189_vm3, %v5656_v14, %v5663_v43  ;;  %v5659_v48 = vrot.slane %v5640_v61, 4  ;;  %v5606_v19 = vsel %vm1189_vm3, %v5598_v26, %v5605_v32  ;;  %v5603_v35 = vrot.slane %v5598_v26, 4  ;;  %v7061_v14 = vld [vmem:[%s8040_s2 + $0xec] sm:$0xf]  ;;  %v7058_v43 = vld [vmem:[%s8040_s2 + $0xcc] sm:$0xf0] }
 0x9ba   : > { %v5657_v52 = vrot.slane %v5652_v25, 4  ;;  %v7532_v31 = vpack.i.bf16 %v5664_v17, %v5610_v24  ;;  %v5662_v20 = vsel %vm1189_vm3, %v5661_v58, %v5644_v6  ;;  %v7063_v6 = vld [vmem:[%s8040_s2 + $0xf4] sm:$0xf0]  ;;  %v6894_v3 = vor.u32 %v7061_v14, %v6891_v50  ;;  %6023 = vmatpush.bf16.msrb.mxu3 %v6886_v21  ;;  %v7056_v32 = vld [vmem:[%s8040_s2 + $0xc4] sm:$0xf] }
 0x9bb   : > { %v7527_v38 = vpack.i.bf16 %v5662_v20, %v5608_v45  ;;  %v5660_v9 = vsel %vm1189_vm3, %v5652_v25, %v5659_v48  ;;  %v5604_v12 = vsel %vm1189_vm3, %v5603_v35, %v5586_v63  ;;  %v6881_v63 = vld [vmem:[%s8040_s2 + $0xe0] sm:$0xf]  ;;  %v6890_v41 = vor.u32 %v7063_v6, %v6889_v30  ;;  %v6867_v24 = vld [vmem:[%s8040_s2 + $0xd0] sm:$0xf0]  ;;  %v6873_v58 = vld [vmem:[%s8040_s2 + $0xc8] sm:$0xf] }
 0x9bc   : > { %v5658_v59 = vsel %vm1189_vm3, %v5657_v52, %v5640_v61  ;;  %7533 = vrot.lane.b32.xlu0 %v7532_v31, %s7803_s14  ;;  %v7522_v2 = vpack.i.bf16 %v5660_v9, %v5606_v19  ;;  %5766 = vmatpush.bf16.msra.mxu1 %v7027_v11  ;;  %v6882_v40 = vor.u32 %v7062_v56, %v6881_v63  ;;  %v7059_v17 = vld [vmem:[%s8040_s2 + $0xd4] sm:$0xf0]  ;;  %v10519_v26 = vld [vmem:[#allocation16_spill] sm:$0xff]  ;;  %v7057_v45 = vld [vmem:[%s8040_s2 + $0xcc] sm:$0xf] }
 0x9bd   : > { %7528 = vrot.lane.b32.xlu1 %v7527_v38, %s7804_s1  ;;  %6037 = vmatpush.bf16.msra.mxu0 %v6890_v41  ;;  %v6866_v25 = vor.u32 %v7058_v43, %v6865_v37  ;;  %v6870_v52 = vor.u32 %v7056_v32, %v6867_v24  ;;  %v6874_v31 = vor.u32 %v7059_v17, %v6873_v58  ;;  %v6875_v20 = vld [vmem:[%s8040_s2 + $0xd8] sm:$0xf0]  ;;  %v6849_v38 = vld [vmem:[%s8040_s2 + $0xa0] sm:$0xf]  ;;  %v7054_v9 = vld [vmem:[%s8040_s2 + $0xac] sm:$0xf0] }
 0x9be   : > { %7523 = vrot.lane.b32.xlu2 %v7522_v2, %s7805_s9  ;;  %6009 = vmatpush.bf16.msra.mxu2 %v6882_v40  ;;  %v6878_v19 = vor.u32 %v7057_v45, %v6875_v20  ;;  %v6851_v2 = vld [vmem:[%s8040_s2 + $0xb0] sm:$0xf0]  ;;  %v6850_v46 = vor.u32 %v7054_v9, %v6849_v38  ;;  %v6857_v11 = vld [vmem:[%s8040_s2 + $0xa8] sm:$0xf]  ;;  %v6833_v35 = vld [vmem:[%s8040_s2 + $0x80] sm:$0xf] }
 0x9bf   : > { %6024 = vmatpush.bf16.msrb.mxu3 %v6870_v52  ;;  %v6801_v56 = vld [vmem:[%s8040_s2 + $0x40] sm:$0xf]  ;;  %v7042_v6 = vld [vmem:[%s8040_s2 + $0x4c] sm:$0xf0]  ;;  %v7040_v21 = vld [vmem:[%s8040_s2 + $0x44] sm:$0xf] }
 0x9c0   : > { %5767 = vmatpush.bf16.msra.mxu1 %v7026_v54  ;;  %v7055_v54 = vld [vmem:[%s8040_s2 + $0xb4] sm:$0xf0]  ;;  %v6803_v50 = vld [vmem:[%s8040_s2 + $0x50] sm:$0xf0]  ;;  %v7041_v43 = vld [vmem:[%s8040_s2 + $0x4c] sm:$0xf] }
 0x9c1   : > { %6038 = vmatpush.bf16.msra.mxu0 %v6874_v31  ;;  %v7043_v37 = vld [vmem:[%s8040_s2 + $0x54] sm:$0xf0]  ;;  %v6811_v32 = vld [vmem:[%s8040_s2 + $0x58] sm:$0xf0]  ;;  %v6785_v24 = vld [vmem:[%s8040_s2 + $0x20] sm:$0xf]  ;;  %v6806_v58 = vor.u32 %v7040_v21, %v6803_v50 }
 0x9c2   : > { %6010 = vmatpush.bf16.msra.mxu2 %v6866_v25  ;;  %v6802_v25 = vor.u32 %v7042_v6, %v6801_v56  ;;  %v6787_v52 = vld [vmem:[%s8040_s2 + $0x30] sm:$0xf0]  ;;  %v6814_v45 = vor.u32 %v7041_v43, %v6811_v32  ;;  %v6793_v20 = vld [vmem:[%s8040_s2 + $0x28] sm:$0xf]  ;;  %v7039_v38 = vld [vmem:[%s8040_s2 + $0x34] sm:$0xf0] }
 0x9c3   : > { %v6795_v9 = vld [vmem:[%s8040_s2 + $0x38] sm:$0xf0]  ;;  %v7070_v43 = vld [vmem:[%s8058_s22 + $0x30] sm:$0xff] }
 0x9c4   : > { %5768 = vmatpush.bf16.msra.mxu1 %v7025_v62  ;;  %v6858_v62 = vor.u32 %v7055_v54, %v6857_v11  ;;  %v6794_v11 = vor.u32 %v7039_v38, %v6793_v20  ;;  %v6769_v54 = vld [vmem:[%s8040_s2] sm:$0xf]  ;;  %v7078_v32 = vld [vmem:[%s8058_s22 + $0x70] sm:$0xff] }
 0x9c6   : > { %6011 = vmatpush.bf16.msra.mxu2 %v6850_v46  ;;  %6039 = vmatpush.bf16.msra.mxu0 %v6858_v62  ;;  %v7034_v62 = vld [vmem:[%s8040_s2 + $0xc] sm:$0xf0] }
 0x9c8   : > { %5769 = vmatpush.bf16.msra.mxu1 %v7024_v23  ;;  %v7053_v23 = vld [vmem:[%s8040_s2 + $0xac] sm:$0xf] }
 0x9cc   : > { %6051 = vmatpush.bf16.msrb.mxu1 %v6894_v3  ;;  %v6809_v3 = vld [vmem:[%s8040_s2 + $0x48] sm:$0xf] }
 0x9cd   : > { %v6810_v17 = vor.u32 %v7043_v37, %v6809_v3  ;;  %v7071_v3 = vld [vmem:[%s8058_s22 + $0x38] sm:$0xff] }
 0x9ce   : > { %v7079_v37 = vld [vmem:[%s8058_s22 + $0x78] sm:$0xff] }
 0x9d0   : > { %6052 = vmatpush.bf16.msrb.mxu1 %v6878_v19  ;;  %v7037_v19 = vld [vmem:[%s8040_s2 + $0x2c] sm:$0xf] }
 0xa18   : > { %v7524_v22 = vpop.permute.xlu2 %7523 }
 0xa19   : > { %v7526_v15 = vunpack.i.h.bf16 %v7524_v22  ;;  %v7525_v55 = vunpack.i.l.bf16 %v7524_v22  ;;  %v6859_v22 = vld [vmem:[%s8040_s2 + $0xb8] sm:$0xf0] }
 0xa1b   : > { %v5690_v27 = vsel %vm4674_vm5, %v5658_v59, %v7526_v15  ;;  %v5689_v34 = vsel %vm4674_vm5, %v5604_v12, %v7525_v55  ;;  %v7052_v59 = vld [vmem:[%s8040_s2 + $0xa4] sm:$0xf]  ;;  %v6862_v15 = vor.u32 %v7053_v23, %v6859_v22  ;;  %v7050_v55 = vld [vmem:[%s8040_s2 + $0x8c] sm:$0xf0]  ;;  %v7051_v12 = vld [vmem:[%s8040_s2 + $0x94] sm:$0xf0] }
 0xa1c   : > { %v6854_v0 = vor.u32 %v7052_v59, %v6851_v2  ;;  %v7032_v23 = vld [vmem:[%s8040_s2 + $0x4] sm:$0xf] }
 0xa1d   : > { %6053 = vmatpush.bf16.msrb.mxu1 %v6862_v15  ;;  %v6771_v15 = vld [vmem:[%s8040_s2 + $0x10] sm:$0xf0] }
 0xa1e   : > { %6025 = vmatpush.bf16.msrb.mxu3 %v6854_v0 }
 0xa2e   : > { %v7534_v60 = vpop.permute.xlu0 %7533 }
 0xa2f   : > { %v7536_v1 = vunpack.i.h.bf16 %v7534_v60  ;;  %v7535_v29 = vunpack.i.l.bf16 %v7534_v60  ;;  %v7529_v42 = vpop.permute.xlu1 %7528  ;;  %v7048_v60 = vld [vmem:[%s8040_s2 + $0x84] sm:$0xf] }
 0xa30   : > { %v7531_v33 = vunpack.i.h.bf16 %v7529_v42  ;;  %v7530_v44 = vunpack.i.l.bf16 %v7529_v42  ;;  %v6841_v42 = vld [vmem:[%s8040_s2 + $0x88] sm:$0xf] }
 0xa32   : > { %v5692_v47 = vsel %vm5691_vm4, %v5689_v34, %v7530_v44  ;;  %v5693_v53 = vsel %vm5691_vm4, %v5690_v27, %v7531_v33  ;;  %v7049_v33 = vld [vmem:[%s8040_s2 + $0x8c] sm:$0xf]  ;;  %v6842_v27 = vor.u32 %v7051_v12, %v6841_v42  ;;  %v6843_v34 = vld [vmem:[%s8040_s2 + $0x98] sm:$0xf0] }
 0xa33   : > { %v5695_v49 = vsel %vm5694_vm12, %v5692_v47, %v7535_v29  ;;  %v5696_v28 = vsel %vm5694_vm12, %v5693_v53, %v7536_v1  ;;  %v6835_v1 = vld [vmem:[%s8040_s2 + $0x90] sm:$0xf0]  ;;  %v6834_v29 = vor.u32 %v7050_v55, %v6833_v35  ;;  %v6817_v47 = vld [vmem:[%s8040_s2 + $0x60] sm:$0xf]  ;;  %v7046_v53 = vld [vmem:[%s8040_s2 + $0x6c] sm:$0xf0]  ;;  %v6798_v35 = vor.u32 %v7037_v19, %v6795_v9 }
 0xa34   : > { %v5697_v39 = vpack.c.bf16 %v5696_v28, %v5695_v49  ;;  %v6838_v44 = vor.u32 %v7048_v60, %v6835_v1  ;;  %v6846_v28 = vor.u32 %v7049_v33, %v6843_v34  ;;  %v6818_v63 = vor.u32 %v7046_v53, %v6817_v47  ;;  %6040 = vmatpush.bf16.msra.mxu0 %v6842_v27  ;;  %v6777_v55 = vld [vmem:[%s8040_s2 + $0x8] sm:$0xf]  ;;  %v7035_v60 = vld [vmem:[%s8040_s2 + $0x14] sm:$0xf0]  ;;  %v7033_v1 = vld [vmem:[%s8040_s2 + $0xc] sm:$0xf] }
 0xa35   : > { %6012 = vmatpush.bf16.msra.mxu2 %v6834_v29  ;;  %v6779_v29 = vld [vmem:[%s8040_s2 + $0x18] sm:$0xf0]  ;;  %v6770_v33 = vor.u32 %v7034_v62, %v6769_v54  ;;  %v6778_v27 = vor.u32 %v7035_v60, %v6777_v55  ;;  %v7068_v19 = vld [vmem:[%s8058_s22 + $0x20] sm:$0xff] }
 0xa36   : > { %5770 = vmatmul.bf16.vlgmr.msra.gmra.mxu1 %v5697_v39  ;;  %v7044_v39 = vld [vmem:[%s8040_s2 + $0x64] sm:$0xf]  ;;  %6026 = vmatpush.bf16.msrb.mxu3 %v6838_v44  ;;  %v6774_v44 = vor.u32 %v7032_v23, %v6771_v15  ;;  %v6782_v47 = vor.u32 %v7033_v1, %v6779_v29  ;;  %v7067_v54 = vld [vmem:[%s8058_s22 + $0x18] sm:$0xff] }
 0xa37   : > { %6054 = vmatpush.bf16.msrb.mxu1 %v6846_v28  ;;  %v7076_v9 = vld [vmem:[%s8058_s22 + $0x60] sm:$0xff]  ;;  %v7075_v62 = vld [vmem:[%s8058_s22 + $0x58] sm:$0xff] }
 0xa39   : > { %6013 = vmatpush.bf16.msra.mxu2 %v6818_v63 }
 0xa3d   : > { %6014 = vmatpush.bf16.msra.mxu2 %v6802_v25 }
 0xab3   : > { %v5771_v57 = vpop.f32.mrf.mxu1 }
 0xab4   : > { %v10117_v36 = vadd.f32 %v7597_v7, %v5771_v57  ;;  %v6819_v57 = vld [vmem:[%s8040_s2 + $0x70] sm:$0xf0]  ;;  %v6825_v7 = vld [vmem:[%s8040_s2 + $0x68] sm:$0xf] }
 0xab5   : > { %v6822_v18 = vor.u32 %v7044_v39, %v6819_v57 }
 0xab6   : > { %v5779_v51 = vmul.f32 %v10117_v36, %v10117_v36 }
 0xab7   : > { %6027 = vmatpush.bf16.msrb.mxu3 %v6822_v18 }
 0xab8   : > { %5781 = vadd.xlane.f32.xlu1 %v5779_v51 }
 0xabb   : > { %v5773_v10 = vpop.f32.mrf.mxu1  ;;  %6028 = vmatpush.bf16.msrb.mxu3 %v6806_v58  ;;  %v7069_v58 = vld [vmem:[%s8058_s22 + $0x28] sm:$0xff] }
 0xabc   : > { %v10124_v4 = vadd.f32 %v7598_v13, %v5773_v10  ;;  %v7047_v10 = vld [vmem:[%s8040_s2 + $0x74] sm:$0xf0]  ;;  %v7045_v13 = vld [vmem:[%s8040_s2 + $0x6c] sm:$0xf] }
 0xabd   : > { %v6826_v30 = vor.u32 %v7047_v10, %v6825_v7 }
 0xabe   : > { %v5780_v16 = vmul.f32 %v10124_v4, %v10124_v4 }
 0xabf   : > { %6041 = vmatpush.bf16.msra.mxu0 %v6826_v30 }
 0xac0   : > { %5783 = vadd.xlane.f32.xlu2 %v5780_v16  ;;  %v6827_v16 = vld [vmem:[%s8040_s2 + $0x78] sm:$0xf0] }
 0xac1   : > { %v6830_v14 = vor.u32 %v7045_v13, %v6827_v16 }
 0xac3   : > { %6055 = vmatpush.bf16.msrb.mxu1 %v6830_v14  ;;  %6042 = vmatpush.bf16.msra.mxu0 %v6810_v17  ;;  %v7077_v17 = vld [vmem:[%s8058_s22 + $0x68] sm:$0xff] }
 0xac7   : > { %6056 = vmatpush.bf16.msrb.mxu1 %v6814_v45  ;;  %6043 = vmatpush.bf16.msra.mxu0 %v6794_v11 }
 0xacb   : > { %6057 = vmatpush.bf16.msrb.mxu1 %v6798_v35  ;;  %6044 = vmatpush.bf16.msra.mxu0 %v6778_v27 }
 0xacf   : > { %6058 = vmatpush.bf16.msrb.mxu1 %v6782_v47  ;;  %v7074_v47 = vld [vmem:[%s8058_s22 + $0x50] sm:$0xff] }
 0xb2b   : > { %v5782_v61 = vpop.xlane.xlu1 %5781 }
 0xb2c   : > { %v5785_v48 = vmul.f32 %v5782_v61, %v10519_v26 }
 0xb2e   : > { %v10149_v5 = vadd.f32 1e-06, %v5785_v48  ;;  %v7036_v48 = vld [vmem:[%s8040_s2 + $0x24] sm:$0xf] }
 0xb2f   : > { %v6790_v0 = vor.u32 %v7036_v48, %v6787_v52 }
 0xb30   : > { %7577 = vrsqrt.f32 %v10149_v5  ;;  %vm5795_vm5 = vweird.f32 %v10149_v5 }
 0xb31   : > { %6029 = vmatpush.bf16.msrb.mxu3 %v6790_v0 }
 0xb33   : > { %v5784_v49 = vpop.xlane.xlu2 %5783 }
 0xb34   : > { %v5786_v51 = vmul.f32 %v5784_v49, %v10519_v26  ;;  %v7038_v26 = vld [vmem:[%s8040_s2 + $0x2c] sm:$0xf0] }
 0xb35   : > { %v6786_v2 = vor.u32 %v7038_v26, %v6785_v24  ;;  %6030 = vmatpush.bf16.msrb.mxu3 %v6774_v44 }
 0xb36   : > { %v10174_v8 = vpop.eup %7577  ;;  %v10176_v40 = vadd.f32 1e-06, %v5786_v51 }
 0xb37   : > { %v5790_v41 = vmul.f32 %v10174_v8, %v10149_v5  ;;  %vm5796_vm3 = vweird.f32 %v10174_v8  ;;  %6015 = vmatpush.bf16.msra.mxu2 %v6786_v2  ;;  %v7538_v5 = vld [vmem:[%s558_s12] ss:$0 sm:$0xff] }
 0xb38   : > { %7579 = vrsqrt.f32 %v10176_v40  ;;  %vm5797_vm13 = vmor %vm5795_vm5, %vm5796_vm3  ;;  %vm5805_vm15 = vweird.f32 %v10176_v40 }
 0xb39   : > { %v5791_v61 = vmul.f32 %v10174_v8, %v5790_v41  ;;  %6293 = vmatpush.bf16.msra.mxu3 %v7079_v37 }
 0xb3b   : > { %v5792_v31 = vmul.f32 0.5, %v5791_v61  ;;  %6016 = vmatpush.bf16.msra.mxu2 %v6770_v33 }
 0xb3d   : > { %v5793_v59 = vsub.f32 1.5, %v5792_v31  ;;  %6294 = vmatpush.bf16.msra.mxu3 %v7078_v32 }
 0xb3e   : > { %v7580_v46 = vpop.eup %7579 }
 0xb3f   : > { %v5800_v22 = vmul.f32 %v7580_v46, %v10176_v40  ;;  %v5794_v42 = vmul.f32 %v10174_v8, %v5793_v59  ;;  %vm5806_vm14 = vweird.f32 %v7580_v46  ;;  %6279 = vmatpush.bf16.msrb.mxu2 %v7071_v3 }
 0xb40   : > { %vm5807_vm0 = vmor %vm5805_vm15, %vm5806_vm14 }
 0xb41   : > { %v5801_v12 = vmul.f32 %v7580_v46, %v5800_v22  ;;  %v5798_v53 = vsel %vm5797_vm13, %v10174_v8, %v5794_v42  ;;  %6295 = vmatpush.bf16.msra.mxu3 %v7077_v17  ;;  %v7072_v17 = vld [vmem:[%s8058_s22 + $0x40] sm:$0xff] }
 0xb42   : > { %v5809_v39 = vmul.f32 %v5798_v53, %v10117_v36 }
 0xb43   : > { %v5802_v34 = vmul.f32 0.5, %v5801_v12  ;;  %6280 = vmatpush.bf16.msrb.mxu2 %v7070_v43 }
 0xb44   : > { %v5814_v51 = vmul.f32 %v7538_v5, %v5809_v39 }
 0xb45   : > { %v5803_v49 = vsub.f32 1.5, %v5802_v34  ;;  %6296 = vmatpush.bf16.msra.mxu3 %v7076_v9  ;;  %v7066_v34 = vld [vmem:[%s8058_s22 + $0x10] sm:$0xff] }
 0xb47   : > { %v5804_v28 = vmul.f32 %v7580_v46, %v5803_v49  ;;  %6281 = vmatpush.bf16.msrb.mxu2 %v7069_v58 }
 0xb49   : > { %v5808_v57 = vsel %vm5807_vm0, %v7580_v46, %v5804_v28  ;;  %6297 = vmatpush.bf16.msra.mxu3 %v7075_v62 }
 0xb4a   : > { %v5810_v7 = vmul.f32 %v5808_v57, %v10124_v4 }
 0xb4b   : > { %6282 = vmatpush.bf16.msrb.mxu2 %v7068_v19 }
 0xb4c   : > { %v5815_v10 = vmul.f32 %v7538_v5, %v5810_v7 }
 0xb4d   : > { %6298 = vmatpush.bf16.msra.mxu3 %v7074_v47 }
 0xb4e   : > { %v5816_v13 = vpack.c.bf16 %v5815_v10, %v5814_v51 }
 0xb4f   : > { %6283 = vmatpush.bf16.msrb.mxu2 %v7067_v54 }
 0xb50   : > { %6017 = vmatmul.bf16.vlgmr.msra.gmra.mxu2 %v5816_v13  ;;  %6031 = vmatmul.bf16.vlgmr.msrb.gmra.mxu3 %v5816_v13 }
 0xb51   : > { %6045 = vmatmul.bf16.vlgmr.msra.gmra.mxu0 %v5816_v13  ;;  %6059 = vmatmul.bf16.vlgmr.msrb.gmra.mxu1 %v5816_v13 }
 0xb53   : > { %6284 = vmatpush.bf16.msrb.mxu2 %v7066_v34 }
 0xbce   : > { %v6046_v35 = vpop.f32.mrf.mxu0  ;;  %v6060_v53 = vpop.f32.mrf.mxu1 }
 0xbd3   : > { %v10218_v16 = vpop.f32.mrf.mxu2  ;;  %v10220_v63 = vpop.f32.mrf.mxu3 }
 0xbd4   : > { %v6895_v56 = vmul.f32 -1.442695, %v10218_v16  ;;  %v6896_v8 = vmul.f32 -1.442695, %v10220_v63 }
 0xbd6   : > { %7581 = vpow2.f32 %v6895_v56 }
 0xbd7   : > { %7583 = vpow2.f32 %v6896_v8 }
 0xbdb   : > { %v10224_v40 = vpop.f32.mrf.mxu2  ;;  %v10227_v6 = vpop.f32.mrf.mxu3 }
 0xbdc   : > { %v7582_v18 = vpop.eup %7581  ;;  %v6897_v30 = vmul.f32 -1.442695, %v10224_v40  ;;  %v6898_v14 = vmul.f32 -1.442695, %v10227_v6 }
 0xbdd   : > { %v7584_v21 = vpop.eup %7583  ;;  %v10229_v41 = vadd.f32 1.0, %v7582_v18 }
 0xbde   : > { %v10232_v50 = vadd.f32 1.0, %v7584_v21  ;;  %7585 = vpow2.f32 %v6897_v30  ;;  %v7065_v21 = vld [vmem:[%s8058_s22 + $0x8] sm:$0xff] }
 0xbdf   : > { %7587 = vrcp.f32 %v10229_v41  ;;  %v6092_v11 = vand.u32 2147483648, %v10229_v41  ;;  %vm6086_vm2 = vweird.f32 %v10229_v41  ;;  %v6090_v23 = vand.u32 2147483647, %v10229_v41  ;;  %6285 = vmatpush.bf16.msrb.mxu2 %v7065_v21 }
 0xbe0   : > { %7589 = vrcp.f32 %v10232_v50  ;;  %v6105_v60 = vand.u32 2147483647, %v10232_v50  ;;  %v6107_v42 = vand.u32 2147483648, %v10232_v50  ;;  %vm6101_vm8 = vweird.f32 %v10232_v50 }
 0xbe1   : > { %7591 = vpow2.f32 %v6898_v14  ;;  %v6093_v33 = vor.u32 1.1754944e-38, %v6092_v11  ;;  %vm6091_vm9 = vcmp.eq.f32.partialorder %v6090_v23, 8.507059e+37 }
 0xbe2   : > { %vm10287_vm4 = vcmp.eq.f32.partialorder %v6105_v60, 8.507059e+37  ;;  %v6108_v10 = vor.u32 1.1754944e-38, %v6107_v42 }
 0xbe4   : > { %v7586_v61 = vpop.eup %7585 }
 0xbe5   : > { %v7588_v25 = vpop.eup %7587  ;;  %v10240_v24 = vadd.f32 1.0, %v7586_v61 }
 0xbe6   : > { %v10244_v26 = vpop.eup %7589  ;;  %v6082_v48 = vmul.f32 %v7588_v25, %v10229_v41  ;;  %vm6087_vm1 = vweird.f32 %v7588_v25  ;;  %v7073_v41 = vld [vmem:[%s8058_s22 + $0x48] sm:$0xff] }
 0xbe7   : > { %v7592_v52 = vpop.eup %7591  ;;  %v6097_v31 = vmul.f32 %v10244_v26, %v10232_v50  ;;  %7593 = vrcp.f32 %v10240_v24  ;;  %vm10262_vm6 = vmor %vm6086_vm2, %vm6087_vm1  ;;  %vm6102_vm7 = vweird.f32 %v10244_v26  ;;  %v6122_v44 = vand.u32 2147483648, %v10240_v24  ;;  %6299 = vmatpush.bf16.msra.mxu3 %v7073_v41 }
 0xbe8   : > { %v6083_v45 = vsub.f32 1.0, %v6082_v48  ;;  %v10250_v20 = vadd.f32 1.0, %v7592_v52  ;;  %vm10279_vm10 = vmor %vm6101_vm8, %vm6102_vm7  ;;  %v6120_v39 = vand.u32 2147483647, %v10240_v24  ;;  %vm6116_vm12 = vweird.f32 %v10240_v24 }
 0xbe9   : > { %v6098_v38 = vsub.f32 1.0, %v6097_v31  ;;  %v6123_v8 = vor.u32 1.1754944e-38, %v6122_v44 }
 0xbea   : > { %v6084_v59 = vmul.f32 %v7588_v25, %v6083_v45  ;;  %7595 = vrcp.f32 %v10250_v20  ;;  %v6137_v56 = vand.u32 2147483648, %v10250_v20  ;;  %v6135_v30 = vand.u32 2147483647, %v10250_v20  ;;  %v6062_v45 = vpop.f32.mrf.mxu1 }
 0xbeb   : > { %v6099_v2 = vmul.f32 %v10244_v26, %v6098_v38  ;;  %vm6121_vm13 = vcmp.eq.f32.partialorder %v6120_v39, 8.507059e+37  ;;  %vm6131_vm14 = vweird.f32 %v10250_v20  ;;  %6300 = vmatpush.bf16.msra.mxu3 %v7072_v17 }
 0xbec   : > { %v6085_v46 = vadd.f32 %v7588_v25, %v6084_v59  ;;  %v6138_v61 = vor.u32 1.1754944e-38, %v6137_v56  ;;  %vm6136_vm0 = vcmp.eq.f32.partialorder %v6135_v30, 8.507059e+37 }
 0xbed   : > { %v7594_v0 = vpop.eup %7593  ;;  %v6100_v55 = vadd.f32 %v10244_v26, %v6099_v2 }
 0xbee   : > { %v6112_v22 = vmul.f32 %v7594_v0, %v10240_v24  ;;  %v6089_v29 = vsel %vm10262_vm6, %v7588_v25, %v6085_v46  ;;  %vm6117_vm11 = vweird.f32 %v7594_v0  ;;  %v6048_v24 = vpop.f32.mrf.mxu0 }
 0xbef   : > { %v6094_v5 = vsel %vm6091_vm9, %v6093_v33, %v6089_v29  ;;  %v6104_v57 = vsel %vm10279_vm10, %v10244_v26, %v6100_v55  ;;  %vm6118_vm3 = vmor %vm6116_vm12, %vm6117_vm11 }
 0xbf0   : > { %v7596_v1 = vpop.eup %7595  ;;  %v6113_v12 = vsub.f32 1.0, %v6112_v22  ;;  %v6141_v14 = vmul.f32 %v6094_v5, %v10218_v16  ;;  %v6109_v50 = vsel %vm10287_vm4, %v6108_v10, %v6104_v57  ;;  %v7064_v16 = vld [vmem:[%s8058_s22] sm:$0xff] }
 0xbf1   : > { %v6127_v27 = vmul.f32 %v7596_v1, %v10250_v20  ;;  %vm6132_vm5 = vweird.f32 %v7596_v1  ;;  %v6142_v25 = vmul.f32 %v6109_v50, %v10220_v63  ;;  %6286 = vmatpush.bf16.msrb.mxu2 %v7064_v16 }
 0xbf2   : > { %v6114_v28 = vmul.f32 %v7594_v0, %v6113_v12  ;;  %vm6133_vm15 = vmor %vm6131_vm14, %vm6132_vm5  ;;  %v6145_v26 = vmul.f32 %v6141_v14, %v6046_v35 }
 0xbf3   : > { %v6128_v51 = vsub.f32 1.0, %v6127_v27  ;;  %v6146_v38 = vmul.f32 %v6142_v25, %v6060_v53 }
 0xbf4   : > { %v6115_v13 = vadd.f32 %v7594_v0, %v6114_v28 }
 0xbf5   : > { %v6129_v18 = vmul.f32 %v7596_v1, %v6128_v51 }
 0xbf6   : > { %v6119_v3 = vsel %vm6118_vm3, %v7594_v0, %v6115_v13 }
 0xbf7   : > { %v6124_v37 = vsel %vm6121_vm13, %v6123_v8, %v6119_v3  ;;  %v6130_v43 = vadd.f32 %v7596_v1, %v6129_v18 }
 0xbf8   : > { %v6143_v32 = vmul.f32 %v6124_v37, %v10224_v40 }
 0xbf9   : > { %v6134_v58 = vsel %vm6133_vm15, %v7596_v1, %v6130_v43 }
 0xbfa   : > { %v6147_v48 = vmul.f32 %v6143_v32, %v6048_v24  ;;  %v6139_v52 = vsel %vm6136_vm0, %v6138_v61, %v6134_v58 }
 0xbfb   : > { %v6144_v31 = vmul.f32 %v6139_v52, %v10227_v6 }
 0xbfc   : > { %v6149_v20 = vpack.c.bf16 %v6147_v48, %v6145_v26 }
 0xbfd   : > { %v6148_v40 = vmul.f32 %v6144_v31, %v6062_v45 }
 0xbfe   : > { %6287 = vmatmul.bf16.vlgmr.msrb.gmra.mxu2 %v6149_v20 }
 0xbff   : > { %v6150_v19 = vpack.c.bf16 %v6148_v40, %v6146_v38 }
 0xc01   : > { %6301 = vmatmul.bf16.vlgmr.msra.gmra.mxu3 %v6150_v19 }
 0xc81   : > { %v6288_v63 = vpop.f32.mrf.mxu2 }
 0xc84   : > { %v6302_v9 = vpop.f32.mrf.mxu3 }
 0xc85   : > { %v6303_v59 = vadd.f32 %v6302_v9, %v6288_v63 }
 0xc87   : > { %v6307_v2 = vadd.f32 %v6303_v59, %v10117_v36 }
 0xc89   : > { %6309 = vst [vmem:[%s10337_s11] sm:$0xff] %v6307_v2  ;;  %v6290_v46 = vpop.f32.mrf.mxu2 }
 0xc8c   : > { %v6304_v6 = vpop.f32.mrf.mxu3 }
 0xc8d   : > { %v6305_v0 = vadd.f32 %v6304_v6, %v6290_v46 }
 0xc8f   : > { %v6308_v11 = vadd.f32 %v6305_v0, %v10124_v4 }
 0xc91   : > { %6310 = vst [vmem:[%s10337_s11 + $0x8] sm:$0xff] %v6308_v11 }
 0xc92 PF: > { %s10526_s20 = sld [smem:[#allocation14_spill]]  ;;  %s10529_s17 = smov %s7783_s18 }
 0xc93   : > { %s10527_s29 = sld [smem:[#allocation13_spill]] }
 0xc94   : > { %s10528_s19 = sld [smem:[#allocation15_spill]] }
 0xc98   : > { %p25_p7 = scmp.ge.s32.totalorder %s10526_s20, 4  }
 0xc99   : > { %s10530_s18 = smov %s10527_s29 }
 0xc9a   :  { %27 = sbr.rel (!%p25_p7) target bundleno = 13 (0xd), region = 150 }
 0xc9f   :  { %6322 = vsyncpa [#allocation3], 1 }
 0xca0   :  { %6324 = vsyncpa [#allocation3 + $0x1], 1 }
 0xca1   :  { %6325 = vsyncpa [#allocation5], 1 }
 0xca2   :  { %6327 = vsyncpa [#allocation5 + $0x1], 1 }
 0xca3   :  { %6328 = vsyncpa [#allocation8], 1 }
 0xca4   :  { %6330 = vsyncpa [#allocation8 + $0x1], 1 }

</bundles_post_ra>
